<compile_context>
chip_gen: v7x
topology: tpu7x:2x2x1
jax: 0.10.0
libtpu: 0.0.40
codegen_flags: <defaults>
</compile_context>

<pallas_src>
import math

import jax
import jax.numpy as jnp
from jax.experimental import pallas as pl
from jax.experimental.pallas import tpu as pltpu

# -----------------------------------------------------------------------------
# Small config consistent with ActionRecognitionTransformer.forward
# (original: num_classes=400, d_model=512, nhead=8, num_layers=6, ffn=2048,
#  feature_dim=960 -- shrunk here but with identical structure/semantics)
# -----------------------------------------------------------------------------
NUM_CLASSES = 16
D_MODEL     = 32
NHEAD       = 4
HEAD_DIM    = D_MODEL // NHEAD
NUM_LAYERS  = 2
DIM_FF      = 64
FEATURE_DIM = 64          # stand-in for mobilenet's 960-dim feature vector
MAX_SEQ     = 16
LN_EPS      = 1e-5

B, S        = 2, 8        # batch, frames per clip
C, H, W     = 3, 16, 16   # per-frame image (NCHW like PyTorch)
BS          = B * S

# Head-padded QKV packing: each head's Q / K / V block is zero-padded to a full
# 128-lane group so every per-head slice in the kernel is a lane-aligned view.
LANE_PAD    = 128
HEAD_STRIDE = 3 * LANE_PAD            # per-head [Q | K | V] slab width
QKV_COLS    = NHEAD * HEAD_STRIDE     # 1536

# Row layout of the per-layer "w2lv" slab: rows [0, DIM_FF) hold W2, then:
ROW_BO    = DIM_FF + 0    # attention output-projection bias
ROW_B2    = DIM_FF + 1    # FFN second-linear bias
ROW_LN1G  = DIM_FF + 2
ROW_LN1B  = DIM_FF + 3
ROW_LN2G  = DIM_FF + 4
ROW_LN2B  = DIM_FF + 5
ROW_CLSG  = DIM_FF + 6    # classifier LayerNorm gamma (valid in layer-0 slab only)
ROW_CLSB  = DIM_FF + 7    # classifier LayerNorm beta  (valid in layer-0 slab only)
W2LV_ROWS = DIM_FF + 8


# -----------------------------------------------------------------------------
# One fused kernel for the whole forward pass
# -----------------------------------------------------------------------------
def fused_forward_kernel(
    x_ref,         # (B*S, C*H*W)              flattened frames, f32
    bbw_ref,       # (C*H*W, F)                backbone weight (mean-pool folded), bf16
    projw_ref,     # (F, D)                    feature projection weight, f32
    addpe_ref,     # (B*S, D)                  pos.enc + (bbb @ projw + projb), pre-tiled
    maskpool_ref,  # (B*S + B, B*S)            rows [0,BS): block-diag attn bias;
                   #                           rows [BS,BS+B): per-clip mean-pool matrix
    qkvw_ref,      # (L, D+1, QKV_COLS)        head-padded QKV weights (row D = bias),
                   #                           1/sqrt(head_dim) folded into Q columns
    wopad_ref,     # (L, NHEAD*128, D)         head-padded output projection
    ffn1_ref,      # (L, D+1, FF)              W1 with b1 appended as last row
    w2lv_ref,      # (L, W2LV_ROWS, D)         W2 + per-layer bias/LN rows (+ cls LN in l=0)
    clswb_ref,     # (D+1, NUM_CLASSES)        classifier weight with bias appended
    out_ref,       # (B, NUM_CLASSES)
):
    # TODO(synk): full MobileNetV3-Large conv stack not reimplemented; this is a
    # deterministic global-average-pool + linear stand-in (pool folded into bbw).
    # Backbone stand-in: bf16 MXU operands, f32 accumulate.
    feats = jnp.dot(x_ref[...].astype(jnp.bfloat16), bbw_ref[...],
                    preferred_element_type=jnp.float32)              # (BS, F)

    # Feature projection; backbone bias, projection bias and positional encoding
    # were folded into one additive term at init time.
    h = jnp.dot(feats, projw_ref[...],
                preferred_element_type=jnp.float32) + addpe_ref[...]  # (BS, D)

    bias = maskpool_ref[0:BS, :]        # block-diagonal additive attention mask

    # Static unroll is fine at NUM_LAYERS=2 (switch to lax.fori_loop with dynamic
    # ref[l] indexing if this grows to 6 layers, to bound live ranges).
    for l in range(NUM_LAYERS):
        # Fused, head-padded QKV projection (scale already folded into Q columns).
        qkv = (jnp.dot(h, qkvw_ref[l, 0:D_MODEL, :],
                       preferred_element_type=jnp.float32)
               + qkvw_ref[l, D_MODEL:D_MODEL + 1, :])                 # (BS, QKV_COLS)

        attn = None
        for hh in range(NHEAD):                      # static head loop
            base = hh * HEAD_STRIDE
            qh = qkv[:, base                 : base +     LANE_PAD]   # lane-aligned views
            kh = qkv[:, base +     LANE_PAD  : base + 2 * LANE_PAD]
            vh = qkv[:, base + 2 * LANE_PAD  : base + 3 * LANE_PAD]

            # q @ k^T without an explicit transpose: contract last dims of both.
            s = jax.lax.dot_general(qh, kh, (((1,), (1,)), ((), ())),
                                    preferred_element_type=jnp.float32) + bias
            s = s - jnp.max(s, axis=-1, keepdims=True)    # kept: needed for -1e30 mask
            p = jnp.exp(s)
            p = p * pl.reciprocal(jnp.sum(p, axis=-1, keepdims=True), approx=True)

            head_out = jnp.dot(p, vh, preferred_element_type=jnp.float32)  # (BS, 128)
            # Accumulate straight into the output projection (no concat): the
            # padded Wo row-slab for this head starts at a 128-row boundary.
            contrib = jnp.dot(head_out,
                              wopad_ref[l, hh * LANE_PAD:(hh + 1) * LANE_PAD, :],
                              preferred_element_type=jnp.float32)          # (BS, D)
            attn = contrib if attn is None else attn + contrib
        attn = attn + w2lv_ref[l, ROW_BO:ROW_BO + 1, :]

        # residual + LayerNorm1 (post-norm, eval-mode dropout == identity)
        r1 = h + attn
        mu1 = jnp.mean(r1, axis=-1, keepdims=True)
        var1 = jnp.mean((r1 - mu1) ** 2, axis=-1, keepdims=True)
        y = ((r1 - mu1) * jax.lax.rsqrt(var1 + LN_EPS)
             * w2lv_ref[l, ROW_LN1G:ROW_LN1G + 1, :]
             + w2lv_ref[l, ROW_LN1B:ROW_LN1B + 1, :])

        # FFN (relu) + residual + LayerNorm2
        f1 = jnp.maximum(
            jnp.dot(y, ffn1_ref[l, 0:D_MODEL, :],
                    preferred_element_type=jnp.float32)
            + ffn1_ref[l, D_MODEL:D_MODEL + 1, :], 0.0)
        f2 = (jnp.dot(f1, w2lv_ref[l, 0:DIM_FF, :],
                      preferred_element_type=jnp.float32)
              + w2lv_ref[l, ROW_B2:ROW_B2 + 1, :])
        r2 = y + f2
        mu2 = jnp.mean(r2, axis=-1, keepdims=True)
        var2 = jnp.mean((r2 - mu2) ** 2, axis=-1, keepdims=True)
        h = ((r2 - mu2) * jax.lax.rsqrt(var2 + LN_EPS)
             * w2lv_ref[l, ROW_LN2G:ROW_LN2G + 1, :]
             + w2lv_ref[l, ROW_LN2B:ROW_LN2B + 1, :])

    # Mean over sequence (tiny matmul with precomputed pooling rows), LayerNorm,
    # classifier Linear.  Only these (B, NUM_CLASSES) logits ever hit HBM.
    pooled = jnp.dot(maskpool_ref[BS:BS + B, :], h,
                     preferred_element_type=jnp.float32)               # (B, D)
    mu = jnp.mean(pooled, axis=-1, keepdims=True)
    var = jnp.mean((pooled - mu) ** 2, axis=-1, keepdims=True)
    yc = ((pooled - mu) * jax.lax.rsqrt(var + LN_EPS)
          * w2lv_ref[0, ROW_CLSG:ROW_CLSG + 1, :]
          + w2lv_ref[0, ROW_CLSB:ROW_CLSB + 1, :])
    out_ref[...] = (jnp.dot(yc, clswb_ref[0:D_MODEL, :],
                            preferred_element_type=jnp.float32)
                    + clswb_ref[D_MODEL:D_MODEL + 1, :])


# -----------------------------------------------------------------------------
# Parameters (deterministic, synthetic), pre-packed for the fused kernel
# -----------------------------------------------------------------------------
def positional_encoding(max_len, d_model):
    position = jnp.arange(max_len, dtype=jnp.float32)[:, None]
    div_term = jnp.exp(jnp.arange(0, d_model, 2, dtype=jnp.float32)
                       * (-math.log(10000.0) / d_model))
    pe = jnp.zeros((max_len, d_model), jnp.float32)
    pe = pe.at[:, 0::2].set(jnp.sin(position * div_term))
    pe = pe.at[:, 1::2].set(jnp.cos(position * div_term))
    return pe


def init_params(key):
    ks = iter(jax.random.split(key, 64))

    def w(shape, scale=0.05):
        return (scale * jax.random.normal(next(ks), shape)).astype(jnp.float32)

    # Backbone stand-in: per-channel spatial mean folded into one (CHW, F) matrix.
    bb_w = w((C, FEATURE_DIM))
    bbw_full = (jnp.repeat(bb_w, H * W, axis=0) / float(H * W)).astype(jnp.float32)
    bbb = w((1, FEATURE_DIM))
    projw = w((FEATURE_DIM, D_MODEL))
    projb = w((1, D_MODEL))
    pe = positional_encoding(MAX_SEQ, D_MODEL)
    # Fold backbone bias + projection bias + positional encoding into one term.
    addpe_base = pe + (bbb @ projw + projb)                 # (MAX_SEQ, D)

    scale = 1.0 / math.sqrt(HEAD_DIM)

    qkvw, wopad, ffn1, w2lv = [], [], [], []
    for _ in range(NUM_LAYERS):
        wq, wk, wv = w((D_MODEL, D_MODEL)), w((D_MODEL, D_MODEL)), w((D_MODEL, D_MODEL))
        bq, bk, bv = w((1, D_MODEL)), w((1, D_MODEL)), w((1, D_MODEL))
        wo_l, bo_l = w((D_MODEL, D_MODEL)), w((1, D_MODEL))
        w1_l, b1_l = w((D_MODEL, DIM_FF)), w((1, DIM_FF))
        w2_l, b2_l = w((DIM_FF, D_MODEL)), w((1, D_MODEL))
        ln1g = jnp.ones((D_MODEL,), jnp.float32); ln1b = jnp.zeros((D_MODEL,), jnp.float32)
        ln2g = jnp.ones((D_MODEL,), jnp.float32); ln2b = jnp.zeros((D_MODEL,), jnp.float32)

        # Head-padded, scale-folded QKV slab: rows [0,D) weights, row D bias.
        qkv_l = jnp.zeros((D_MODEL + 1, QKV_COLS), jnp.float32)
        wo_pad_l = jnp.zeros((NHEAD * LANE_PAD, D_MODEL), jnp.float32)
        for hh in range(NHEAD):
            cs = slice(hh * HEAD_DIM, (hh + 1) * HEAD_DIM)
            base = hh * HEAD_STRIDE
            qkv_l = qkv_l.at[:D_MODEL, base:base + HEAD_DIM].set(wq[:, cs] * scale)
            qkv_l = qkv_l.at[:D_MODEL, base + LANE_PAD:base + LANE_PAD + HEAD_DIM].set(wk[:, cs])
            qkv_l = qkv_l.at[:D_MODEL, base + 2 * LANE_PAD:base + 2 * LANE_PAD + HEAD_DIM].set(wv[:, cs])
            qkv_l = qkv_l.at[D_MODEL, base:base + HEAD_DIM].set(bq[0, cs] * scale)
            qkv_l = qkv_l.at[D_MODEL, base + LANE_PAD:base + LANE_PAD + HEAD_DIM].set(bk[0, cs])
            qkv_l = qkv_l.at[D_MODEL, base + 2 * LANE_PAD:base + 2 * LANE_PAD + HEAD_DIM].set(bv[0, cs])
            wo_pad_l = wo_pad_l.at[hh * LANE_PAD:hh * LANE_PAD + HEAD_DIM, :].set(wo_l[cs, :])

        ffn1_l = jnp.concatenate([w1_l, b1_l], axis=0)       # (D+1, FF)

        w2lv_l = jnp.zeros((W2LV_ROWS, D_MODEL), jnp.float32)
        w2lv_l = w2lv_l.at[:DIM_FF, :].set(w2_l)
        w2lv_l = w2lv_l.at[ROW_BO].set(bo_l[0])
        w2lv_l = w2lv_l.at[ROW_B2].set(b2_l[0])
        w2lv_l = w2lv_l.at[ROW_LN1G].set(ln1g)
        w2lv_l = w2lv_l.at[ROW_LN1B].set(ln1b)
        w2lv_l = w2lv_l.at[ROW_LN2G].set(ln2g)
        w2lv_l = w2lv_l.at[ROW_LN2B].set(ln2b)

        qkvw.append(qkv_l); wopad.append(wo_pad_l); ffn1.append(ffn1_l); w2lv.append(w2lv_l)

    w2lv = jnp.stack(w2lv)
    # Classifier LayerNorm affine lives in the layer-0 slab (rows ROW_CLSG/ROW_CLSB).
    w2lv = w2lv.at[0, ROW_CLSG].set(jnp.ones((D_MODEL,), jnp.float32))
    w2lv = w2lv.at[0, ROW_CLSB].set(jnp.zeros((D_MODEL,), jnp.float32))

    cls_w, cls_b = w((D_MODEL, NUM_CLASSES)), w((1, NUM_CLASSES))
    clswb = jnp.concatenate([cls_w, cls_b], axis=0)          # (D+1, NC)

    # Constants that keep the fused kernel purely 2-D:
    rb = jnp.arange(BS)[:, None] // S
    cb = jnp.arange(BS)[None, :] // S
    attn_bias = jnp.where(rb == cb, 0.0, -1e30).astype(jnp.float32)       # (BS, BS)
    pool = jnp.where(cb == jnp.arange(B)[:, None], 1.0 / S, 0.0).astype(jnp.float32)  # (B, BS)
    maskpool = jnp.concatenate([attn_bias, pool], axis=0)                 # (BS+B, BS)

    return {
        "bbw": bbw_full.astype(jnp.bfloat16),    # bf16 MXU operand (largest weight DMA)
        "projw": projw,
        "addpe_base": addpe_base,
        "maskpool": maskpool,
        "qkvw": jnp.stack(qkvw),
        "wopad": jnp.stack(wopad),
        "ffn1": jnp.stack(ffn1),
        "w2lv": w2lv,
        "clswb": clswb,
    }


# -----------------------------------------------------------------------------
# Forward pass (mirrors ActionRecognitionTransformer.forward, eval mode)
# -----------------------------------------------------------------------------
def forward(x, params):
    b, s = x.shape[:2]
    assert b == B and s == S, "mask/pool constants were built for (B, S)"
    x2d = x.reshape(b * s, C * H * W)                   # x.view(-1, *x.shape[2:]) flattened
    addpe = jnp.tile(params["addpe_base"][:s], (b, 1))  # (B*S, D)

    vmem = lambda: pl.BlockSpec(memory_space=pltpu.MemorySpace.VMEM)
    return pl.pallas_call(
        fused_forward_kernel,
        out_shape=jax.ShapeDtypeStruct((b, NUM_CLASSES), jnp.float32),
        in_specs=[vmem() for _ in range(10)],
        out_specs=vmem(),
    )(x2d, params["bbw"], params["projw"], addpe, params["maskpool"],
      params["qkvw"], params["wopad"], params["ffn1"], params["w2lv"],
      params["clswb"])


if __name__ == "__main__":
    x = jax.random.normal(jax.random.PRNGKey(0), (B, S, C, H, W), dtype=jnp.float32)
    params = init_params(jax.random.PRNGKey(42))
    out = jax.jit(forward)(x, params)
    out = jax.block_until_ready(out)
    assert out.shape == (B, NUM_CLASSES) and out.dtype == jnp.float32
    assert bool(jnp.all(jnp.isfinite(out)))
    print("KERNEL_OK")
</pallas_src>

<mosaic_0001>
module attributes {stable_mosaic.version = 11 : i64} {
  func.func @fused_forward_kernel(%arg0: memref<16x768xf32, #tpu.memory_space<vmem>>, %arg1: memref<768x64xbf16, #tpu.memory_space<vmem>>, %arg2: memref<64x32xf32, #tpu.memory_space<vmem>>, %arg3: memref<16x32xf32, #tpu.memory_space<vmem>>, %arg4: memref<18x16xf32, #tpu.memory_space<vmem>>, %arg5: memref<2x33x1536xf32, #tpu.memory_space<vmem>>, %arg6: memref<2x512x32xf32, #tpu.memory_space<vmem>>, %arg7: memref<2x33x64xf32, #tpu.memory_space<vmem>>, %arg8: memref<2x72x32xf32, #tpu.memory_space<vmem>>, %arg9: memref<33x16xf32, #tpu.memory_space<vmem>>, %arg10: memref<2x16xf32, #tpu.memory_space<vmem>>) attributes {dimension_semantics = [], scalar_prefetch = 0 : i64, scratch_operands = 0 : i64, tpu.core_type = #tpu.core_type<tc>} {
    %c0 = arith.constant 0 : index
    %c0_0 = arith.constant 0 : index
    %0 = vector.load %arg0[%c0, %c0_0] : memref<16x768xf32, #tpu.memory_space<vmem>>, vector<16x768xf32>
    %1 = arith.truncf %0 : vector<16x768xf32> to vector<16x768xbf16>
    %c0_1 = arith.constant 0 : index
    %c0_2 = arith.constant 0 : index
    %2 = vector.load %arg1[%c0_1, %c0_2] : memref<768x64xbf16, #tpu.memory_space<vmem>>, vector<768x64xbf16>
    %cst = arith.constant dense<0.000000e+00> : vector<16x64xf32>
    %3 = tpu.matmul %1, %2, %cst {dimension_numbers = #tpu.dot_dimension_numbers<[1], [0], [0], [1], [0, 0, 1, 1], [], []>} : vector<16x768xbf16>, vector<768x64xbf16>, vector<16x64xf32> -> vector<16x64xf32>
    %c0_3 = arith.constant 0 : index
    %c0_4 = arith.constant 0 : index
    %4 = vector.load %arg2[%c0_3, %c0_4] : memref<64x32xf32, #tpu.memory_space<vmem>>, vector<64x32xf32>
    %cst_5 = arith.constant dense<0.000000e+00> : vector<16x32xf32>
    %5 = tpu.matmul %3, %4, %cst_5 {dimension_numbers = #tpu.dot_dimension_numbers<[1], [0], [0], [1], [0, 0, 1, 1], [], []>} : vector<16x64xf32>, vector<64x32xf32>, vector<16x32xf32> -> vector<16x32xf32>
    %c0_6 = arith.constant 0 : index
    %c0_7 = arith.constant 0 : index
    %6 = vector.load %arg3[%c0_6, %c0_7] : memref<16x32xf32, #tpu.memory_space<vmem>>, vector<16x32xf32>
    %7 = arith.addf %5, %6 : vector<16x32xf32>
    %c0_8 = arith.constant 0 : index
    %c0_9 = arith.constant 0 : index
    %8 = vector.load %arg4[%c0_8, %c0_9] : memref<18x16xf32, #tpu.memory_space<vmem>>, vector<16x16xf32>
    %c0_10 = arith.constant 0 : index
    %c0_11 = arith.constant 0 : index
    %c0_12 = arith.constant 0 : index
    %9 = vector.load %arg5[%c0_10, %c0_11, %c0_12] : memref<2x33x1536xf32, #tpu.memory_space<vmem>>, vector<1x32x1536xf32>
    %10 = vector.shape_cast %9 : vector<1x32x1536xf32> to vector<32x1536xf32>
    %cst_13 = arith.constant dense<0.000000e+00> : vector<16x1536xf32>
    %11 = tpu.matmul %7, %10, %cst_13 {dimension_numbers = #tpu.dot_dimension_numbers<[1], [0], [0], [1], [0, 0, 1, 1], [], []>} : vector<16x32xf32>, vector<32x1536xf32>, vector<16x1536xf32> -> vector<16x1536xf32>
    %c0_14 = arith.constant 0 : index
    %c32 = arith.constant 32 : index
    %c0_15 = arith.constant 0 : index
    %12 = vector.load %arg5[%c0_14, %c32, %c0_15] : memref<2x33x1536xf32, #tpu.memory_space<vmem>>, vector<1x1x1536xf32>
    %13 = vector.shape_cast %12 : vector<1x1x1536xf32> to vector<1x1536xf32>
    %14 = vector.broadcast %13 : vector<1x1536xf32> to vector<16x1536xf32>
    %15 = arith.addf %11, %14 : vector<16x1536xf32>
    %16 = vector.extract_strided_slice %15 {offsets = [0, 0], sizes = [16, 128], strides = [1, 1]} : vector<16x1536xf32> to vector<16x128xf32>
    %17 = vector.extract_strided_slice %15 {offsets = [0, 128], sizes = [16, 128], strides = [1, 1]} : vector<16x1536xf32> to vector<16x128xf32>
    %18 = vector.extract_strided_slice %15 {offsets = [0, 256], sizes = [16, 128], strides = [1, 1]} : vector<16x1536xf32> to vector<16x128xf32>
    %cst_16 = arith.constant dense<0.000000e+00> : vector<16x16xf32>
    %19 = tpu.matmul %16, %17, %cst_16 {dimension_numbers = #tpu.dot_dimension_numbers<[1], [1], [0], [0], [0, 0, 1, 0], [], []>} : vector<16x128xf32>, vector<16x128xf32>, vector<16x16xf32> -> vector<16x16xf32>
    %20 = arith.addf %19, %8 : vector<16x16xf32>
    %cst_17 = arith.constant dense<0xFF800000> : vector<16xf32>
    %21 = vector.multi_reduction <maximumf>, %20, %cst_17 [1] : vector<16x16xf32> to vector<16xf32>
    %22 = vector.shape_cast %21 : vector<16xf32> to vector<16x1xf32>
    %23 = vector.broadcast %22 : vector<16x1xf32> to vector<16x16xf32>
    %24 = arith.subf %20, %23 : vector<16x16xf32>
    %25 = math.exp %24 : vector<16x16xf32>
    %cst_18 = arith.constant dense<0.000000e+00> : vector<16xf32>
    %26 = vector.multi_reduction <add>, %25, %cst_18 [1] : vector<16x16xf32> to vector<16xf32>
    %27 = vector.shape_cast %26 : vector<16xf32> to vector<16x1xf32>
    %28 = tpu.reciprocal %27 {approx = true} : vector<16x1xf32> -> vector<16x1xf32>
    %29 = vector.broadcast %28 : vector<16x1xf32> to vector<16x16xf32>
    %30 = arith.mulf %25, %29 : vector<16x16xf32>
    %cst_19 = arith.constant dense<0.000000e+00> : vector<16x128xf32>
    %31 = tpu.matmul %30, %18, %cst_19 {dimension_numbers = #tpu.dot_dimension_numbers<[1], [0], [0], [1], [0, 0, 1, 1], [], []>} : vector<16x16xf32>, vector<16x128xf32>, vector<16x128xf32> -> vector<16x128xf32>
    %c0_20 = arith.constant 0 : index
    %c0_21 = arith.constant 0 : index
    %c0_22 = arith.constant 0 : index
    %32 = vector.load %arg6[%c0_20, %c0_21, %c0_22] : memref<2x512x32xf32, #tpu.memory_space<vmem>>, vector<1x128x32xf32>
    %33 = vector.shape_cast %32 : vector<1x128x32xf32> to vector<128x32xf32>
    %cst_23 = arith.constant dense<0.000000e+00> : vector<16x32xf32>
    %34 = tpu.matmul %31, %33, %cst_23 {dimension_numbers = #tpu.dot_dimension_numbers<[1], [0], [0], [1], [0, 0, 1, 1], [], []>} : vector<16x128xf32>, vector<128x32xf32>, vector<16x32xf32> -> vector<16x32xf32>
    %35 = vector.extract_strided_slice %15 {offsets = [0, 384], sizes = [16, 128], strides = [1, 1]} : vector<16x1536xf32> to vector<16x128xf32>
    %36 = vector.extract_strided_slice %15 {offsets = [0, 512], sizes = [16, 128], strides = [1, 1]} : vector<16x1536xf32> to vector<16x128xf32>
    %37 = vector.extract_strided_slice %15 {offsets = [0, 640], sizes = [16, 128], strides = [1, 1]} : vector<16x1536xf32> to vector<16x128xf32>
    %cst_24 = arith.constant dense<0.000000e+00> : vector<16x16xf32>
    %38 = tpu.matmul %35, %36, %cst_24 {dimension_numbers = #tpu.dot_dimension_numbers<[1], [1], [0], [0], [0, 0, 1, 0], [], []>} : vector<16x128xf32>, vector<16x128xf32>, vector<16x16xf32> -> vector<16x16xf32>
    %39 = arith.addf %38, %8 : vector<16x16xf32>
    %cst_25 = arith.constant dense<0xFF800000> : vector<16xf32>
    %40 = vector.multi_reduction <maximumf>, %39, %cst_25 [1] : vector<16x16xf32> to vector<16xf32>
    %41 = vector.shape_cast %40 : vector<16xf32> to vector<16x1xf32>
    %42 = vector.broadcast %41 : vector<16x1xf32> to vector<16x16xf32>
    %43 = arith.subf %39, %42 : vector<16x16xf32>
    %44 = math.exp %43 : vector<16x16xf32>
    %cst_26 = arith.constant dense<0.000000e+00> : vector<16xf32>
    %45 = vector.multi_reduction <add>, %44, %cst_26 [1] : vector<16x16xf32> to vector<16xf32>
    %46 = vector.shape_cast %45 : vector<16xf32> to vector<16x1xf32>
    %47 = tpu.reciprocal %46 {approx = true} : vector<16x1xf32> -> vector<16x1xf32>
    %48 = vector.broadcast %47 : vector<16x1xf32> to vector<16x16xf32>
    %49 = arith.mulf %44, %48 : vector<16x16xf32>
    %cst_27 = arith.constant dense<0.000000e+00> : vector<16x128xf32>
    %50 = tpu.matmul %49, %37, %cst_27 {dimension_numbers = #tpu.dot_dimension_numbers<[1], [0], [0], [1], [0, 0, 1, 1], [], []>} : vector<16x16xf32>, vector<16x128xf32>, vector<16x128xf32> -> vector<16x128xf32>
    %c0_28 = arith.constant 0 : index
    %c128 = arith.constant 128 : index
    %c0_29 = arith.constant 0 : index
    %51 = vector.load %arg6[%c0_28, %c128, %c0_29] : memref<2x512x32xf32, #tpu.memory_space<vmem>>, vector<1x128x32xf32>
    %52 = vector.shape_cast %51 : vector<1x128x32xf32> to vector<128x32xf32>
    %cst_30 = arith.constant dense<0.000000e+00> : vector<16x32xf32>
    %53 = tpu.matmul %50, %52, %cst_30 {dimension_numbers = #tpu.dot_dimension_numbers<[1], [0], [0], [1], [0, 0, 1, 1], [], []>} : vector<16x128xf32>, vector<128x32xf32>, vector<16x32xf32> -> vector<16x32xf32>
    %54 = arith.addf %34, %53 : vector<16x32xf32>
    %55 = vector.extract_strided_slice %15 {offsets = [0, 768], sizes = [16, 128], strides = [1, 1]} : vector<16x1536xf32> to vector<16x128xf32>
    %56 = vector.extract_strided_slice %15 {offsets = [0, 896], sizes = [16, 128], strides = [1, 1]} : vector<16x1536xf32> to vector<16x128xf32>
    %57 = vector.extract_strided_slice %15 {offsets = [0, 1024], sizes = [16, 128], strides = [1, 1]} : vector<16x1536xf32> to vector<16x128xf32>
    %cst_31 = arith.constant dense<0.000000e+00> : vector<16x16xf32>
    %58 = tpu.matmul %55, %56, %cst_31 {dimension_numbers = #tpu.dot_dimension_numbers<[1], [1], [0], [0], [0, 0, 1, 0], [], []>} : vector<16x128xf32>, vector<16x128xf32>, vector<16x16xf32> -> vector<16x16xf32>
    %59 = arith.addf %58, %8 : vector<16x16xf32>
    %cst_32 = arith.constant dense<0xFF800000> : vector<16xf32>
    %60 = vector.multi_reduction <maximumf>, %59, %cst_32 [1] : vector<16x16xf32> to vector<16xf32>
    %61 = vector.shape_cast %60 : vector<16xf32> to vector<16x1xf32>
    %62 = vector.broadcast %61 : vector<16x1xf32> to vector<16x16xf32>
    %63 = arith.subf %59, %62 : vector<16x16xf32>
    %64 = math.exp %63 : vector<16x16xf32>
    %cst_33 = arith.constant dense<0.000000e+00> : vector<16xf32>
    %65 = vector.multi_reduction <add>, %64, %cst_33 [1] : vector<16x16xf32> to vector<16xf32>
    %66 = vector.shape_cast %65 : vector<16xf32> to vector<16x1xf32>
    %67 = tpu.reciprocal %66 {approx = true} : vector<16x1xf32> -> vector<16x1xf32>
    %68 = vector.broadcast %67 : vector<16x1xf32> to vector<16x16xf32>
    %69 = arith.mulf %64, %68 : vector<16x16xf32>
    %cst_34 = arith.constant dense<0.000000e+00> : vector<16x128xf32>
    %70 = tpu.matmul %69, %57, %cst_34 {dimension_numbers = #tpu.dot_dimension_numbers<[1], [0], [0], [1], [0, 0, 1, 1], [], []>} : vector<16x16xf32>, vector<16x128xf32>, vector<16x128xf32> -> vector<16x128xf32>
    %c0_35 = arith.constant 0 : index
    %c256 = arith.constant 256 : index
    %c0_36 = arith.constant 0 : index
    %71 = vector.load %arg6[%c0_35, %c256, %c0_36] : memref<2x512x32xf32, #tpu.memory_space<vmem>>, vector<1x128x32xf32>
    %72 = vector.shape_cast %71 : vector<1x128x32xf32> to vector<128x32xf32>
    %cst_37 = arith.constant dense<0.000000e+00> : vector<16x32xf32>
    %73 = tpu.matmul %70, %72, %cst_37 {dimension_numbers = #tpu.dot_dimension_numbers<[1], [0], [0], [1], [0, 0, 1, 1], [], []>} : vector<16x128xf32>, vector<128x32xf32>, vector<16x32xf32> -> vector<16x32xf32>
    %74 = arith.addf %54, %73 : vector<16x32xf32>
    %75 = vector.extract_strided_slice %15 {offsets = [0, 1152], sizes = [16, 128], strides = [1, 1]} : vector<16x1536xf32> to vector<16x128xf32>
    %76 = vector.extract_strided_slice %15 {offsets = [0, 1280], sizes = [16, 128], strides = [1, 1]} : vector<16x1536xf32> to vector<16x128xf32>
    %77 = vector.extract_strided_slice %15 {offsets = [0, 1408], sizes = [16, 128], strides = [1, 1]} : vector<16x1536xf32> to vector<16x128xf32>
    %cst_38 = arith.constant dense<0.000000e+00> : vector<16x16xf32>
    %78 = tpu.matmul %75, %76, %cst_38 {dimension_numbers = #tpu.dot_dimension_numbers<[1], [1], [0], [0], [0, 0, 1, 0], [], []>} : vector<16x128xf32>, vector<16x128xf32>, vector<16x16xf32> -> vector<16x16xf32>
    %79 = arith.addf %78, %8 : vector<16x16xf32>
    %cst_39 = arith.constant dense<0xFF800000> : vector<16xf32>
    %80 = vector.multi_reduction <maximumf>, %79, %cst_39 [1] : vector<16x16xf32> to vector<16xf32>
    %81 = vector.shape_cast %80 : vector<16xf32> to vector<16x1xf32>
    %82 = vector.broadcast %81 : vector<16x1xf32> to vector<16x16xf32>
    %83 = arith.subf %79, %82 : vector<16x16xf32>
    %84 = math.exp %83 : vector<16x16xf32>
    %cst_40 = arith.constant dense<0.000000e+00> : vector<16xf32>
    %85 = vector.multi_reduction <add>, %84, %cst_40 [1] : vector<16x16xf32> to vector<16xf32>
    %86 = vector.shape_cast %85 : vector<16xf32> to vector<16x1xf32>
    %87 = tpu.reciprocal %86 {approx = true} : vector<16x1xf32> -> vector<16x1xf32>
    %88 = vector.broadcast %87 : vector<16x1xf32> to vector<16x16xf32>
    %89 = arith.mulf %84, %88 : vector<16x16xf32>
    %cst_41 = arith.constant dense<0.000000e+00> : vector<16x128xf32>
    %90 = tpu.matmul %89, %77, %cst_41 {dimension_numbers = #tpu.dot_dimension_numbers<[1], [0], [0], [1], [0, 0, 1, 1], [], []>} : vector<16x16xf32>, vector<16x128xf32>, vector<16x128xf32> -> vector<16x128xf32>
    %c0_42 = arith.constant 0 : index
    %c384 = arith.constant 384 : index
    %c0_43 = arith.constant 0 : index
    %91 = vector.load %arg6[%c0_42, %c384, %c0_43] : memref<2x512x32xf32, #tpu.memory_space<vmem>>, vector<1x128x32xf32>
    %92 = vector.shape_cast %91 : vector<1x128x32xf32> to vector<128x32xf32>
    %cst_44 = arith.constant dense<0.000000e+00> : vector<16x32xf32>
    %93 = tpu.matmul %90, %92, %cst_44 {dimension_numbers = #tpu.dot_dimension_numbers<[1], [0], [0], [1], [0, 0, 1, 1], [], []>} : vector<16x128xf32>, vector<128x32xf32>, vector<16x32xf32> -> vector<16x32xf32>
    %94 = arith.addf %74, %93 : vector<16x32xf32>
    %c0_45 = arith.constant 0 : index
    %c64 = arith.constant 64 : index
    %c0_46 = arith.constant 0 : index
    %95 = vector.load %arg8[%c0_45, %c64, %c0_46] : memref<2x72x32xf32, #tpu.memory_space<vmem>>, vector<1x1x32xf32>
    %96 = vector.shape_cast %95 : vector<1x1x32xf32> to vector<1x32xf32>
    %97 = vector.broadcast %96 : vector<1x32xf32> to vector<16x32xf32>
    %98 = arith.addf %94, %97 : vector<16x32xf32>
    %99 = arith.addf %7, %98 : vector<16x32xf32>
    %cst_47 = arith.constant dense<0.000000e+00> : vector<16xf32>
    %100 = vector.multi_reduction <add>, %99, %cst_47 [1] : vector<16x32xf32> to vector<16xf32>
    %101 = vector.shape_cast %100 : vector<16xf32> to vector<16x1xf32>
    %cst_48 = arith.constant 3.200000e+01 : f32
    %102 = vector.broadcast %cst_48 : f32 to vector<16x1xf32>
    %103 = arith.divf %101, %102 : vector<16x1xf32>
    %104 = vector.broadcast %103 : vector<16x1xf32> to vector<16x32xf32>
    %105 = arith.subf %99, %104 : vector<16x32xf32>
    %106 = arith.mulf %105, %105 : vector<16x32xf32>
    %cst_49 = arith.constant dense<0.000000e+00> : vector<16xf32>
    %107 = vector.multi_reduction <add>, %106, %cst_49 [1] : vector<16x32xf32> to vector<16xf32>
    %108 = vector.shape_cast %107 : vector<16xf32> to vector<16x1xf32>
    %cst_50 = arith.constant 3.200000e+01 : f32
    %109 = vector.broadcast %cst_50 : f32 to vector<16x1xf32>
    %110 = arith.divf %108, %109 : vector<16x1xf32>
    %111 = vector.broadcast %103 : vector<16x1xf32> to vector<16x32xf32>
    %112 = arith.subf %99, %111 : vector<16x32xf32>
    %cst_51 = arith.constant 9.99999974E-6 : f32
    %113 = vector.broadcast %cst_51 : f32 to vector<16x1xf32>
    %114 = arith.addf %110, %113 : vector<16x1xf32>
    %115 = math.rsqrt %114 : vector<16x1xf32>
    %116 = vector.broadcast %115 : vector<16x1xf32> to vector<16x32xf32>
    %117 = arith.mulf %112, %116 : vector<16x32xf32>
    %c0_52 = arith.constant 0 : index
    %c66 = arith.constant 66 : index
    %c0_53 = arith.constant 0 : index
    %118 = vector.load %arg8[%c0_52, %c66, %c0_53] : memref<2x72x32xf32, #tpu.memory_space<vmem>>, vector<1x1x32xf32>
    %119 = vector.shape_cast %118 : vector<1x1x32xf32> to vector<1x32xf32>
    %120 = vector.broadcast %119 : vector<1x32xf32> to vector<16x32xf32>
    %121 = arith.mulf %117, %120 : vector<16x32xf32>
    %c0_54 = arith.constant 0 : index
    %c67 = arith.constant 67 : index
    %c0_55 = arith.constant 0 : index
    %122 = vector.load %arg8[%c0_54, %c67, %c0_55] : memref<2x72x32xf32, #tpu.memory_space<vmem>>, vector<1x1x32xf32>
    %123 = vector.shape_cast %122 : vector<1x1x32xf32> to vector<1x32xf32>
    %124 = vector.broadcast %123 : vector<1x32xf32> to vector<16x32xf32>
    %125 = arith.addf %121, %124 : vector<16x32xf32>
    %c0_56 = arith.constant 0 : index
    %c0_57 = arith.constant 0 : index
    %c0_58 = arith.constant 0 : index
    %126 = vector.load %arg7[%c0_56, %c0_57, %c0_58] : memref<2x33x64xf32, #tpu.memory_space<vmem>>, vector<1x32x64xf32>
    %127 = vector.shape_cast %126 : vector<1x32x64xf32> to vector<32x64xf32>
    %cst_59 = arith.constant dense<0.000000e+00> : vector<16x64xf32>
    %128 = tpu.matmul %125, %127, %cst_59 {dimension_numbers = #tpu.dot_dimension_numbers<[1], [0], [0], [1], [0, 0, 1, 1], [], []>} : vector<16x32xf32>, vector<32x64xf32>, vector<16x64xf32> -> vector<16x64xf32>
    %c0_60 = arith.constant 0 : index
    %c32_61 = arith.constant 32 : index
    %c0_62 = arith.constant 0 : index
    %129 = vector.load %arg7[%c0_60, %c32_61, %c0_62] : memref<2x33x64xf32, #tpu.memory_space<vmem>>, vector<1x1x64xf32>
    %130 = vector.shape_cast %129 : vector<1x1x64xf32> to vector<1x64xf32>
    %131 = vector.broadcast %130 : vector<1x64xf32> to vector<16x64xf32>
    %132 = arith.addf %128, %131 : vector<16x64xf32>
    %cst_63 = arith.constant 0.000000e+00 : f32
    %133 = vector.broadcast %cst_63 : f32 to vector<16x64xf32>
    %134 = arith.maximumf %132, %133 : vector<16x64xf32>
    %c0_64 = arith.constant 0 : index
    %c0_65 = arith.constant 0 : index
    %c0_66 = arith.constant 0 : index
    %135 = vector.load %arg8[%c0_64, %c0_65, %c0_66] : memref<2x72x32xf32, #tpu.memory_space<vmem>>, vector<1x64x32xf32>
    %136 = vector.shape_cast %135 : vector<1x64x32xf32> to vector<64x32xf32>
    %cst_67 = arith.constant dense<0.000000e+00> : vector<16x32xf32>
    %137 = tpu.matmul %134, %136, %cst_67 {dimension_numbers = #tpu.dot_dimension_numbers<[1], [0], [0], [1], [0, 0, 1, 1], [], []>} : vector<16x64xf32>, vector<64x32xf32>, vector<16x32xf32> -> vector<16x32xf32>
    %c0_68 = arith.constant 0 : index
    %c65 = arith.constant 65 : index
    %c0_69 = arith.constant 0 : index
    %138 = vector.load %arg8[%c0_68, %c65, %c0_69] : memref<2x72x32xf32, #tpu.memory_space<vmem>>, vector<1x1x32xf32>
    %139 = vector.shape_cast %138 : vector<1x1x32xf32> to vector<1x32xf32>
    %140 = vector.broadcast %139 : vector<1x32xf32> to vector<16x32xf32>
    %141 = arith.addf %137, %140 : vector<16x32xf32>
    %142 = arith.addf %125, %141 : vector<16x32xf32>
    %cst_70 = arith.constant dense<0.000000e+00> : vector<16xf32>
    %143 = vector.multi_reduction <add>, %142, %cst_70 [1] : vector<16x32xf32> to vector<16xf32>
    %144 = vector.shape_cast %143 : vector<16xf32> to vector<16x1xf32>
    %cst_71 = arith.constant 3.200000e+01 : f32
    %145 = vector.broadcast %cst_71 : f32 to vector<16x1xf32>
    %146 = arith.divf %144, %145 : vector<16x1xf32>
    %147 = vector.broadcast %146 : vector<16x1xf32> to vector<16x32xf32>
    %148 = arith.subf %142, %147 : vector<16x32xf32>
    %149 = arith.mulf %148, %148 : vector<16x32xf32>
    %cst_72 = arith.constant dense<0.000000e+00> : vector<16xf32>
    %150 = vector.multi_reduction <add>, %149, %cst_72 [1] : vector<16x32xf32> to vector<16xf32>
    %151 = vector.shape_cast %150 : vector<16xf32> to vector<16x1xf32>
    %cst_73 = arith.constant 3.200000e+01 : f32
    %152 = vector.broadcast %cst_73 : f32 to vector<16x1xf32>
    %153 = arith.divf %151, %152 : vector<16x1xf32>
    %154 = vector.broadcast %146 : vector<16x1xf32> to vector<16x32xf32>
    %155 = arith.subf %142, %154 : vector<16x32xf32>
    %cst_74 = arith.constant 9.99999974E-6 : f32
    %156 = vector.broadcast %cst_74 : f32 to vector<16x1xf32>
    %157 = arith.addf %153, %156 : vector<16x1xf32>
    %158 = math.rsqrt %157 : vector<16x1xf32>
    %159 = vector.broadcast %158 : vector<16x1xf32> to vector<16x32xf32>
    %160 = arith.mulf %155, %159 : vector<16x32xf32>
    %c0_75 = arith.constant 0 : index
    %c68 = arith.constant 68 : index
    %c0_76 = arith.constant 0 : index
    %161 = vector.load %arg8[%c0_75, %c68, %c0_76] : memref<2x72x32xf32, #tpu.memory_space<vmem>>, vector<1x1x32xf32>
    %162 = vector.shape_cast %161 : vector<1x1x32xf32> to vector<1x32xf32>
    %163 = vector.broadcast %162 : vector<1x32xf32> to vector<16x32xf32>
    %164 = arith.mulf %160, %163 : vector<16x32xf32>
    %c0_77 = arith.constant 0 : index
    %c69 = arith.constant 69 : index
    %c0_78 = arith.constant 0 : index
    %165 = vector.load %arg8[%c0_77, %c69, %c0_78] : memref<2x72x32xf32, #tpu.memory_space<vmem>>, vector<1x1x32xf32>
    %166 = vector.shape_cast %165 : vector<1x1x32xf32> to vector<1x32xf32>
    %167 = vector.broadcast %166 : vector<1x32xf32> to vector<16x32xf32>
    %168 = arith.addf %164, %167 : vector<16x32xf32>
    %c1 = arith.constant 1 : index
    %c0_79 = arith.constant 0 : index
    %c0_80 = arith.constant 0 : index
    %169 = vector.load %arg5[%c1, %c0_79, %c0_80] : memref<2x33x1536xf32, #tpu.memory_space<vmem>>, vector<1x32x1536xf32>
    %170 = vector.shape_cast %169 : vector<1x32x1536xf32> to vector<32x1536xf32>
    %cst_81 = arith.constant dense<0.000000e+00> : vector<16x1536xf32>
    %171 = tpu.matmul %168, %170, %cst_81 {dimension_numbers = #tpu.dot_dimension_numbers<[1], [0], [0], [1], [0, 0, 1, 1], [], []>} : vector<16x32xf32>, vector<32x1536xf32>, vector<16x1536xf32> -> vector<16x1536xf32>
    %c1_82 = arith.constant 1 : index
    %c32_83 = arith.constant 32 : index
    %c0_84 = arith.constant 0 : index
    %172 = vector.load %arg5[%c1_82, %c32_83, %c0_84] : memref<2x33x1536xf32, #tpu.memory_space<vmem>>, vector<1x1x1536xf32>
    %173 = vector.shape_cast %172 : vector<1x1x1536xf32> to vector<1x1536xf32>
    %174 = vector.broadcast %173 : vector<1x1536xf32> to vector<16x1536xf32>
    %175 = arith.addf %171, %174 : vector<16x1536xf32>
    %176 = vector.extract_strided_slice %175 {offsets = [0, 0], sizes = [16, 128], strides = [1, 1]} : vector<16x1536xf32> to vector<16x128xf32>
    %177 = vector.extract_strided_slice %175 {offsets = [0, 128], sizes = [16, 128], strides = [1, 1]} : vector<16x1536xf32> to vector<16x128xf32>
    %178 = vector.extract_strided_slice %175 {offsets = [0, 256], sizes = [16, 128], strides = [1, 1]} : vector<16x1536xf32> to vector<16x128xf32>
    %cst_85 = arith.constant dense<0.000000e+00> : vector<16x16xf32>
    %179 = tpu.matmul %176, %177, %cst_85 {dimension_numbers = #tpu.dot_dimension_numbers<[1], [1], [0], [0], [0, 0, 1, 0], [], []>} : vector<16x128xf32>, vector<16x128xf32>, vector<16x16xf32> -> vector<16x16xf32>
    %180 = arith.addf %179, %8 : vector<16x16xf32>
    %cst_86 = arith.constant dense<0xFF800000> : vector<16xf32>
    %181 = vector.multi_reduction <maximumf>, %180, %cst_86 [1] : vector<16x16xf32> to vector<16xf32>
    %182 = vector.shape_cast %181 : vector<16xf32> to vector<16x1xf32>
    %183 = vector.broadcast %182 : vector<16x1xf32> to vector<16x16xf32>
    %184 = arith.subf %180, %183 : vector<16x16xf32>
    %185 = math.exp %184 : vector<16x16xf32>
    %cst_87 = arith.constant dense<0.000000e+00> : vector<16xf32>
    %186 = vector.multi_reduction <add>, %185, %cst_87 [1] : vector<16x16xf32> to vector<16xf32>
    %187 = vector.shape_cast %186 : vector<16xf32> to vector<16x1xf32>
    %188 = tpu.reciprocal %187 {approx = true} : vector<16x1xf32> -> vector<16x1xf32>
    %189 = vector.broadcast %188 : vector<16x1xf32> to vector<16x16xf32>
    %190 = arith.mulf %185, %189 : vector<16x16xf32>
    %cst_88 = arith.constant dense<0.000000e+00> : vector<16x128xf32>
    %191 = tpu.matmul %190, %178, %cst_88 {dimension_numbers = #tpu.dot_dimension_numbers<[1], [0], [0], [1], [0, 0, 1, 1], [], []>} : vector<16x16xf32>, vector<16x128xf32>, vector<16x128xf32> -> vector<16x128xf32>
    %c1_89 = arith.constant 1 : index
    %c0_90 = arith.constant 0 : index
    %c0_91 = arith.constant 0 : index
    %192 = vector.load %arg6[%c1_89, %c0_90, %c0_91] : memref<2x512x32xf32, #tpu.memory_space<vmem>>, vector<1x128x32xf32>
    %193 = vector.shape_cast %192 : vector<1x128x32xf32> to vector<128x32xf32>
    %cst_92 = arith.constant dense<0.000000e+00> : vector<16x32xf32>
    %194 = tpu.matmul %191, %193, %cst_92 {dimension_numbers = #tpu.dot_dimension_numbers<[1], [0], [0], [1], [0, 0, 1, 1], [], []>} : vector<16x128xf32>, vector<128x32xf32>, vector<16x32xf32> -> vector<16x32xf32>
    %195 = vector.extract_strided_slice %175 {offsets = [0, 384], sizes = [16, 128], strides = [1, 1]} : vector<16x1536xf32> to vector<16x128xf32>
    %196 = vector.extract_strided_slice %175 {offsets = [0, 512], sizes = [16, 128], strides = [1, 1]} : vector<16x1536xf32> to vector<16x128xf32>
    %197 = vector.extract_strided_slice %175 {offsets = [0, 640], sizes = [16, 128], strides = [1, 1]} : vector<16x1536xf32> to vector<16x128xf32>
    %cst_93 = arith.constant dense<0.000000e+00> : vector<16x16xf32>
    %198 = tpu.matmul %195, %196, %cst_93 {dimension_numbers = #tpu.dot_dimension_numbers<[1], [1], [0], [0], [0, 0, 1, 0], [], []>} : vector<16x128xf32>, vector<16x128xf32>, vector<16x16xf32> -> vector<16x16xf32>
    %199 = arith.addf %198, %8 : vector<16x16xf32>
    %cst_94 = arith.constant dense<0xFF800000> : vector<16xf32>
    %200 = vector.multi_reduction <maximumf>, %199, %cst_94 [1] : vector<16x16xf32> to vector<16xf32>
    %201 = vector.shape_cast %200 : vector<16xf32> to vector<16x1xf32>
    %202 = vector.broadcast %201 : vector<16x1xf32> to vector<16x16xf32>
    %203 = arith.subf %199, %202 : vector<16x16xf32>
    %204 = math.exp %203 : vector<16x16xf32>
    %cst_95 = arith.constant dense<0.000000e+00> : vector<16xf32>
    %205 = vector.multi_reduction <add>, %204, %cst_95 [1] : vector<16x16xf32> to vector<16xf32>
    %206 = vector.shape_cast %205 : vector<16xf32> to vector<16x1xf32>
    %207 = tpu.reciprocal %206 {approx = true} : vector<16x1xf32> -> vector<16x1xf32>
    %208 = vector.broadcast %207 : vector<16x1xf32> to vector<16x16xf32>
    %209 = arith.mulf %204, %208 : vector<16x16xf32>
    %cst_96 = arith.constant dense<0.000000e+00> : vector<16x128xf32>
    %210 = tpu.matmul %209, %197, %cst_96 {dimension_numbers = #tpu.dot_dimension_numbers<[1], [0], [0], [1], [0, 0, 1, 1], [], []>} : vector<16x16xf32>, vector<16x128xf32>, vector<16x128xf32> -> vector<16x128xf32>
    %c1_97 = arith.constant 1 : index
    %c128_98 = arith.constant 128 : index
    %c0_99 = arith.constant 0 : index
    %211 = vector.load %arg6[%c1_97, %c128_98, %c0_99] : memref<2x512x32xf32, #tpu.memory_space<vmem>>, vector<1x128x32xf32>
    %212 = vector.shape_cast %211 : vector<1x128x32xf32> to vector<128x32xf32>
    %cst_100 = arith.constant dense<0.000000e+00> : vector<16x32xf32>
    %213 = tpu.matmul %210, %212, %cst_100 {dimension_numbers = #tpu.dot_dimension_numbers<[1], [0], [0], [1], [0, 0, 1, 1], [], []>} : vector<16x128xf32>, vector<128x32xf32>, vector<16x32xf32> -> vector<16x32xf32>
    %214 = arith.addf %194, %213 : vector<16x32xf32>
    %215 = vector.extract_strided_slice %175 {offsets = [0, 768], sizes = [16, 128], strides = [1, 1]} : vector<16x1536xf32> to vector<16x128xf32>
    %216 = vector.extract_strided_slice %175 {offsets = [0, 896], sizes = [16, 128], strides = [1, 1]} : vector<16x1536xf32> to vector<16x128xf32>
    %217 = vector.extract_strided_slice %175 {offsets = [0, 1024], sizes = [16, 128], strides = [1, 1]} : vector<16x1536xf32> to vector<16x128xf32>
    %cst_101 = arith.constant dense<0.000000e+00> : vector<16x16xf32>
    %218 = tpu.matmul %215, %216, %cst_101 {dimension_numbers = #tpu.dot_dimension_numbers<[1], [1], [0], [0], [0, 0, 1, 0], [], []>} : vector<16x128xf32>, vector<16x128xf32>, vector<16x16xf32> -> vector<16x16xf32>
    %219 = arith.addf %218, %8 : vector<16x16xf32>
    %cst_102 = arith.constant dense<0xFF800000> : vector<16xf32>
    %220 = vector.multi_reduction <maximumf>, %219, %cst_102 [1] : vector<16x16xf32> to vector<16xf32>
    %221 = vector.shape_cast %220 : vector<16xf32> to vector<16x1xf32>
    %222 = vector.broadcast %221 : vector<16x1xf32> to vector<16x16xf32>
    %223 = arith.subf %219, %222 : vector<16x16xf32>
    %224 = math.exp %223 : vector<16x16xf32>
    %cst_103 = arith.constant dense<0.000000e+00> : vector<16xf32>
    %225 = vector.multi_reduction <add>, %224, %cst_103 [1] : vector<16x16xf32> to vector<16xf32>
    %226 = vector.shape_cast %225 : vector<16xf32> to vector<16x1xf32>
    %227 = tpu.reciprocal %226 {approx = true} : vector<16x1xf32> -> vector<16x1xf32>
    %228 = vector.broadcast %227 : vector<16x1xf32> to vector<16x16xf32>
    %229 = arith.mulf %224, %228 : vector<16x16xf32>
    %cst_104 = arith.constant dense<0.000000e+00> : vector<16x128xf32>
    %230 = tpu.matmul %229, %217, %cst_104 {dimension_numbers = #tpu.dot_dimension_numbers<[1], [0], [0], [1], [0, 0, 1, 1], [], []>} : vector<16x16xf32>, vector<16x128xf32>, vector<16x128xf32> -> vector<16x128xf32>
    %c1_105 = arith.constant 1 : index
    %c256_106 = arith.constant 256 : index
    %c0_107 = arith.constant 0 : index
    %231 = vector.load %arg6[%c1_105, %c256_106, %c0_107] : memref<2x512x32xf32, #tpu.memory_space<vmem>>, vector<1x128x32xf32>
    %232 = vector.shape_cast %231 : vector<1x128x32xf32> to vector<128x32xf32>
    %cst_108 = arith.constant dense<0.000000e+00> : vector<16x32xf32>
    %233 = tpu.matmul %230, %232, %cst_108 {dimension_numbers = #tpu.dot_dimension_numbers<[1], [0], [0], [1], [0, 0, 1, 1], [], []>} : vector<16x128xf32>, vector<128x32xf32>, vector<16x32xf32> -> vector<16x32xf32>
    %234 = arith.addf %214, %233 : vector<16x32xf32>
    %235 = vector.extract_strided_slice %175 {offsets = [0, 1152], sizes = [16, 128], strides = [1, 1]} : vector<16x1536xf32> to vector<16x128xf32>
    %236 = vector.extract_strided_slice %175 {offsets = [0, 1280], sizes = [16, 128], strides = [1, 1]} : vector<16x1536xf32> to vector<16x128xf32>
    %237 = vector.extract_strided_slice %175 {offsets = [0, 1408], sizes = [16, 128], strides = [1, 1]} : vector<16x1536xf32> to vector<16x128xf32>
    %cst_109 = arith.constant dense<0.000000e+00> : vector<16x16xf32>
    %238 = tpu.matmul %235, %236, %cst_109 {dimension_numbers = #tpu.dot_dimension_numbers<[1], [1], [0], [0], [0, 0, 1, 0], [], []>} : vector<16x128xf32>, vector<16x128xf32>, vector<16x16xf32> -> vector<16x16xf32>
    %239 = arith.addf %238, %8 : vector<16x16xf32>
    %cst_110 = arith.constant dense<0xFF800000> : vector<16xf32>
    %240 = vector.multi_reduction <maximumf>, %239, %cst_110 [1] : vector<16x16xf32> to vector<16xf32>
    %241 = vector.shape_cast %240 : vector<16xf32> to vector<16x1xf32>
    %242 = vector.broadcast %241 : vector<16x1xf32> to vector<16x16xf32>
    %243 = arith.subf %239, %242 : vector<16x16xf32>
    %244 = math.exp %243 : vector<16x16xf32>
    %cst_111 = arith.constant dense<0.000000e+00> : vector<16xf32>
    %245 = vector.multi_reduction <add>, %244, %cst_111 [1] : vector<16x16xf32> to vector<16xf32>
    %246 = vector.shape_cast %245 : vector<16xf32> to vector<16x1xf32>
    %247 = tpu.reciprocal %246 {approx = true} : vector<16x1xf32> -> vector<16x1xf32>
    %248 = vector.broadcast %247 : vector<16x1xf32> to vector<16x16xf32>
    %249 = arith.mulf %244, %248 : vector<16x16xf32>
    %cst_112 = arith.constant dense<0.000000e+00> : vector<16x128xf32>
    %250 = tpu.matmul %249, %237, %cst_112 {dimension_numbers = #tpu.dot_dimension_numbers<[1], [0], [0], [1], [0, 0, 1, 1], [], []>} : vector<16x16xf32>, vector<16x128xf32>, vector<16x128xf32> -> vector<16x128xf32>
    %c1_113 = arith.constant 1 : index
    %c384_114 = arith.constant 384 : index
    %c0_115 = arith.constant 0 : index
    %251 = vector.load %arg6[%c1_113, %c384_114, %c0_115] : memref<2x512x32xf32, #tpu.memory_space<vmem>>, vector<1x128x32xf32>
    %252 = vector.shape_cast %251 : vector<1x128x32xf32> to vector<128x32xf32>
    %cst_116 = arith.constant dense<0.000000e+00> : vector<16x32xf32>
    %253 = tpu.matmul %250, %252, %cst_116 {dimension_numbers = #tpu.dot_dimension_numbers<[1], [0], [0], [1], [0, 0, 1, 1], [], []>} : vector<16x128xf32>, vector<128x32xf32>, vector<16x32xf32> -> vector<16x32xf32>
    %254 = arith.addf %234, %253 : vector<16x32xf32>
    %c1_117 = arith.constant 1 : index
    %c64_118 = arith.constant 64 : index
    %c0_119 = arith.constant 0 : index
    %255 = vector.load %arg8[%c1_117, %c64_118, %c0_119] : memref<2x72x32xf32, #tpu.memory_space<vmem>>, vector<1x1x32xf32>
    %256 = vector.shape_cast %255 : vector<1x1x32xf32> to vector<1x32xf32>
    %257 = vector.broadcast %256 : vector<1x32xf32> to vector<16x32xf32>
    %258 = arith.addf %254, %257 : vector<16x32xf32>
    %259 = arith.addf %168, %258 : vector<16x32xf32>
    %cst_120 = arith.constant dense<0.000000e+00> : vector<16xf32>
    %260 = vector.multi_reduction <add>, %259, %cst_120 [1] : vector<16x32xf32> to vector<16xf32>
    %261 = vector.shape_cast %260 : vector<16xf32> to vector<16x1xf32>
    %cst_121 = arith.constant 3.200000e+01 : f32
    %262 = vector.broadcast %cst_121 : f32 to vector<16x1xf32>
    %263 = arith.divf %261, %262 : vector<16x1xf32>
    %264 = vector.broadcast %263 : vector<16x1xf32> to vector<16x32xf32>
    %265 = arith.subf %259, %264 : vector<16x32xf32>
    %266 = arith.mulf %265, %265 : vector<16x32xf32>
    %cst_122 = arith.constant dense<0.000000e+00> : vector<16xf32>
    %267 = vector.multi_reduction <add>, %266, %cst_122 [1] : vector<16x32xf32> to vector<16xf32>
    %268 = vector.shape_cast %267 : vector<16xf32> to vector<16x1xf32>
    %cst_123 = arith.constant 3.200000e+01 : f32
    %269 = vector.broadcast %cst_123 : f32 to vector<16x1xf32>
    %270 = arith.divf %268, %269 : vector<16x1xf32>
    %271 = vector.broadcast %263 : vector<16x1xf32> to vector<16x32xf32>
    %272 = arith.subf %259, %271 : vector<16x32xf32>
    %cst_124 = arith.constant 9.99999974E-6 : f32
    %273 = vector.broadcast %cst_124 : f32 to vector<16x1xf32>
    %274 = arith.addf %270, %273 : vector<16x1xf32>
    %275 = math.rsqrt %274 : vector<16x1xf32>
    %276 = vector.broadcast %275 : vector<16x1xf32> to vector<16x32xf32>
    %277 = arith.mulf %272, %276 : vector<16x32xf32>
    %c1_125 = arith.constant 1 : index
    %c66_126 = arith.constant 66 : index
    %c0_127 = arith.constant 0 : index
    %278 = vector.load %arg8[%c1_125, %c66_126, %c0_127] : memref<2x72x32xf32, #tpu.memory_space<vmem>>, vector<1x1x32xf32>
    %279 = vector.shape_cast %278 : vector<1x1x32xf32> to vector<1x32xf32>
    %280 = vector.broadcast %279 : vector<1x32xf32> to vector<16x32xf32>
    %281 = arith.mulf %277, %280 : vector<16x32xf32>
    %c1_128 = arith.constant 1 : index
    %c67_129 = arith.constant 67 : index
    %c0_130 = arith.constant 0 : index
    %282 = vector.load %arg8[%c1_128, %c67_129, %c0_130] : memref<2x72x32xf32, #tpu.memory_space<vmem>>, vector<1x1x32xf32>
    %283 = vector.shape_cast %282 : vector<1x1x32xf32> to vector<1x32xf32>
    %284 = vector.broadcast %283 : vector<1x32xf32> to vector<16x32xf32>
    %285 = arith.addf %281, %284 : vector<16x32xf32>
    %c1_131 = arith.constant 1 : index
    %c0_132 = arith.constant 0 : index
    %c0_133 = arith.constant 0 : index
    %286 = vector.load %arg7[%c1_131, %c0_132, %c0_133] : memref<2x33x64xf32, #tpu.memory_space<vmem>>, vector<1x32x64xf32>
    %287 = vector.shape_cast %286 : vector<1x32x64xf32> to vector<32x64xf32>
    %cst_134 = arith.constant dense<0.000000e+00> : vector<16x64xf32>
    %288 = tpu.matmul %285, %287, %cst_134 {dimension_numbers = #tpu.dot_dimension_numbers<[1], [0], [0], [1], [0, 0, 1, 1], [], []>} : vector<16x32xf32>, vector<32x64xf32>, vector<16x64xf32> -> vector<16x64xf32>
    %c1_135 = arith.constant 1 : index
    %c32_136 = arith.constant 32 : index
    %c0_137 = arith.constant 0 : index
    %289 = vector.load %arg7[%c1_135, %c32_136, %c0_137] : memref<2x33x64xf32, #tpu.memory_space<vmem>>, vector<1x1x64xf32>
    %290 = vector.shape_cast %289 : vector<1x1x64xf32> to vector<1x64xf32>
    %291 = vector.broadcast %290 : vector<1x64xf32> to vector<16x64xf32>
    %292 = arith.addf %288, %291 : vector<16x64xf32>
    %cst_138 = arith.constant 0.000000e+00 : f32
    %293 = vector.broadcast %cst_138 : f32 to vector<16x64xf32>
    %294 = arith.maximumf %292, %293 : vector<16x64xf32>
    %c1_139 = arith.constant 1 : index
    %c0_140 = arith.constant 0 : index
    %c0_141 = arith.constant 0 : index
    %295 = vector.load %arg8[%c1_139, %c0_140, %c0_141] : memref<2x72x32xf32, #tpu.memory_space<vmem>>, vector<1x64x32xf32>
    %296 = vector.shape_cast %295 : vector<1x64x32xf32> to vector<64x32xf32>
    %cst_142 = arith.constant dense<0.000000e+00> : vector<16x32xf32>
    %297 = tpu.matmul %294, %296, %cst_142 {dimension_numbers = #tpu.dot_dimension_numbers<[1], [0], [0], [1], [0, 0, 1, 1], [], []>} : vector<16x64xf32>, vector<64x32xf32>, vector<16x32xf32> -> vector<16x32xf32>
    %c1_143 = arith.constant 1 : index
    %c65_144 = arith.constant 65 : index
    %c0_145 = arith.constant 0 : index
    %298 = vector.load %arg8[%c1_143, %c65_144, %c0_145] : memref<2x72x32xf32, #tpu.memory_space<vmem>>, vector<1x1x32xf32>
    %299 = vector.shape_cast %298 : vector<1x1x32xf32> to vector<1x32xf32>
    %300 = vector.broadcast %299 : vector<1x32xf32> to vector<16x32xf32>
    %301 = arith.addf %297, %300 : vector<16x32xf32>
    %302 = arith.addf %285, %301 : vector<16x32xf32>
    %cst_146 = arith.constant dense<0.000000e+00> : vector<16xf32>
    %303 = vector.multi_reduction <add>, %302, %cst_146 [1] : vector<16x32xf32> to vector<16xf32>
    %304 = vector.shape_cast %303 : vector<16xf32> to vector<16x1xf32>
    %cst_147 = arith.constant 3.200000e+01 : f32
    %305 = vector.broadcast %cst_147 : f32 to vector<16x1xf32>
    %306 = arith.divf %304, %305 : vector<16x1xf32>
    %307 = vector.broadcast %306 : vector<16x1xf32> to vector<16x32xf32>
    %308 = arith.subf %302, %307 : vector<16x32xf32>
    %309 = arith.mulf %308, %308 : vector<16x32xf32>
    %cst_148 = arith.constant dense<0.000000e+00> : vector<16xf32>
    %310 = vector.multi_reduction <add>, %309, %cst_148 [1] : vector<16x32xf32> to vector<16xf32>
    %311 = vector.shape_cast %310 : vector<16xf32> to vector<16x1xf32>
    %cst_149 = arith.constant 3.200000e+01 : f32
    %312 = vector.broadcast %cst_149 : f32 to vector<16x1xf32>
    %313 = arith.divf %311, %312 : vector<16x1xf32>
    %314 = vector.broadcast %306 : vector<16x1xf32> to vector<16x32xf32>
    %315 = arith.subf %302, %314 : vector<16x32xf32>
    %cst_150 = arith.constant 9.99999974E-6 : f32
    %316 = vector.broadcast %cst_150 : f32 to vector<16x1xf32>
    %317 = arith.addf %313, %316 : vector<16x1xf32>
    %318 = math.rsqrt %317 : vector<16x1xf32>
    %319 = vector.broadcast %318 : vector<16x1xf32> to vector<16x32xf32>
    %320 = arith.mulf %315, %319 : vector<16x32xf32>
    %c1_151 = arith.constant 1 : index
    %c68_152 = arith.constant 68 : index
    %c0_153 = arith.constant 0 : index
    %321 = vector.load %arg8[%c1_151, %c68_152, %c0_153] : memref<2x72x32xf32, #tpu.memory_space<vmem>>, vector<1x1x32xf32>
    %322 = vector.shape_cast %321 : vector<1x1x32xf32> to vector<1x32xf32>
    %323 = vector.broadcast %322 : vector<1x32xf32> to vector<16x32xf32>
    %324 = arith.mulf %320, %323 : vector<16x32xf32>
    %c1_154 = arith.constant 1 : index
    %c69_155 = arith.constant 69 : index
    %c0_156 = arith.constant 0 : index
    %325 = vector.load %arg8[%c1_154, %c69_155, %c0_156] : memref<2x72x32xf32, #tpu.memory_space<vmem>>, vector<1x1x32xf32>
    %326 = vector.shape_cast %325 : vector<1x1x32xf32> to vector<1x32xf32>
    %327 = vector.broadcast %326 : vector<1x32xf32> to vector<16x32xf32>
    %328 = arith.addf %324, %327 : vector<16x32xf32>
    %c16 = arith.constant 16 : index
    %c0_157 = arith.constant 0 : index
    %329 = vector.load %arg4[%c16, %c0_157] : memref<18x16xf32, #tpu.memory_space<vmem>>, vector<2x16xf32>
    %cst_158 = arith.constant dense<0.000000e+00> : vector<2x32xf32>
    %330 = tpu.matmul %329, %328, %cst_158 {dimension_numbers = #tpu.dot_dimension_numbers<[1], [0], [0], [1], [0, 0, 1, 1], [], []>} : vector<2x16xf32>, vector<16x32xf32>, vector<2x32xf32> -> vector<2x32xf32>
    %cst_159 = arith.constant dense<0.000000e+00> : vector<2xf32>
    %331 = vector.multi_reduction <add>, %330, %cst_159 [1] : vector<2x32xf32> to vector<2xf32>
    %332 = vector.shape_cast %331 : vector<2xf32> to vector<2x1xf32>
    %cst_160 = arith.constant 3.200000e+01 : f32
    %333 = vector.broadcast %cst_160 : f32 to vector<2x1xf32>
    %334 = arith.divf %332, %333 : vector<2x1xf32>
    %335 = vector.broadcast %334 : vector<2x1xf32> to vector<2x32xf32>
    %336 = arith.subf %330, %335 : vector<2x32xf32>
    %337 = arith.mulf %336, %336 : vector<2x32xf32>
    %cst_161 = arith.constant dense<0.000000e+00> : vector<2xf32>
    %338 = vector.multi_reduction <add>, %337, %cst_161 [1] : vector<2x32xf32> to vector<2xf32>
    %339 = vector.shape_cast %338 : vector<2xf32> to vector<2x1xf32>
    %cst_162 = arith.constant 3.200000e+01 : f32
    %340 = vector.broadcast %cst_162 : f32 to vector<2x1xf32>
    %341 = arith.divf %339, %340 : vector<2x1xf32>
    %342 = vector.broadcast %334 : vector<2x1xf32> to vector<2x32xf32>
    %343 = arith.subf %330, %342 : vector<2x32xf32>
    %cst_163 = arith.constant 9.99999974E-6 : f32
    %344 = vector.broadcast %cst_163 : f32 to vector<2x1xf32>
    %345 = arith.addf %341, %344 : vector<2x1xf32>
    %346 = math.rsqrt %345 : vector<2x1xf32>
    %347 = vector.broadcast %346 : vector<2x1xf32> to vector<2x32xf32>
    %348 = arith.mulf %343, %347 : vector<2x32xf32>
    %c0_164 = arith.constant 0 : index
    %c70 = arith.constant 70 : index
    %c0_165 = arith.constant 0 : index
    %349 = vector.load %arg8[%c0_164, %c70, %c0_165] : memref<2x72x32xf32, #tpu.memory_space<vmem>>, vector<1x1x32xf32>
    %350 = vector.shape_cast %349 : vector<1x1x32xf32> to vector<1x32xf32>
    %351 = vector.broadcast %350 : vector<1x32xf32> to vector<2x32xf32>
    %352 = arith.mulf %348, %351 : vector<2x32xf32>
    %c0_166 = arith.constant 0 : index
    %c71 = arith.constant 71 : index
    %c0_167 = arith.constant 0 : index
    %353 = vector.load %arg8[%c0_166, %c71, %c0_167] : memref<2x72x32xf32, #tpu.memory_space<vmem>>, vector<1x1x32xf32>
    %354 = vector.shape_cast %353 : vector<1x1x32xf32> to vector<1x32xf32>
    %355 = vector.broadcast %354 : vector<1x32xf32> to vector<2x32xf32>
    %356 = arith.addf %352, %355 : vector<2x32xf32>
    %c0_168 = arith.constant 0 : index
    %c0_169 = arith.constant 0 : index
    %357 = vector.load %arg9[%c0_168, %c0_169] : memref<33x16xf32, #tpu.memory_space<vmem>>, vector<32x16xf32>
    %cst_170 = arith.constant dense<0.000000e+00> : vector<2x16xf32>
    %358 = tpu.matmul %356, %357, %cst_170 {dimension_numbers = #tpu.dot_dimension_numbers<[1], [0], [0], [1], [0, 0, 1, 1], [], []>} : vector<2x32xf32>, vector<32x16xf32>, vector<2x16xf32> -> vector<2x16xf32>
    %c32_171 = arith.constant 32 : index
    %c0_172 = arith.constant 0 : index
    %359 = vector.load %arg9[%c32_171, %c0_172] : memref<33x16xf32, #tpu.memory_space<vmem>>, vector<1x16xf32>
    %360 = vector.broadcast %359 : vector<1x16xf32> to vector<2x16xf32>
    %361 = arith.addf %358, %360 : vector<2x16xf32>
    %c0_173 = arith.constant 0 : index
    %c0_174 = arith.constant 0 : index
    %362 = vector.load %arg10[%c0_173, %c0_174] : memref<2x16xf32, #tpu.memory_space<vmem>>, vector<2x16xf32>
    tpu.vector_store %arg10[%c0_173, %c0_174], %361 {strides = array<i32>} : memref<2x16xf32, #tpu.memory_space<vmem>>, vector<2x16xf32>,
    return
  }
}

</mosaic_0001>

<bundles_post_ra>
// kernel: forward.1
= control target key start
LH: loop header
LB: loop body
LE: loop exit
PB: predicated region body
PF: predicated region fallthrough
CT: control target
= control target key end

     0   :  { %s7930_s0 = inlined_call_operand.vmem [shape: f32[16,768], index: 0, kind: input, shape index: {}]   ;;  %s7931_s1 = inlined_call_operand.vmem [shape: bf16[768,64], index: 1, kind: input, shape index: {}]   ;;  %s7932_s2 = inlined_call_operand.vmem [shape: f32[64,32], index: 2, kind: input, shape index: {}]   ;;  %s7933_s3 = inlined_call_operand.vmem [shape: f32[16,32], index: 3, kind: input, shape index: {}]   ;;  %s7934_s4 = inlined_call_operand.vmem [shape: f32[18,16], index: 4, kind: input, shape index: {}]   ;;  %s7935_s5 = inlined_call_operand.vmem [shape: f32[2,33,1536], index: 5, kind: input, shape index: {}]   ;;  %s7936_s6 = inlined_call_operand.vmem [shape: f32[2,512,32], index: 6, kind: input, shape index: {}]   ;;  %s7937_s7 = inlined_call_operand.vmem [shape: f32[2,33,64], index: 7, kind: input, shape index: {}]   ;;  %s7938_s8 = inlined_call_operand.vmem [shape: f32[2,72,32], index: 8, kind: input, shape index: {}]   ;;  %s7939_s9 = inlined_call_operand.vmem [shape: f32[33,16], index: 9, kind: input, shape index: {}]   ;;  %s7940_s10 = inlined_call_operand.hbm [shape: f32[2,16], index: 10, kind: output, shape index: {}]  }
   0x1   :  { %v6317_v0 = vld [vmem:[%s7931_s1 + $0x40] sm:$0xff]   ;;  %v6319_v2 = vld [vmem:[%s7931_s1 + $0x48] sm:$0xff]   ;;  %v6321_v4 = vld [vmem:[%s7931_s1 + $0x50] sm:$0xff]  }
   0x2   :  { %v6318_v1 = vld [vmem:[%s7931_s1] sm:$0xff]   ;;  %4999 = vmatprep.subr.bf16.mxu1 %v6317_v0  ;;  %v6320_v3 = vld [vmem:[%s7931_s1 + $0x8] sm:$0xff]   ;;  %v6322_v5 = vld [vmem:[%s7931_s1 + $0x10] sm:$0xff]  }
   0x3   :  { %5000 = vmatpush3.bf16.msra.mxu1 %v6318_v1  ;;  %v6323_v6 = vld [vmem:[%s7931_s1 + $0x58] sm:$0xff]   ;;  %v6325_v8 = vld [vmem:[%s7931_s1 + $0x60] sm:$0xff]   ;;  %v6327_v10 = vld [vmem:[%s7931_s1 + $0x68] sm:$0xff]  }
   0x4   :  { %5001 = vmatprep.subr.bf16.mxu1 %v6319_v2  ;;  %v6324_v7 = vld [vmem:[%s7931_s1 + $0x18] sm:$0xff]   ;;  %v6326_v9 = vld [vmem:[%s7931_s1 + $0x20] sm:$0xff]   ;;  %v38_v11 = vld [vmem:[%s7930_s0 + $0x8] sm:$0xff] }
   0x5   :  { %v44_v12 = vld [vmem:[%s7930_s0 + $0x38] sm:$0xff]  ;;  %v6333_v14 = vld [vmem:[%s7931_s1 + $0x140] sm:$0xff]   ;;  %v6328_v15 = vld [vmem:[%s7931_s1 + $0x28] sm:$0xff]  }
   0x6   :  { %v50_v13 = vpack.c.bf16 %v44_v12, %v38_v11  ;;  %v6329_v16 = vld [vmem:[%s7931_s1 + $0x70] sm:$0xff]   ;;  %5043 = vmatprep.subr.bf16.mxu0 %v6333_v14  ;;  %v6335_v17 = vld [vmem:[%s7931_s1 + $0x100] sm:$0xff]   ;;  %v6337_v19 = vld [vmem:[%s7931_s1 + $0x148] sm:$0xff]  }
   0x7   :  { %5002 = vmatpush3.bf16.msra.mxu1 %v6320_v3  ;;  %v6330_v18 = vld [vmem:[%s7931_s1 + $0x30] sm:$0xff]   ;;  %5044 = vmatpush3.bf16.msra.mxu0 %v6335_v17  ;;  %v6331_v20 = vld [vmem:[%s7931_s1 + $0x78] sm:$0xff]   ;;  %v6339_v21 = vld [vmem:[%s7931_s1 + $0x108] sm:$0xff]  }
   0x8   :  { %5003 = vmatprep.subr.bf16.mxu1 %v6321_v4  ;;  %471 = vmatprep.mubr.bf16.mxu1 %v50_v13  ;;  %v6332_v22 = vld [vmem:[%s7931_s1 + $0x38] sm:$0xff]   ;;  %v37_v23 = vld [vmem:[%s7930_s0] sm:$0xff]  ;;  %v43_v24 = vld [vmem:[%s7930_s0 + $0x30] sm:$0xff] }
   0x9   :  { %5045 = vmatprep.subr.bf16.mxu0 %v6337_v19  ;;  %v6341_v25 = vld [vmem:[%s7931_s1 + $0x150] sm:$0xff]   ;;  %v6334_v26 = vld [vmem:[%s7931_s1 + $0xc0] sm:$0xff]   ;;  %v49_v29 = vpack.c.bf16 %v43_v24, %v37_v23  ;;  %v6345_v30 = vld [vmem:[%s7931_s1 + $0x158] sm:$0xff]  }
   0xa   :  { %v6343_v27 = vld [vmem:[%s7931_s1 + $0x110] sm:$0xff]   ;;  %v6336_v28 = vld [vmem:[%s7931_s1 + $0x80] sm:$0xff]   ;;  %v6338_v31 = vld [vmem:[%s7931_s1 + $0xc8] sm:$0xff]  }
   0xb   :  { %5004 = vmatpush3.bf16.msra.mxu1 %v6322_v5  ;;  %5046 = vmatpush3.bf16.msra.mxu0 %v6339_v21  ;;  %v6347_v32 = vld [vmem:[%s7931_s1 + $0x118] sm:$0xff]   ;;  %v6340_v33 = vld [vmem:[%s7931_s1 + $0x88] sm:$0xff]   ;;  %v6349_v34 = vld [vmem:[%s7931_s1 + $0x160] sm:$0xff]  }
   0xc   :  { %5005 = vmatprep.subr.bf16.mxu1 %v6323_v6  ;;  %5047 = vmatprep.subr.bf16.mxu0 %v6341_v25  ;;  %v6342_v35 = vld [vmem:[%s7931_s1 + $0xd0] sm:$0xff]   ;;  %v6351_v36 = vld [vmem:[%s7931_s1 + $0x120] sm:$0xff]   ;;  %v6353_v38 = vld [vmem:[%s7931_s1 + $0x168] sm:$0xff]  }
   0xd   :  { %v6344_v37 = vld [vmem:[%s7931_s1 + $0x90] sm:$0xff]   ;;  %v6346_v39 = vld [vmem:[%s7931_s1 + $0xd8] sm:$0xff]   ;;  %v6355_v40 = vld [vmem:[%s7931_s1 + $0x128] sm:$0xff]  }
   0xe   :  { %v6348_v41 = vld [vmem:[%s7931_s1 + $0x98] sm:$0xff]   ;;  %v6357_v42 = vld [vmem:[%s7931_s1 + $0x170] sm:$0xff]   ;;  %v6350_v43 = vld [vmem:[%s7931_s1 + $0xe0] sm:$0xff]  }
   0xf   :  { %5006 = vmatpush3.bf16.msra.mxu1 %v6324_v7  ;;  %5048 = vmatpush3.bf16.msra.mxu0 %v6343_v27  ;;  %v6359_v44 = vld [vmem:[%s7931_s1 + $0x130] sm:$0xff]   ;;  %v6352_v45 = vld [vmem:[%s7931_s1 + $0xa0] sm:$0xff]   ;;  %v6361_v46 = vld [vmem:[%s7931_s1 + $0x178] sm:$0xff]  }
  0x10   :  { %5007 = vmatprep.subr.bf16.mxu1 %v6325_v8  ;;  %5049 = vmatprep.subr.bf16.mxu0 %v6345_v30  ;;  %v6354_v47 = vld [vmem:[%s7931_s1 + $0xe8] sm:$0xff]   ;;  %v6363_v48 = vld [vmem:[%s7931_s1 + $0x138] sm:$0xff]   ;;  %v41_v54 = vld [vmem:[%s7930_s0 + $0x20] sm:$0xff] }
  0x11   :  { %v42_v49 = vld [vmem:[%s7930_s0 + $0x28] sm:$0xff]  ;;  %v48_v50 = vld [vmem:[%s7930_s0 + $0x58] sm:$0xff]  ;;  %v47_v57 = vld [vmem:[%s7930_s0 + $0x50] sm:$0xff] }
  0x12   :  { %v54_v51 = vpack.c.bf16 %v48_v50, %v42_v49  ;;  %v40_v52 = vld [vmem:[%s7930_s0 + $0x18] sm:$0xff]  ;;  %v46_v53 = vld [vmem:[%s7930_s0 + $0x48] sm:$0xff]  ;;  %v6358_v58 = vld [vmem:[%s7931_s1 + $0xf0] sm:$0xff]   ;;  %v53_v59 = vpack.c.bf16 %v47_v57, %v41_v54 }
  0x13   :  { %5008 = vmatpush3.bf16.msra.mxu1 %v6326_v9  ;;  %5050 = vmatpush3.bf16.msra.mxu0 %v6347_v32  ;;  %v6356_v55 = vld [vmem:[%s7931_s1 + $0xa8] sm:$0xff]   ;;  %v52_v56 = vpack.c.bf16 %v46_v53, %v40_v52 }
  0x14   :  { %5009 = vmatprep.subr.bf16.mxu1 %v6327_v10  ;;  %5051 = vmatprep.subr.bf16.mxu0 %v6349_v34 }
  0x15   :  { %553 = vmatprep.mubr.bf16.mxu0 %v54_v51 }
  0x17   :  { %5010 = vmatpush3.bf16.msra.mxu1 %v6328_v15  ;;  %5052 = vmatpush3.bf16.msra.mxu0 %v6351_v36 }
  0x18   :  { %5011 = vmatprep.subr.bf16.mxu1 %v6329_v16  ;;  %5053 = vmatprep.subr.bf16.mxu0 %v6353_v38 }
  0x1b   :  { %5012 = vmatpush3.bf16.msra.mxu1 %v6330_v18  ;;  %5054 = vmatpush3.bf16.msra.mxu0 %v6355_v40 }
  0x1c   :  { %5013 = vmatprep.subr.bf16.mxu1 %v6331_v20  ;;  %5055 = vmatprep.subr.bf16.mxu0 %v6357_v42 }
  0x1f   :  { %5014 = vmatpush3.bf16.msra.mxu1 %v6332_v22  ;;  %5056 = vmatpush3.bf16.msra.mxu0 %v6359_v44 }
  0x20   :  { %5021 = vmatprep.subr.bf16.mxu1 %v6334_v26  ;;  %5057 = vmatprep.subr.bf16.mxu0 %v6361_v46 }
  0x22   :  { %472 = vmatmul.mubr.bf16.vlgmr.msra.gmra.mrb[0].mxu1 %v49_v29 }
  0x23   :  { %5022 = vmatpush3.bf16.msra.mxu1 %v6336_v28  ;;  %5058 = vmatpush3.bf16.msra.mxu0 %v6363_v48 }
  0x24   :  { %5023 = vmatprep.subr.bf16.mxu1 %v6338_v31 }
  0x27   :  { %5024 = vmatpush3.bf16.msra.mxu1 %v6340_v33 }
  0x28   :  { %5025 = vmatprep.subr.bf16.mxu1 %v6342_v35 }
  0x2b   :  { %5026 = vmatpush3.bf16.msra.mxu1 %v6344_v37 }
  0x2c   :  { %5027 = vmatprep.subr.bf16.mxu1 %v6346_v39 }
  0x2f   :  { %5028 = vmatpush3.bf16.msra.mxu1 %v6348_v41 }
  0x30   :  { %5029 = vmatprep.subr.bf16.mxu1 %v6350_v43 }
  0x33   :  { %5030 = vmatpush3.bf16.msra.mxu1 %v6352_v45 }
  0x34   :  { %5031 = vmatprep.subr.bf16.mxu1 %v6354_v47 }
  0x35   :  { %15 = vsyncpa [#allocation3], 0  ;;  %512 = vmatprep.mubr.bf16.mxu1 %v52_v56  ;;  %554 = vmatmul.mubr.bf16.vlgmr.msra.gmra.mrb[0].mxu0 %v53_v59  ;;  %v6360_v60 = vld [vmem:[%s7931_s1 + $0xb0] sm:$0xff]   ;;  %v6362_v61 = vld [vmem:[%s7931_s1 + $0xf8] sm:$0xff]   ;;  %vm572_vm0 = vcmask 523264   ;;  %vm772_vm1 = vcmask 261120  }
  0x36   :  { %v6364_v62 = vld [vmem:[%s7931_s1 + $0xb8] sm:$0xff]   ;;  %v39_v63 = vld [vmem:[%s7930_s0 + $0x10] sm:$0xff]  ;;  %v45_v0 = vld [vmem:[%s7930_s0 + $0x40] sm:$0xff]  ;;  %vm1316_vm2 = vcmask 130048   ;;  %vm6475_vm3 = vmmov 0   ;;  %vm4619_vm4 = vcmask 254976  }
  0x37   :  { %5032 = vmatpush3.bf16.msra.mxu1 %v6356_v55  ;;  %v51_v1 = vpack.c.bf16 %v45_v0, %v39_v63  ;;  %v562_v2 = vld [vmem:[%s7932_s2] sm:$0xff]  ;;  %v563_v3 = vld [vmem:[%s7932_s2 + $0x8] sm:$0xff]  ;;  %v564_v4 = vld [vmem:[%s7932_s2 + $0x10] sm:$0xff]  ;;  %vm4727_vm5 = vcmask 123904  }
  0x38   :  { %5033 = vmatprep.subr.bf16.mxu1 %v6358_v58  ;;  %v5812_v5 = vpack.c.bf16 %v563_v3, %v562_v2  ;;  %v565_v6 = vld [vmem:[%s7932_s2 + $0x18] sm:$0xff]  ;;  %v566_v8 = vld [vmem:[%s7932_s2 + $0x20] sm:$0xff]  ;;  %v567_v9 = vld [vmem:[%s7932_s2 + $0x28] sm:$0xff] }
  0x39   :  { %v5816_v7 = vpack.c.bf16 %v565_v6, %v564_v4  ;;  %v5820_v10 = vpack.c.bf16 %v567_v9, %v566_v8  ;;  %v568_v11 = vld [vmem:[%s7932_s2 + $0x30] sm:$0xff]  ;;  %v569_v12 = vld [vmem:[%s7932_s2 + $0x38] sm:$0xff]  ;;  %v657_v14 = vld [vmem:[%s7935_s5 + $0x8] sm:$0xff] }
  0x3a   :  { %v5824_v13 = vpack.c.bf16 %v569_v12, %v568_v11  ;;  %v669_v15 = vld [vmem:[%s7935_s5 + $0x68] sm:$0xff]  ;;  %v660_v20 = vld [vmem:[%s7935_s5 + $0x20] sm:$0xff]  ;;  %v658_v3 = vld [vmem:[%s7935_s5 + $0x10] sm:$0xff] }
  0x3b   :  { %5034 = vmatpush3.bf16.msra.mxu1 %v6360_v60  ;;  %v661_v16 = vld [vmem:[%s7935_s5 + $0x28] sm:$0xff]  ;;  %v5828_v17 = vpack.c.bf16 %v669_v15, %v657_v14  ;;  %v672_v21 = vld [vmem:[%s7935_s5 + $0x80] sm:$0xff]  ;;  %v659_v60 = vld [vmem:[%s7935_s5 + $0x18] sm:$0xff] }
  0x3c   :  { %5035 = vmatprep.subr.bf16.mxu1 %v6362_v61  ;;  %v673_v18 = vld [vmem:[%s7935_s5 + $0x88] sm:$0xff]  ;;  %v5846_v22 = vpack.c.bf16 %v672_v21, %v660_v20  ;;  %v656_v42 = vld [vmem:[%s7935_s5] sm:$0xff]  ;;  %v671_v61 = vld [vmem:[%s7935_s5 + $0x78] sm:$0xff] }
  0x3d   :  { %v5844_v19 = vpack.c.bf16 %v673_v18, %v661_v16  ;;  %v668_v43 = vld [vmem:[%s7935_s5 + $0x60] sm:$0xff]  ;;  %v681_v48 = vld [vmem:[%s7935_s5 + $0xc8] sm:$0xff]  ;;  %v670_v4 = vld [vmem:[%s7935_s5 + $0x70] sm:$0xff] }
  0x3e   :  { %v5830_v46 = vpack.c.bf16 %v668_v43, %v656_v42  ;;  %v693_v49 = vld [vmem:[%s7935_s5 + $0x128] sm:$0xff]  ;;  %v680_v53 = vld [vmem:[%s7935_s5 + $0xc0] sm:$0xff]  ;;  %v683_v8 = vld [vmem:[%s7935_s5 + $0xd8] sm:$0xff]  ;;  %v5838_v14 = vpack.c.bf16 %v670_v4, %v658_v3 }
  0x3f   :  { %5036 = vmatpush3.bf16.msra.mxu1 %v6364_v62  ;;  %5845 = vmatprep.subr.bf16.mxu0 %v5844_v19  ;;  %v685_v50 = vld [vmem:[%s7935_s5 + $0xe8] sm:$0xff]  ;;  %v5832_v51 = vpack.c.bf16 %v693_v49, %v681_v48  ;;  %v692_v54 = vld [vmem:[%s7935_s5 + $0x120] sm:$0xff]  ;;  %v5836_v62 = vpack.c.bf16 %v671_v61, %v659_v60  ;;  %v682_v16 = vld [vmem:[%s7935_s5 + $0xd0] sm:$0xff] }
  0x40   :  { %5813 = vmatprep.subr.bf16.mxu1 %v5812_v5  ;;  %5847 = vmatpush1.bf16.msra.mxu0 %v5846_v22  ;;  %v697_v52 = vld [vmem:[%s7935_s5 + $0x148] sm:$0xff]  ;;  %v5834_v56 = vpack.c.bf16 %v692_v54, %v680_v53  ;;  %v684_v57 = vld [vmem:[%s7935_s5 + $0xe0] sm:$0xff]  ;;  %v694_v18 = vld [vmem:[%s7935_s5 + $0x130] sm:$0xff] }
  0x41   :  { %v5848_v55 = vpack.c.bf16 %v697_v52, %v685_v50  ;;  %v696_v58 = vld [vmem:[%s7935_s5 + $0x140] sm:$0xff]  ;;  %v665_v63 = vld [vmem:[%s7935_s5 + $0x48] sm:$0xff]  ;;  %v666_v42 = vld [vmem:[%s7935_s5 + $0x50] sm:$0xff] }
  0x42   :  { %513 = vmatmul.mubr.bf16.vlgmr.msra.gmra.mrb[4].mxu1 %v51_v1  ;;  %v5850_v59 = vpack.c.bf16 %v696_v58, %v684_v57  ;;  %v677_v0 = vld [vmem:[%s7935_s5 + $0xa8] sm:$0xff]  ;;  %v6473_v1 = vmov 0.0   ;;  %v676_v6 = vld [vmem:[%s7935_s5 + $0xa0] sm:$0xff]  ;;  %v678_v43 = vld [vmem:[%s7935_s5 + $0xb0] sm:$0xff] }
  0x43   :  { %5815 = vmatpush3.bf16.msra.mxu1 %v5812_v5  ;;  %5849 = vmatprep.subr.bf16.mxu0 %v5848_v55  ;;  %v5860_v2 = vpack.c.bf16 %v677_v0, %v665_v63  ;;  %v664_v5 = vld [vmem:[%s7935_s5 + $0x40] sm:$0xff]  ;;  %v689_v11 = vld [vmem:[%s7935_s5 + $0x108] sm:$0xff]  ;;  %v690_v48 = vld [vmem:[%s7935_s5 + $0x110] sm:$0xff] }
  0x44   :  { %5817 = vmatprep.subr.bf16.mxu1 %v5816_v7  ;;  %5851 = vmatpush1.bf16.msra.mxu0 %v5850_v59  ;;  %v701_v12 = vld [vmem:[%s7935_s5 + $0x168] sm:$0xff]  ;;  %v5862_v15 = vpack.c.bf16 %v676_v6, %v664_v5  ;;  %v688_v19 = vld [vmem:[%s7935_s5 + $0x100] sm:$0xff]  ;;  %v702_v49 = vld [vmem:[%s7935_s5 + $0x170] sm:$0xff] }
  0x45   :  { %997 = vmatprep.mubr.f32.mxu0 %v6473_v1  ;;  %5861 = vmatprep.subr.bf16.mxu0 %v5860_v2  ;;  %v700_v20 = vld [vmem:[%s7935_s5 + $0x160] sm:$0xff]  ;;  %v571_v21 = vld [vmem:[%s7933_s3 + $0x8] sm:$0xff]  ;;  %v5874_v50 = vpack.c.bf16 %v702_v49, %v690_v48 }
  0x46   :  { %v4795_v53 = vld [vmem:[%s7935_s5 + $0x180] ss:$8 sm:$0xf] }
  0x47   :  { %5819 = vmatpush3.bf16.msra.mxu1 %v5816_v7  ;;  %v570_v7 = vld [vmem:[%s7933_s3] sm:$0xff]  ;;  %s6476_s3 = smov [#allocation2]  }
  0x48   :  { %5821 = vmatprep.subr.bf16.mxu1 %v5820_v10  ;;  %v4796_v54 = vld [vmem:[%s7935_s5 + $0x180] ss:$8 sm:$0xf0]  ;;  %s4735_s30 = sshll.u32 %s6476_s3, 4  ;;  %s4736_s30 = int_to_ptr.vmem [resolvable:$true] %s4735_s30 }
  0x49   :  { %v6936_v55 = vor.u32 %v4796_v54, %v4795_v53  ;;  %v6959_v6 = vld [vmem:[%s7935_s5 + $0x1c0] ss:$8 sm:$0xf]  ;;  %p6454_p1 = scmp.lt.s32.totalorder %s4736_s30, %s4736_s30 }
  0x4b   :  { %5823 = vmatpush3.bf16.msra.mxu1 %v5820_v10  ;;  %v695_v10 = vld [vmem:[%s7935_s5 + $0x138] sm:$0xff] }
  0x4c   :  { %5825 = vmatprep.subr.bf16.mxu1 %v5824_v13  ;;  %v5840_v22 = vpack.c.bf16 %v695_v10, %v683_v8 }
  0x4f   :  { %5827 = vmatpush3.bf16.msra.mxu1 %v5824_v13 }
  0x50   :  { %5829 = vmatprep.subr.bf16.mxu1 %v5828_v17 }
  0xf5   :  { %v5015_v23 = vpop.f32.mrb[0].mxu1 }
  0xf6   :  { %v5016_v24 = vpop.f32.mrb[1].mxu1 }
  0xf7   :  { %v5017_v25 = vadd.f32 %v5016_v24, %v5015_v23  ;;  %v5018_v26 = vpop.f32.mrb[2].mxu1  ;;  %v5864_v23 = vpack.c.bf16 %v701_v12, %v689_v11  ;;  %v663_v24 = vld [vmem:[%s7935_s5 + $0x38] sm:$0xff] }
  0xf8   :  { %v5019_v27 = vpop.f32.mrb[3].mxu1 }
  0xf9   :  { %v5020_v28 = vadd.f32 %v5019_v27, %v5018_v26  ;;  %v5842_v26 = vpack.c.bf16 %v694_v18, %v682_v16  ;;  %v5866_v27 = vpack.c.bf16 %v700_v20, %v688_v19 }
 0x108   :  { %v5059_v29 = vpop.f32.mrb[0].mxu0 }
 0x109   :  { %v5060_v30 = vpop.f32.mrb[1].mxu0 }
 0x10a   :  { %v5061_v31 = vadd.f32 %v5060_v30, %v5059_v29  ;;  %v5062_v32 = vpop.f32.mrb[2].mxu0  ;;  %v662_v29 = vld [vmem:[%s7935_s5 + $0x30] sm:$0xff] }
 0x10b   :  { %v5063_v33 = vpop.f32.mrb[3].mxu0  ;;  %v674_v30 = vld [vmem:[%s7935_s5 + $0x90] sm:$0xff] }
 0x10c   :  { %v5064_v34 = vadd.f32 %v5063_v33, %v5062_v32  ;;  %v687_v32 = vld [vmem:[%s7935_s5 + $0xf8] sm:$0xff] }
 0x10d   :  { %v699_v33 = vld [vmem:[%s7935_s5 + $0x158] sm:$0xff] }
 0x115   :  { %v5037_v35 = vpop.f32.mrb[4].mxu1 }
 0x116   :  { %v5038_v36 = vpop.f32.mrb[5].mxu1 }
 0x117   :  { %v5039_v37 = vadd.f32 %v5038_v36, %v5037_v35  ;;  %v5040_v38 = vpop.f32.mrb[6].mxu1  ;;  %v5856_v35 = vpack.c.bf16 %v699_v33, %v687_v32  ;;  %v686_v36 = vld [vmem:[%s7935_s5 + $0xf0] sm:$0xff] }
 0x118   :  { %v5041_v39 = vpop.f32.mrb[7].mxu1 }
 0x119   :  { %v515_v40 = vadd.f32 %v5039_v37, %v5017_v25  ;;  %v5042_v41 = vadd.f32 %v5041_v39, %v5040_v38  ;;  %v675_v25 = vld [vmem:[%s7935_s5 + $0x98] sm:$0xff]  ;;  %v698_v37 = vld [vmem:[%s7935_s5 + $0x150] sm:$0xff] }
 0x11a   :  { %v667_v38 = vld [vmem:[%s7935_s5 + $0x58] sm:$0xff] }
 0x11b   :  { %v556_v44 = vadd.f32 %v5061_v31, %v515_v40  ;;  %v518_v45 = vadd.f32 %v5042_v41, %v5020_v28  ;;  %v5852_v31 = vpack.c.bf16 %v675_v25, %v663_v24  ;;  %v679_v39 = vld [vmem:[%s7935_s5 + $0xb8] sm:$0xff]  ;;  %v5858_v40 = vpack.c.bf16 %v698_v37, %v686_v36 }
 0x11c   :  { %v5868_v41 = vpack.c.bf16 %v679_v39, %v667_v38 }
 0x11d   :  { %v559_v47 = vadd.f32 %v5064_v34, %v518_v45  ;;  %5339 = vmatprep.mubr.msk.f32.mxu1 %vm572_vm0, %v556_v44  ;;  %v5854_v34 = vpack.c.bf16 %v674_v30, %v662_v29  ;;  %v691_v44 = vld [vmem:[%s7935_s5 + $0x118] sm:$0xff] }
 0x11e   :  { %v703_v45 = vld [vmem:[%s7935_s5 + $0x178] sm:$0xff] }
 0x11f   :  { %5340 = vmatmul.mubr.msk.f32.vlgmr.msra.gmra.mrb[8].mxu1 %vm572_vm0, %v559_v47  ;;  %v5872_v47 = vpack.c.bf16 %v703_v45, %v691_v44 }
 0x120   :  { %5831 = vmatpush1.bf16.msra.mxu1 %v5830_v46  ;;  %843 = vmatprep.mubr.f32.mxu1 %v6473_v1  ;;  %v5870_v46 = vpack.c.bf16 %v678_v43, %v666_v42 }
 0x121   :  { %5833 = vmatprep.subr.bf16.mxu1 %v5832_v51  ;;  %v712_v51 = vlaneseq }
 0x123   :  { %v6928_v52 = vshrl.u32 %v712_v51, 7 }
 0x124   :  { %5835 = vmatpush1.bf16.msra.mxu1 %v5834_v56 }
 0x125   :  { %5837 = vmatprep.subr.bf16.mxu1 %v5836_v62  ;;  %v6939_v56 = vsub.s32 0, %v6928_v52  ;;  %v730_v58 = vsub.s32 4, %v6928_v52  ;;  %v6945_v59 = vsub.s32 1, %v6928_v52  ;;  %v734_v60 = vsub.s32 5, %v6928_v52 }
 0x126   :  { %v6969_v25 = vsub.s32 3, %v6928_v52  ;;  %v742_v42 = vsub.s32 7, %v6928_v52  ;;  %v738_v48 = vsub.s32 6, %v6928_v52 }
 0x127   :  { %v715_v57 = vrot.slane %v6936_v55, %v6939_v56  ;;  %v731_v0 = vrot.slane %v6936_v55, %v730_v58  ;;  %v719_v4 = vrot.slane %v6936_v55, %v6945_v59  ;;  %v735_v5 = vrot.slane %v6936_v55, %v734_v60 }
 0x128   :  { %v727_v32 = vrot.slane %v6936_v55, %v6969_v25  ;;  %v739_v53 = vrot.slane %v6936_v55, %v738_v48 }
 0x1f2   :  { %v5341_v9 = vpop.f32.mrb[8].mxu1 }
 0x1f3   :  { %v645_v13 = vpop.f32.mrb[9].mxu1  ;;  %v6854_v28 = vadd.f32 %v5341_v9, %v571_v21 }
 0x1f4   :  { %v6830_v17 = vadd.f32 %v645_v13, %v570_v7  ;;  %v6962_v13 = vsub.s32 2, %v6928_v52 }
 0x1f6   :  { %4798 = vmatmul.mubr.msk.f32.vlgmr.msra.gmra.mrb[10].mxu1 %vm772_vm1, %v6830_v17  ;;  %4802 = vmatmul.mubr.msk.f32.vlgmr.msra.gmra.mrb[4].mxu0 %vm772_vm1, %v6830_v17 }
 0x1f7   :  { %5839 = vmatpush1.bf16.msra.mxu1 %v5838_v14  ;;  %5863 = vmatpush1.bf16.msra.mxu0 %v5862_v15  ;;  %v751_v14 = vrot.slane %v6959_v6, %v6945_v59 }
 0x1f8   :  { %849 = vmatprep.mubr.f32.mxu1 %v6473_v1  ;;  %1003 = vmatprep.mubr.f32.mxu0 %v6473_v1 }
 0x1f9   :  { %5841 = vmatprep.subr.bf16.mxu1 %v5840_v22  ;;  %5865 = vmatprep.subr.bf16.mxu0 %v5864_v23 }
 0x1fa   :  { %4799 = vmatmul.mubr.msk.f32.gmra.mrb[12].mxu1 %vm772_vm1, %v6854_v28  ;;  %4803 = vmatmul.mubr.msk.f32.gmra.mrb[6].mxu0 %vm772_vm1, %v6854_v28 }
 0x1fb   :  { %5843 = vmatpush1.bf16.msra.mxu1 %v5842_v26  ;;  %5867 = vmatpush1.bf16.msra.mxu0 %v5866_v27  ;;  %v723_v26 = vrot.slane %v6936_v55, %v6962_v13  ;;  %v747_v27 = vrot.slane %v6959_v6, %v6939_v56 }
 0x1fc   :  { %920 = vmatprep.mubr.f32.mxu1 %v6473_v1  ;;  %1151 = vmatprep.mubr.f32.mxu0 %v6473_v1 }
 0x1fd   :  { %5853 = vmatprep.subr.bf16.mxu1 %v5852_v31 }
 0x1fe   :  { %4800 = vmatmul.mubr.msk.f32.vlgmr.msra.gmra.mrb[14].mxu1 %vm772_vm1, %v6830_v17  ;;  %4806 = vmatmul.mubr.msk.f32.vlgmr.msra.gmra.mrb[8].mxu0 %vm772_vm1, %v6830_v17 }
 0x1ff   :  { %5855 = vmatpush1.bf16.msra.mxu1 %v5854_v34  ;;  %926 = vmatprep.mubr.f32.mxu1 %v6473_v1 }
 0x200   :  { %1157 = vmatprep.mubr.f32.mxu0 %v6473_v1  ;;  %5857 = vmatprep.subr.bf16.mxu1 %v5856_v35 }
 0x202   :  { %4801 = vmatmul.mubr.msk.f32.gmra.mrb[16].mxu1 %vm772_vm1, %v6854_v28  ;;  %4807 = vmatmul.mubr.msk.f32.gmra.mrb[10].mxu0 %vm772_vm1, %v6854_v28 }
 0x203   :  { %5859 = vmatpush1.bf16.msra.mxu1 %v5858_v40  ;;  %1074 = vmatprep.mubr.f32.mxu1 %v6473_v1 }
 0x204   :  { %5869 = vmatprep.subr.bf16.mxu1 %v5868_v41 }
 0x206   :  { %4804 = vmatmul.mubr.msk.f32.vlgmr.msra.gmra.mrb[18].mxu1 %vm772_vm1, %v6830_v17 }
 0x207   :  { %5871 = vmatpush1.bf16.msra.mxu1 %v5870_v46  ;;  %1080 = vmatprep.mubr.f32.mxu1 %v6473_v1 }
 0x208   :  { %5873 = vmatprep.subr.bf16.mxu1 %v5872_v47 }
 0x20a   :  { %4805 = vmatmul.mubr.msk.f32.gmra.mrb[20].mxu1 %vm772_vm1, %v6854_v28 }
 0x20b   :  { %5875 = vmatpush1.bf16.msra.mxu1 %v5874_v50  ;;  %1228 = vmatprep.mubr.f32.mxu1 %v6473_v1  ;;  %v743_v50 = vrot.slane %v6936_v55, %v742_v42 }
 0x20e   :  { %4808 = vmatmul.mubr.msk.f32.vlgmr.msra.gmra.mrb[22].mxu1 %vm772_vm1, %v6830_v17 }
 0x20f   :  { %1234 = vmatprep.mubr.f32.mxu1 %v6473_v1 }
 0x212   :  { %4809 = vmatmul.mubr.msk.f32.gmra.mrb[24].mxu1 %vm772_vm1, %v6854_v28 }
 0x2c9   :  { %v845_v61 = vpop.f32.mrb[10].mxu1  ;;  %v999_v62 = vpop.f32.mrb[4].mxu0 }
 0x2ca   :  { %v846_v63 = vadd.f32 %v845_v61, %v715_v57  ;;  %v847_v2 = vpop.f32.mrb[11].mxu1  ;;  %v1001_v3 = vpop.f32.mrb[5].mxu0  ;;  %v1000_v9 = vadd.f32 %v999_v62, %v731_v0  ;;  %v759_v62 = vrot.slane %v6959_v6, %v6969_v25 }
 0x2cb   :  { %v848_v15 = vadd.f32 %v847_v2, %v719_v4  ;;  %v1002_v16 = vadd.f32 %v1001_v3, %v735_v5 }
 0x2cc   :  { %5346 = vmatprep.mubr.f32.mxu0 %v846_v63 }
 0x2cd   :  { %v851_v7 = vpop.f32.mrb[12].mxu1  ;;  %v1005_v8 = vpop.f32.mrb[6].mxu0 }
 0x2ce   :  { %v1006_v10 = vadd.f32 %v1005_v8, %v731_v0  ;;  %v853_v11 = vpop.f32.mrb[13].mxu1  ;;  %v1007_v12 = vpop.f32.mrb[7].mxu0  ;;  %v852_v45 = vadd.f32 %v851_v7, %v715_v57 }
 0x2cf   :  { %v854_v18 = vadd.f32 %v853_v11, %v719_v4  ;;  %v1008_v19 = vadd.f32 %v1007_v12, %v735_v5  ;;  %v755_v4 = vrot.slane %v6959_v6, %v6962_v13 }
 0x2d0   :  { %v5884_v20 = vpack.c.bf16 %v1006_v10, %v1000_v9 }
 0x2d1   :  { %v5876_v21 = vpack.c.bf16 %v854_v18, %v848_v15  ;;  %v6966_v22 = vpack.c.bf16 %v1008_v19, %v1002_v16  ;;  %v922_v23 = vpop.f32.mrb[14].mxu1  ;;  %v1153_v24 = vpop.f32.mrb[8].mxu0 }
 0x2d2   :  { %v924_v29 = vpop.f32.mrb[15].mxu1  ;;  %v1155_v30 = vpop.f32.mrb[9].mxu0  ;;  %v923_v35 = vadd.f32 %v922_v23, %v723_v26  ;;  %v1154_v36 = vadd.f32 %v1153_v24, %v747_v27 }
 0x2d3   :  { %v6975_v31 = vadd.f32 %v1155_v30, %v751_v14  ;;  %5877 = vmatprep.subr.bf16.mxu0 %v5876_v21  ;;  %v925_v47 = vadd.f32 %v924_v29, %v727_v32 }
 0x2d4   :  { %5879 = vmatpush3.bf16.xpose.msra.mxu0 %v5876_v21  ;;  %v7002_v21 = vld [vmem:[%s7934_s4] sm:$0xff] }
 0x2d5   :  { %v928_v33 = vpop.f32.mrb[16].mxu1  ;;  %v1159_v34 = vpop.f32.mrb[10].mxu0  ;;  %5885 = vmatprep.subr.bf16.mxu0 %v5884_v20 }
 0x2d6   :  { %v929_v37 = vadd.f32 %v928_v33, %v723_v26  ;;  %v1160_v38 = vadd.f32 %v1159_v34, %v747_v27  ;;  %v930_v39 = vpop.f32.mrb[17].mxu1  ;;  %v1161_v40 = vpop.f32.mrb[11].mxu0  ;;  %v7008_v26 = vld [vmem:[%s7934_s4 + $0x8] sm:$0xff] }
 0x2d7   :  { %v6979_v41 = vadd.f32 %v1161_v40, %v751_v14  ;;  %v931_v63 = vadd.f32 %v930_v39, %v727_v32 }
 0x2d8   :  { %v5880_v43 = vpack.c.bf16 %v929_v37, %v923_v35  ;;  %v5960_v44 = vpack.c.bf16 %v1160_v38, %v1154_v36 }
 0x2d9   :  { %v1076_v46 = vpop.f32.mrb[18].mxu1 }
 0x2da   :  { %v1078_v49 = vpop.f32.mrb[19].mxu1  ;;  %5881 = vmatprep.subr.bf16.mxu1 %v5880_v43  ;;  %v1077_v3 = vadd.f32 %v1076_v46, %v739_v53 }
 0x2db   :  { %5347 = vmatmul.mubr.f32.vlgmr.msra.gmra.mrb[12].mxu0 %v852_v45  ;;  %5883 = vmatpush3.bf16.msra.mxu1 %v5880_v43  ;;  %v1079_v57 = vadd.f32 %v1078_v49, %v743_v50 }
 0x2dc   :  { %5887 = vmatpush3.bf16.xpose.msra.mxu0 %v5884_v20  ;;  %5360 = vmatprep.mubr.f32.mxu0 %v925_v47 }
 0x2dd   :  { %5889 = vmatprep.subr.bf16.mxu1 %v6966_v22  ;;  %v1082_v51 = vpop.f32.mrb[20].mxu1 }
 0x2de   :  { %v1084_v54 = vpop.f32.mrb[21].mxu1  ;;  %v1083_v14 = vadd.f32 %v1082_v51, %v739_v53 }
 0x2df   :  { %v1085_v61 = vadd.f32 %v1084_v54, %v743_v50 }
 0x2e1   :  { %v5956_v0 = vpack.c.bf16 %v1085_v61, %v1079_v57  ;;  %v1230_v2 = vpop.f32.mrb[22].mxu1 }
 0x2e2   :  { %v1232_v5 = vpop.f32.mrb[23].mxu1  ;;  %v1231_v8 = vadd.f32 %v1230_v2, %v755_v4 }
 0x2e3   :  { %v1233_v7 = vadd.f32 %v1232_v5, %v759_v62  ;;  %5361 = vmatmul.mubr.f32.vlgmr.msra.gmra.mrb[14].mxu0 %v931_v63  ;;  %5957 = vmatprep.subr.bf16.mxu0 %v5956_v0 }
 0x2e4   :  { %5959 = vmatpush3.bf16.xpose.msra.mxu0 %v5956_v0  ;;  %5444 = vmatprep.mubr.f32.mxu0 %v1077_v3 }
 0x2e5   :  { %v1236_v55 = vpop.f32.mrb[24].mxu1  ;;  %5961 = vmatprep.subr.bf16.mxu0 %v5960_v44 }
 0x2e6   :  { %v1237_v9 = vadd.f32 %v1236_v55, %v755_v4  ;;  %v1238_v10 = vpop.f32.mrb[25].mxu1 }
 0x2e7   :  { %v1239_v11 = vadd.f32 %v1238_v10, %v759_v62 }
 0x2e8   :  { %v6994_v12 = vpack.c.bf16 %v1237_v9, %v1231_v8 }
 0x2e9   :  { %v6996_v15 = vpack.c.bf16 %v1239_v11, %v1233_v7 }
 0x2eb   :  { %5445 = vmatmul.mubr.f32.vlgmr.msra.gmra.mrb[16].mxu0 %v1083_v14 }
 0x2ec   :  { %5963 = vmatpush3.bf16.msra.mxu0 %v5960_v44 }
 0x2ed   :  { %5997 = vmatprep.subr.bf16.mxu0 %v6994_v12 }
 0x3ae   :  { %v5348_v6 = vpop.f32.mrb[12].mxu0 }
 0x3af   :  { %v1307_v16 = vpop.f32.mrb[13].mxu0  ;;  %v1313_v57 = vadd.f32 %v5348_v6, %v7008_v26 }
 0x3b0   :  { %v1308_v30 = vadd.f32 %v1307_v16, %v7002_v21 }
 0x3b1   :  { %v1320_v0 = vsel %vm1316_vm2, %v1313_v57, -inf }
 0x3b2   :  { %v1317_v34 = vsel %vm1316_vm2, %v1308_v30, -inf }
 0x3b6   :  { %v5362_v18 = vpop.f32.mrb[14].mxu0 }
 0x3b7   :  { %v1502_v19 = vpop.f32.mrb[15].mxu0  ;;  %v1508_v63 = vadd.f32 %v5362_v18, %v7008_v26 }
 0x3b8   :  { %v1503_v33 = vadd.f32 %v1502_v19, %v7002_v21 }
 0x3b9   :  { %v1514_v4 = vsel %vm1316_vm2, %v1508_v63, -inf }
 0x3ba   :  { %v1511_v35 = vsel %vm1316_vm2, %v1503_v33, -inf }
 0x3be   :  { %v5446_v20 = vpop.f32.mrb[16].mxu0 }
 0x3bf   :  { %v1846_v23 = vpop.f32.mrb[17].mxu0  ;;  %v1852_v27 = vadd.f32 %v5446_v20, %v7008_v26 }
 0x3c0   :  { %v1847_v24 = vadd.f32 %v1846_v23, %v7002_v21 }
 0x3c1   :  { %v1858_v32 = vsel %vm1316_vm2, %v1852_v27, -inf }
 0x3c2   :  { %v1855_v29 = vsel %vm1316_vm2, %v1847_v24, -inf }
 0x3c3   :  { %1856 = vmax.xlane.f32.xlu0 %v1855_v29 }
 0x3c7   :  { %1859 = vmax.xlane.f32.xlu0 %v1858_v32 }
 0x3cb   :  { %1318 = vmax.xlane.f32.xlu0 %v1317_v34 }
 0x3cf   :  { %1512 = vmax.xlane.f32.xlu0 %v1511_v35  ;;  %v1614_v35 = vld [vmem:[%s7936_s6 + $0x80] sm:$0xff] }
 0x450   :  { %v1857_v36 = vpop.xlane.xlu0 %1856 }
 0x451   :  { %v1861_v37 = vsub.f32 %v1847_v24, %v1857_v36 }
 0x453   :  { %v1863_v38 = vmul.f32 1.442695, %v1861_v37 }
 0x454   :  { %v1860_v39 = vpop.xlane.xlu0 %1859 }
 0x455   :  { %6365 = vpow2.f32 %v1863_v38  ;;  %v1862_v40 = vsub.f32 %v1852_v27, %v1860_v39 }
 0x457   :  { %v1865_v43 = vmul.f32 1.442695, %v1862_v40  ;;  %v1616_v40 = vld [vmem:[%s7936_s6 + $0x90] sm:$0xff] }
 0x458   :  { %v1319_v44 = vpop.xlane.xlu0 %1318 }
 0x459   :  { %6367 = vpow2.f32 %v1865_v43  ;;  %v1323_v45 = vsub.f32 %v1308_v30, %v1319_v44  ;;  %v1617_v43 = vld [vmem:[%s7936_s6 + $0x98] sm:$0xff] }
 0x45b   :  { %v1325_v46 = vmul.f32 1.442695, %v1323_v45 }
 0x45c   :  { %v1513_v47 = vpop.xlane.xlu0 %1512 }
 0x45d   :  { %6369 = vpow2.f32 %v1325_v46  ;;  %v1517_v49 = vsub.f32 %v1503_v33, %v1513_v47  ;;  %v5896_v46 = vpack.c.bf16 %v1617_v43, %v1616_v40  ;;  %v1618_v47 = vld [vmem:[%s7936_s6 + $0xa0] sm:$0xff] }
 0x45f   :  { %v6366_v50 = vpop.eup %6365  ;;  %v1519_v51 = vmul.f32 1.442695, %v1517_v49  ;;  %v1619_v49 = vld [vmem:[%s7936_s6 + $0xa8] sm:$0xff] }
 0x460   :  { %v1867_v53 = vsel %vm1316_vm2, %v6366_v50, 0.0 }
 0x461   :  { %6371 = vpow2.f32 %v1519_v51  ;;  %1868 = vadd.xlane.f32.xlu1 %v1867_v53  ;;  %v1621_v51 = vld [vmem:[%s7936_s6 + $0xb8] sm:$0xff] }
 0x463   :  { %v6368_v54 = vpop.eup %6367 }
 0x464   :  { %v1870_v61 = vsel %vm1316_vm2, %v6368_v54, 0.0 }
 0x465   :  { %1871 = vadd.xlane.f32.xlu1 %v1870_v61 }
 0x467   :  { %v6370_v62 = vpop.eup %6369 }
 0x468   :  { %v1329_v2 = vsel %vm1316_vm2, %v6370_v62, 0.0 }
 0x469   :  { %1321 = vmax.xlane.f32.xlu1 %v1320_v0  ;;  %1330 = vadd.xlane.f32.xlu0 %v1329_v2 }
 0x46b   :  { %v6372_v3 = vpop.eup %6371 }
 0x46c   :  { %v1523_v5 = vsel %vm1316_vm2, %v6372_v3, 0.0 }
 0x46d   :  { %1515 = vmax.xlane.f32.xlu1 %v1514_v4  ;;  %1524 = vadd.xlane.f32.xlu0 %v1523_v5  ;;  %v1622_v4 = vld [vmem:[%s7936_s6 + $0xc0] sm:$0xff]  ;;  %v1623_v5 = vld [vmem:[%s7936_s6 + $0xc8] sm:$0xff] }
 0x4ee   :  { %v1869_v7 = vpop.xlane.xlu1 %1868 }
 0x4ef   :  { %6373 = vrcp.f32 %v1869_v7  ;;  %v5908_v7 = vpack.c.bf16 %v1623_v5, %v1622_v4  ;;  %v1958_v4 = vld [vmem:[%s7936_s6 + $0x100] sm:$0xff]  ;;  %v1959_v5 = vld [vmem:[%s7936_s6 + $0x108] sm:$0xff] }
 0x4f2   :  { %v1872_v55 = vpop.xlane.xlu1 %1871 }
 0x4f3   :  { %6375 = vrcp.f32 %v1872_v55 }
 0x4f6   :  { %v1322_v8 = vpop.xlane.xlu1 %1321  ;;  %v1331_v9 = vpop.xlane.xlu0 %1330 }
 0x4f7   :  { %v1324_v10 = vsub.f32 %v1313_v57, %v1322_v8  ;;  %6377 = vrcp.f32 %v1331_v9  ;;  %v1626_v8 = vld [vmem:[%s7936_s6 + $0xe0] sm:$0xff]  ;;  %v1627_v9 = vld [vmem:[%s7936_s6 + $0xe8] sm:$0xff] }
 0x4f9   :  { %v6374_v11 = vpop.eup %6373  ;;  %v1327_v14 = vmul.f32 1.442695, %v1324_v10  ;;  %v5916_v10 = vpack.c.bf16 %v1627_v9, %v1626_v8  ;;  %v1962_v8 = vld [vmem:[%s7936_s6 + $0x120] sm:$0xff]  ;;  %v1963_v9 = vld [vmem:[%s7936_s6 + $0x128] sm:$0xff] }
 0x4fa   :  { %v1516_v6 = vpop.xlane.xlu1 %1515  ;;  %v1875_v16 = vmul.f32 %v6374_v11, %v6366_v50  ;;  %v5900_v50 = vpack.c.bf16 %v1619_v49, %v1618_v47  ;;  %v1628_v11 = vld [vmem:[%s7936_s6 + $0xf0] sm:$0xff]  ;;  %v1428_v47 = vld [vmem:[%s7936_s6 + $0x40] sm:$0xff]  ;;  %v1429_v49 = vld [vmem:[%s7936_s6 + $0x48] sm:$0xff] }
 0x4fb   :  { %6379 = vpow2.f32 %v1327_v14  ;;  %v1518_v18 = vsub.f32 %v1508_v63, %v1516_v6  ;;  %v1629_v14 = vld [vmem:[%s7936_s6 + $0xf8] sm:$0xff] }
 0x4fc   :  { %5451 = vmatprep.mubr.msk.f32.mxu0 %vm1316_vm2, %v1875_v16  ;;  %v5920_v6 = vpack.c.bf16 %v1629_v14, %v1628_v11  ;;  %v1420_v16 = vld [vmem:[%s7936_s6] sm:$0xff]  ;;  %v1964_v11 = vld [vmem:[%s7936_s6 + $0x130] sm:$0xff]  ;;  %v1965_v14 = vld [vmem:[%s7936_s6 + $0x138] sm:$0xff] }
 0x4fd   :  { %v6376_v19 = vpop.eup %6375  ;;  %v1521_v20 = vmul.f32 1.442695, %v1518_v18  ;;  %v1421_v18 = vld [vmem:[%s7936_s6 + $0x8] sm:$0xff] }
 0x4fe   :  { %v1876_v23 = vmul.f32 %v6376_v19, %v6368_v54  ;;  %v5924_v19 = vpack.c.bf16 %v1421_v18, %v1420_v16  ;;  %v1966_v16 = vld [vmem:[%s7936_s6 + $0x140] sm:$0xff] }
 0x4ff   :  { %6381 = vpow2.f32 %v1521_v20 }
 0x500   :  { %5452 = vmatmul.mubr.msk.f32.vlgmr.msra.gmra.mrb[18].mxu0 %vm1316_vm2, %v1876_v23 }
 0x501   :  { %v6378_v24 = vpop.eup %6377  ;;  %5999 = vmatpush3.bf16.xpose.msra.mxu0 %v6994_v12  ;;  %5493 = vmatprep.mubr.f32.mxu0 %v6975_v31  ;;  %v1525_v12 = vpop.xlane.xlu0 %1524 }
 0x502   :  { %6001 = vmatprep.subr.bf16.mxu0 %v6996_v15  ;;  %v1337_v27 = vmul.f32 %v6378_v24, %v6370_v62  ;;  %6383 = vrcp.f32 %v1525_v12  ;;  %v1422_v12 = vld [vmem:[%s7936_s6 + $0x10] sm:$0xff] }
 0x504   :  { %5353 = vmatprep.mubr.msk.f32.mxu1 %vm1316_vm2, %v1337_v27 }
 0x505   :  { %v6380_v29 = vpop.eup %6379 }
 0x506   :  { %v1332_v30 = vsel %vm1316_vm2, %v6380_v29, 0.0 }
 0x507   :  { %1333 = vadd.xlane.f32.xlu1 %v1332_v30 }
 0x508   :  { %5494 = vmatmul.mubr.f32.vlgmr.msra.gmra.mrb[20].mxu0 %v6979_v41  ;;  %v1615_v41 = vld [vmem:[%s7936_s6 + $0x88] sm:$0xff] }
 0x509   :  { %v6382_v32 = vpop.eup %6381  ;;  %6003 = vmatpush3.bf16.msra.mxu0 %v6996_v15  ;;  %v5892_v38 = vpack.c.bf16 %v1615_v41, %v1614_v35 }
 0x50a   :  { %v1526_v33 = vsel %vm1316_vm2, %v6382_v32, 0.0 }
 0x50b   :  { %1527 = vadd.xlane.f32.xlu1 %v1526_v33 }
 0x50c   :  { %v6384_v36 = vpop.eup %6383 }
 0x50d   :  { %v1531_v39 = vmul.f32 %v6384_v36, %v6372_v3 }
 0x594   :  { %v1334_v31 = vpop.xlane.xlu1 %1333 }
 0x595   :  { %6385 = vrcp.f32 %v1334_v31  ;;  %v1423_v31 = vld [vmem:[%s7936_s6 + $0x18] sm:$0xff] }
 0x596   :  { %v5928_v36 = vpack.c.bf16 %v1423_v31, %v1422_v12  ;;  %v2229_v12 = vld [vmem:[%s7936_s6 + $0x180] sm:$0xff]  ;;  %v2230_v31 = vld [vmem:[%s7936_s6 + $0x188] sm:$0xff] }
 0x598   :  { %v1528_v34 = vpop.xlane.xlu1 %1527 }
 0x599   :  { %6387 = vrcp.f32 %v1528_v34 }
 0x59f   :  { %v6386_v37 = vpop.eup %6385 }
 0x5a0   :  { %v1338_v15 = vmul.f32 %v6386_v37, %v6380_v29  ;;  %v1424_v37 = vld [vmem:[%s7936_s6 + $0x20] sm:$0xff] }
 0x5a2   :  { %5354 = vmatmul.mubr.msk.f32.vlgmr.msra.gmra.mrb[26].mxu1 %vm1316_vm2, %v1338_v15  ;;  %v1425_v15 = vld [vmem:[%s7936_s6 + $0x28] sm:$0xff] }
 0x5a3   :  { %v6388_v44 = vpop.eup %6387  ;;  %5891 = vmatpush3.bf16.msra.mxu1 %v6966_v22  ;;  %5367 = vmatprep.mubr.msk.f32.mxu1 %vm1316_vm2, %v1531_v39  ;;  %v1620_v22 = vld [vmem:[%s7936_s6 + $0xb0] sm:$0xff]  ;;  %v5932_v43 = vpack.c.bf16 %v1425_v15, %v1424_v37  ;;  %v2233_v15 = vld [vmem:[%s7936_s6 + $0x1a0] sm:$0xff] }
 0x5a4   :  { %v1532_v45 = vmul.f32 %v6388_v44, %v6382_v32  ;;  %5893 = vmatprep.subr.bf16.mxu1 %v5892_v38  ;;  %v5904_v53 = vpack.c.bf16 %v1621_v51, %v1620_v22  ;;  %v1426_v44 = vld [vmem:[%s7936_s6 + $0x30] sm:$0xff]  ;;  %v1431_v51 = vld [vmem:[%s7936_s6 + $0x58] sm:$0xff] }
 0x5a5   :  { %v1430_v22 = vld [vmem:[%s7936_s6 + $0x50] sm:$0xff] }
 0x5a6   :  { %5368 = vmatmul.mubr.msk.f32.vlgmr.msra.gmra.mrb[28].mxu1 %vm1316_vm2, %v1532_v45  ;;  %v1427_v45 = vld [vmem:[%s7936_s6 + $0x38] sm:$0xff] }
 0x5a7   :  { %5895 = vmatpush3.bf16.msra.mxu1 %v5892_v38 }
 0x5a8   :  { %5897 = vmatprep.subr.bf16.mxu1 %v5896_v46 }
 0x5ab   :  { %5899 = vmatpush3.bf16.msra.mxu1 %v5896_v46  ;;  %v5936_v46 = vpack.c.bf16 %v1427_v45, %v1426_v44  ;;  %v2236_v44 = vld [vmem:[%s7936_s6 + $0x1b8] sm:$0xff] }
 0x5ac   :  { %5901 = vmatprep.subr.bf16.mxu1 %v5900_v50 }
 0x5af   :  { %5903 = vmatpush3.bf16.msra.mxu1 %v5900_v50  ;;  %v5940_v50 = vpack.c.bf16 %v1429_v49, %v1428_v47  ;;  %v2239_v49 = vld [vmem:[%s7936_s6 + $0x1d0] sm:$0xff] }
 0x5b0   :  { %5905 = vmatprep.subr.bf16.mxu1 %v5904_v53 }
 0x5b3   :  { %5907 = vmatpush3.bf16.msra.mxu1 %v5904_v53  ;;  %v5944_v53 = vpack.c.bf16 %v1431_v51, %v1430_v22  ;;  %v2241_v51 = vld [vmem:[%s7936_s6 + $0x1e0] sm:$0xff] }
 0x5b4   :  { %5909 = vmatprep.subr.bf16.mxu1 %v5908_v7 }
 0x5b7   :  { %5911 = vmatpush3.bf16.msra.mxu1 %v5908_v7  ;;  %v5964_v7 = vpack.c.bf16 %v1959_v5, %v1958_v4 }
 0x5d3   :  { %v7063_v54 = vpop.f32.mrb[18].mxu0 }
 0x5d4   :  { %v7065_v57 = vpop.f32.mrb[19].mxu0 }
 0x5db   :  { %v5495_v61 = vpop.f32.mrb[20].mxu0 }
 0x5dc   :  { %v2123_v62 = vadd.f32 %v5495_v61, %v7008_v26  ;;  %v2117_v63 = vpop.f32.mrb[21].mxu0  ;;  %v1625_v26 = vld [vmem:[%s7936_s6 + $0xd8] sm:$0xff]  ;;  %v1432_v61 = vld [vmem:[%s7936_s6 + $0x60] sm:$0xff] }
 0x5dd   :  { %v2118_v0 = vadd.f32 %v2117_v63, %v7002_v21  ;;  %v1624_v21 = vld [vmem:[%s7936_s6 + $0xd0] sm:$0xff] }
 0x5de   :  { %v2129_v2 = vsel %vm1316_vm2, %v2123_v62, -inf  ;;  %v5912_v55 = vpack.c.bf16 %v1625_v26, %v1624_v21  ;;  %v1960_v21 = vld [vmem:[%s7936_s6 + $0x110] sm:$0xff]  ;;  %v1961_v26 = vld [vmem:[%s7936_s6 + $0x118] sm:$0xff] }
 0x5df   :  { %2130 = vmax.xlane.f32.xlu1 %v2129_v2  ;;  %v2126_v3 = vsel %vm1316_vm2, %v2118_v0, -inf  ;;  %v1435_v2 = vld [vmem:[%s7936_s6 + $0x78] sm:$0xff] }
 0x5e0   :  { %2127 = vmax.xlane.f32.xlu0 %v2126_v3  ;;  %5913 = vmatprep.subr.bf16.mxu1 %v5912_v55 }
 0x5e1   :  { %5915 = vmatpush3.bf16.msra.mxu1 %v5912_v55  ;;  %v5968_v55 = vpack.c.bf16 %v1961_v26, %v1960_v21 }
 0x5e2   :  { %5917 = vmatprep.subr.bf16.mxu1 %v5916_v10 }
 0x5e5   :  { %5919 = vmatpush3.bf16.msra.mxu1 %v5916_v10  ;;  %v5972_v10 = vpack.c.bf16 %v1963_v9, %v1962_v8  ;;  %v4818_v8 = vld [vmem:[%s7938_s8 + $0x40] ss:$0 sm:$0xff] }
 0x5e6   :  { %5921 = vmatprep.subr.bf16.mxu1 %v5920_v6 }
 0x5e9   :  { %5923 = vmatpush3.bf16.msra.mxu1 %v5920_v6  ;;  %v5976_v6 = vpack.c.bf16 %v1965_v14, %v1964_v11 }
 0x5ea   :  { %5925 = vmatprep.subr.bf16.mxu1 %v5924_v19 }
 0x66c   :  { %v2131_v20 = vpop.xlane.xlu1 %2130 }
 0x66d   :  { %v2133_v23 = vsub.f32 %v2123_v62, %v2131_v20  ;;  %v2128_v24 = vpop.xlane.xlu0 %2127  ;;  %v1433_v62 = vld [vmem:[%s7936_s6 + $0x68] sm:$0xff]  ;;  %v1969_v20 = vld [vmem:[%s7936_s6 + $0x158] sm:$0xff] }
 0x66e   :  { %v2132_v27 = vsub.f32 %v2118_v0, %v2128_v24  ;;  %v5948_v63 = vpack.c.bf16 %v1433_v62, %v1432_v61  ;;  %v1434_v0 = vld [vmem:[%s7936_s6 + $0x70] sm:$0xff]  ;;  %v1970_v24 = vld [vmem:[%s7936_s6 + $0x160] sm:$0xff] }
 0x66f   :  { %v2136_v29 = vmul.f32 1.442695, %v2133_v23  ;;  %v5952_v3 = vpack.c.bf16 %v1435_v2, %v1434_v0  ;;  %v2243_v62 = vld [vmem:[%s7936_s6 + $0x1f0] sm:$0xff] }
 0x670   :  { %v2134_v30 = vmul.f32 1.442695, %v2132_v27  ;;  %v1971_v27 = vld [vmem:[%s7936_s6 + $0x168] sm:$0xff] }
 0x671   :  { %6389 = vpow2.f32 %v2136_v29  ;;  %v5988_v29 = vpack.c.bf16 %v1971_v27, %v1970_v24 }
 0x672   :  { %6391 = vpow2.f32 %v2134_v30  ;;  %v1972_v30 = vld [vmem:[%s7936_s6 + $0x170] sm:$0xff] }
 0x675   :  { %v5355_v32 = vpop.f32.mrb[26].mxu1 }
 0x676   :  { %v1411_v33 = vpop.f32.mrb[27].mxu1 }
 0x679   :  { %v5369_v34 = vpop.f32.mrb[28].mxu1 }
 0x67a   :  { %v1605_v35 = vpop.f32.mrb[29].mxu1 }
 0x67b   :  { %v7107_v41 = vpop.eup %6389  ;;  %5402 = vmatprep.mubr.f32.mxu1 %v1605_v35  ;;  %v2231_v35 = vld [vmem:[%s7936_s6 + $0x190] sm:$0xff] }
 0x67c   :  { %v7115_v38 = vpop.eup %6391  ;;  %v2141_v39 = vsel %vm1316_vm2, %v7107_v41, 0.0  ;;  %5403 = vmatmul.mubr.f32.vlgmr.msra.gmra.mrb[30].mxu1 %v5369_v34  ;;  %v6004_v34 = vpack.c.bf16 %v2230_v31, %v2229_v12  ;;  %v2374_v12 = vld [vmem:[%s7937_s7 + $0x10] sm:$0xff]  ;;  %v2375_v31 = vld [vmem:[%s7937_s7 + $0x18] sm:$0xff] }
 0x67d   :  { %2142 = vadd.xlane.f32.xlu1 %v2141_v39  ;;  %5927 = vmatpush3.bf16.msra.mxu1 %v5924_v19  ;;  %v2138_v40 = vsel %vm1316_vm2, %v7115_v38, 0.0  ;;  %v1968_v19 = vld [vmem:[%s7936_s6 + $0x150] sm:$0xff]  ;;  %v2234_v39 = vld [vmem:[%s7936_s6 + $0x1a8] sm:$0xff] }
 0x67e   :  { %5437 = vmatprep.mubr.f32.mxu1 %v1411_v33  ;;  %2139 = vadd.xlane.f32.xlu0 %v2138_v40  ;;  %v5984_v23 = vpack.c.bf16 %v1969_v20, %v1968_v19  ;;  %v6012_v40 = vpack.c.bf16 %v2234_v39, %v2233_v15 }
 0x67f   :  { %5929 = vmatprep.subr.bf16.mxu1 %v5928_v36 }
 0x681   :  { %5931 = vmatpush3.bf16.msra.mxu1 %v5928_v36  ;;  %v2232_v36 = vld [vmem:[%s7936_s6 + $0x198] sm:$0xff] }
 0x682   :  { %5933 = vmatprep.subr.bf16.mxu1 %v5932_v43  ;;  %v6008_v37 = vpack.c.bf16 %v2232_v36, %v2231_v35  ;;  %v2464_v35 = vld [vmem:[%s7938_s8] sm:$0xff]  ;;  %v2465_v36 = vld [vmem:[%s7938_s8 + $0x8] sm:$0xff] }
 0x685   :  { %5935 = vmatpush3.bf16.msra.mxu1 %v5932_v43  ;;  %v2235_v43 = vld [vmem:[%s7936_s6 + $0x1b0] sm:$0xff] }
 0x686   :  { %5937 = vmatprep.subr.bf16.mxu1 %v5936_v46  ;;  %v6016_v45 = vpack.c.bf16 %v2236_v44, %v2235_v43 }
 0x689   :  { %5939 = vmatpush3.bf16.msra.mxu1 %v5936_v46  ;;  %v2237_v46 = vld [vmem:[%s7936_s6 + $0x1c0] sm:$0xff] }
 0x68a   :  { %5941 = vmatprep.subr.bf16.mxu1 %v5940_v50 }
 0x68d   :  { %5943 = vmatpush3.bf16.msra.mxu1 %v5940_v50  ;;  %v2240_v50 = vld [vmem:[%s7936_s6 + $0x1d8] sm:$0xff] }
 0x68e   :  { %5945 = vmatprep.subr.bf16.mxu1 %v5944_v53  ;;  %v6024_v22 = vpack.c.bf16 %v2240_v50, %v2239_v49 }
 0x691   :  { %5947 = vmatpush3.bf16.msra.mxu1 %v5944_v53  ;;  %v2242_v53 = vld [vmem:[%s7936_s6 + $0x1e8] sm:$0xff] }
 0x692   :  { %5949 = vmatprep.subr.bf16.mxu1 %v5948_v63  ;;  %v6028_v61 = vpack.c.bf16 %v2242_v53, %v2241_v51  ;;  %v4820_v51 = vld [vmem:[%s7938_s8 + $0x43] ss:$0 sm:$0xff] }
 0x695   :  { %5951 = vmatpush3.bf16.msra.mxu1 %v5948_v63  ;;  %v2244_v63 = vld [vmem:[%s7936_s6 + $0x1f8] sm:$0xff] }
 0x696   :  { %5953 = vmatprep.subr.bf16.mxu1 %v5952_v3  ;;  %v6032_v0 = vpack.c.bf16 %v2244_v63, %v2243_v62  ;;  %v2467_v62 = vld [vmem:[%s7938_s8 + $0x18] sm:$0xff] }
 0x699   :  { %5955 = vmatpush3.bf16.msra.mxu1 %v5952_v3 }
 0x69a   :  { %5965 = vmatprep.subr.bf16.mxu1 %v5964_v7 }
 0x69c   :  { %5438 = vmatmul.mubr.f32.vlgmr.msra.gmra.mrb[30].mxu1 %v5355_v32  ;;  %v1973_v32 = vld [vmem:[%s7936_s6 + $0x178] sm:$0xff] }
 0x69d   :  { %5967 = vmatpush3.bf16.msra.mxu1 %v5964_v7  ;;  %5486 = vmatprep.mubr.f32.mxu1 %v7065_v57  ;;  %v1967_v57 = vld [vmem:[%s7936_s6 + $0x148] sm:$0xff]  ;;  %v5992_v33 = vpack.c.bf16 %v1973_v32, %v1972_v30 }
 0x69e   :  { %5969 = vmatprep.subr.bf16.mxu1 %v5968_v55  ;;  %v5980_v18 = vpack.c.bf16 %v1967_v57, %v1966_v16  ;;  %v2373_v32 = vld [vmem:[%s7937_s7 + $0x8] sm:$0xff] }
 0x6a1   :  { %5971 = vmatpush3.bf16.msra.mxu1 %v5968_v55 }
 0x6a2   :  { %5973 = vmatprep.subr.bf16.mxu1 %v5972_v10 }
 0x6a5   :  { %5975 = vmatpush3.bf16.msra.mxu1 %v5972_v10 }
 0x6a6   :  { %5977 = vmatprep.subr.bf16.mxu1 %v5976_v6 }
 0x6a9   :  { %5979 = vmatpush3.bf16.msra.mxu1 %v5976_v6 }
 0x6aa   :  { %5981 = vmatprep.subr.bf16.mxu1 %v5980_v18 }
 0x6ad   :  { %5983 = vmatpush3.bf16.msra.mxu1 %v5980_v18 }
 0x6ae   :  { %5985 = vmatprep.subr.bf16.mxu1 %v5984_v23 }
 0x6b1   :  { %5987 = vmatpush3.bf16.msra.mxu1 %v5984_v23 }
 0x6b2   :  { %5989 = vmatprep.subr.bf16.mxu1 %v5988_v29 }
 0x6b5   :  { %5991 = vmatpush3.bf16.msra.mxu1 %v5988_v29 }
 0x6b6   :  { %5993 = vmatprep.subr.bf16.mxu1 %v5992_v33 }
 0x6b9   :  { %5995 = vmatpush3.bf16.msra.mxu1 %v5992_v33 }
 0x6ba   :  { %6005 = vmatprep.subr.bf16.mxu1 %v6004_v34 }
 0x6bc   :  { %5487 = vmatmul.mubr.f32.vlgmr.msra.gmra.mrb[30].mxu1 %v7063_v54  ;;  %v2238_v54 = vld [vmem:[%s7936_s6 + $0x1c8] sm:$0xff] }
 0x6bd   :  { %6007 = vmatpush3.bf16.msra.mxu1 %v6004_v34  ;;  %v6020_v47 = vpack.c.bf16 %v2238_v54, %v2237_v46  ;;  %v6040_v34 = vpack.c.bf16 %v2375_v31, %v2374_v12  ;;  %v4819_v54 = vld [vmem:[%s7938_s8 + $0x42] ss:$0 sm:$0xff] }
 0x6be   :  { %6009 = vmatprep.subr.bf16.mxu1 %v6008_v37 }
 0x6c1   :  { %6011 = vmatpush3.bf16.msra.mxu1 %v6008_v37  ;;  %v6044_v37 = vpack.c.bf16 %v2465_v36, %v2464_v35  ;;  %v4830_v35 = vld [vmem:[%s7935_s5 + $0x1e8] sm:$0xff] }
 0x6c2   :  { %6013 = vmatprep.subr.bf16.mxu1 %v6012_v40  ;;  %v4842_v36 = vld [vmem:[%s7935_s5 + $0x248] sm:$0xff] }
 0x6c5   :  { %6015 = vmatpush3.bf16.msra.mxu1 %v6012_v40 }
 0x6c6   :  { %6017 = vmatprep.subr.bf16.mxu1 %v6016_v45 }
 0x6c9   :  { %6019 = vmatpush3.bf16.msra.mxu1 %v6016_v45 }
 0x6ca   :  { %6021 = vmatprep.subr.bf16.mxu1 %v6020_v47 }
 0x6cd   :  { %6023 = vmatpush3.bf16.msra.mxu1 %v6020_v47 }
 0x6ce   :  { %6025 = vmatprep.subr.bf16.mxu1 %v6024_v22 }
 0x6d1   :  { %6027 = vmatpush3.bf16.msra.mxu1 %v6024_v22 }
 0x6d2   :  { %6029 = vmatprep.subr.bf16.mxu1 %v6028_v61 }
 0x6d5   :  { %6031 = vmatpush3.bf16.msra.mxu1 %v6028_v61  ;;  %v2466_v61 = vld [vmem:[%s7938_s8 + $0x10] sm:$0xff] }
 0x6d6   :  { %6033 = vmatprep.subr.bf16.mxu1 %v6032_v0 }
 0x6d9   :  { %6035 = vmatpush3.bf16.msra.mxu1 %v6032_v0 }
 0x70a   :  { %v2143_v2 = vpop.xlane.xlu1 %2142 }
 0x70b   :  { %6393 = vrcp.f32 %v2143_v2  ;;  %v2140_v3 = vpop.xlane.xlu0 %2139  ;;  %v6048_v2 = vpack.c.bf16 %v2467_v62, %v2466_v61 }
 0x70c   :  { %6395 = vrcp.f32 %v2140_v3  ;;  %v2468_v3 = vld [vmem:[%s7938_s8 + $0x20] sm:$0xff] }
 0x715   :  { %v6394_v4 = vpop.eup %6393 }
 0x716   :  { %v6396_v5 = vpop.eup %6395  ;;  %v2147_v21 = vmul.f32 %v6394_v4, %v7107_v41  ;;  %v2469_v4 = vld [vmem:[%s7938_s8 + $0x28] sm:$0xff] }
 0x717   :  { %v2146_v7 = vmul.f32 %v6396_v5, %v7115_v38  ;;  %v6052_v5 = vpack.c.bf16 %v2469_v4, %v2468_v3  ;;  %v4827_v4 = vld [vmem:[%s7938_s8 + $0x44] ss:$0 sm:$0xff] }
 0x719   :  { %5500 = vmatprep.mubr.msk.f32.mxu0 %vm1316_vm2, %v2146_v7  ;;  %v2470_v7 = vld [vmem:[%s7938_s8 + $0x30] sm:$0xff] }
 0x71a   :  { %5501 = vmatmul.mubr.msk.f32.vlgmr.msra.gmra.mrb[22].mxu0 %vm1316_vm2, %v2147_v21  ;;  %v2471_v21 = vld [vmem:[%s7938_s8 + $0x38] sm:$0xff] }
 0x7ed   :  { %v5502_v26 = vpop.f32.mrb[22].mxu0 }
 0x7ee   :  { %v2220_v55 = vpop.f32.mrb[23].mxu0 }
 0x7ef   :  { %5535 = vmatprep.mubr.f32.mxu1 %v2220_v55  ;;  %v4821_v55 = vld [vmem:[%s7937_s7 + $0x20] ss:$0 sm:$0xff] }
 0x7f0   :  { %5536 = vmatmul.mubr.f32.vlgmr.msra.gmra.mrb[30].mxu1 %v5502_v26  ;;  %v6056_v26 = vpack.c.bf16 %v2471_v21, %v2470_v7  ;;  %v4831_v21 = vld [vmem:[%s7935_s5 + $0x1f0] sm:$0xff] }
 0x8c3   :  { %v5537_v9 = vpop.f32.mrb[30].mxu1 }
 0x8c4   :  { %v2328_v10 = vadd.f32 %v5537_v9, %v4818_v8  ;;  %v2311_v11 = vpop.f32.mrb[31].mxu1 }
 0x8c5   :  { %v2327_v14 = vadd.f32 %v4818_v8, %v2311_v11 }
 0x8c6   :  { %v2330_v38 = vadd.f32 %v2328_v10, %v6854_v28 }
 0x8c7   :  { %v2329_v41 = vadd.f32 %v2327_v14, %v6830_v17  ;;  %v2372_v17 = vld [vmem:[%s7937_s7] sm:$0xff] }
 0x8c8   :  { %v2334_v6 = vsel %vm772_vm1, %v2330_v38, 0.0  ;;  %v6036_v33 = vpack.c.bf16 %v2373_v32, %v2372_v17 }
 0x8c9   :  { %2335 = vadd.xlane.f32.xlu1 %v2334_v6  ;;  %v2331_v16 = vsel %vm772_vm1, %v2329_v41, 0.0 }
 0x8ca   :  { %2332 = vadd.xlane.f32.xlu0 %v2331_v16  ;;  %6037 = vmatprep.subr.bf16.mxu0 %v6036_v33 }
 0x8cb   :  { %6039 = vmatpush3.bf16.msra.mxu0 %v6036_v33 }
 0x8cc   :  { %6041 = vmatprep.subr.bf16.mxu0 %v6040_v34 }
 0x8cf   :  { %6043 = vmatpush3.bf16.msra.mxu0 %v6040_v34 }
 0x8d0   :  { %6045 = vmatprep.subr.bf16.mxu0 %v6044_v37 }
 0x956   :  { %v2336_v57 = vpop.xlane.xlu1 %2335 }
 0x957   :  { %v2339_v18 = vmul.f32 0.03125, %v2336_v57  ;;  %v2333_v19 = vpop.xlane.xlu0 %2332 }
 0x958   :  { %v2338_v20 = vmul.f32 0.03125, %v2333_v19 }
 0x959   :  { %v2341_v23 = vsub.f32 %v2330_v38, %v2339_v18 }
 0x95a   :  { %v2340_v24 = vsub.f32 %v2329_v41, %v2338_v20  ;;  %v4824_v41 = vld [vmem:[%s7938_s8 + $0x41] ss:$0 sm:$0xff] }
 0x95b   :  { %v2343_v27 = vmul.f32 %v2341_v23, %v2341_v23 }
 0x95c   :  { %v2342_v29 = vmul.f32 %v2340_v24, %v2340_v24 }
 0x95d   :  { %v2347_v30 = vsel %vm772_vm1, %v2343_v27, 0.0 }
 0x95e   :  { %2348 = vadd.xlane.f32.xlu1 %v2347_v30  ;;  %v2344_v28 = vsel %vm772_vm1, %v2342_v29, 0.0 }
 0x95f   :  { %2345 = vadd.xlane.f32.xlu0 %v2344_v28 }
 0x9eb   :  { %v2349_v15 = vpop.xlane.xlu1 %2348 }
 0x9ec   :  { %v2351_v39 = vmul.f32 0.03125, %v2349_v15  ;;  %v2346_v40 = vpop.xlane.xlu0 %2345  ;;  %v4829_v15 = vld [vmem:[%s7935_s5 + $0x1e0] sm:$0xff] }
 0x9ed   :  { %v2350_v43 = vmul.f32 0.03125, %v2346_v40 }
 0x9ee   :  { %v2353_v44 = vadd.f32 1e-05, %v2351_v39  ;;  %v4841_v39 = vld [vmem:[%s7935_s5 + $0x240] sm:$0xff] }
 0x9ef   :  { %v2352_v45 = vadd.f32 1e-05, %v2350_v43  ;;  %v6062_v40 = vpack.c.bf16 %v4841_v39, %v4829_v15  ;;  %v4854_v43 = vld [vmem:[%s7935_s5 + $0x2a8] sm:$0xff]  ;;  %v4860_v15 = vld [vmem:[%s7935_s5 + $0x2d8] sm:$0xff] }
 0x9f0   :  { %6397 = vrsqrt.f32 %v2353_v44  ;;  %v4866_v44 = vld [vmem:[%s7935_s5 + $0x308] sm:$0xff]  ;;  %v4872_v39 = vld [vmem:[%s7935_s5 + $0x338] sm:$0xff] }
 0x9f1   :  { %6399 = vrsqrt.f32 %v2352_v45  ;;  %v6064_v45 = vpack.c.bf16 %v4866_v44, %v4854_v43  ;;  %v6088_v43 = vpack.c.bf16 %v4872_v39, %v4860_v15  ;;  %v4859_v44 = vld [vmem:[%s7935_s5 + $0x2d0] sm:$0xff] }
 0x9fa   :  { %v6398_v46 = vpop.eup %6397 }
 0x9fb   :  { %v6400_v47 = vpop.eup %6399  ;;  %v2357_v49 = vmul.f32 %v6398_v46, %v2341_v23  ;;  %v4853_v46 = vld [vmem:[%s7935_s5 + $0x2a0] sm:$0xff] }
 0x9fc   :  { %v2356_v50 = vmul.f32 %v6400_v47, %v2340_v24 }
 0x9fd   :  { %v2364_v22 = vmul.f32 %v4819_v54, %v2357_v49  ;;  %v4832_v49 = vld [vmem:[%s7935_s5 + $0x1f8] sm:$0xff] }
 0x9fe   :  { %v2363_v53 = vmul.f32 %v4819_v54, %v2356_v50  ;;  %v4865_v54 = vld [vmem:[%s7935_s5 + $0x300] sm:$0xff]  ;;  %v4844_v50 = vld [vmem:[%s7935_s5 + $0x258] sm:$0xff] }
 0x9ff   :  { %v2371_v0 = vadd.f32 %v4820_v51, %v2364_v22  ;;  %v6066_v47 = vpack.c.bf16 %v4865_v54, %v4853_v46  ;;  %v6068_v22 = vpack.c.bf16 %v4844_v50, %v4832_v49  ;;  %v4838_v46 = vld [vmem:[%s7935_s5 + $0x228] sm:$0xff]  ;;  %v4837_v50 = vld [vmem:[%s7935_s5 + $0x220] sm:$0xff] }
 0xa00   :  { %v2370_v63 = vadd.f32 %v4820_v51, %v2363_v53  ;;  %v4850_v54 = vld [vmem:[%s7935_s5 + $0x288] sm:$0xff] }
 0xa01   :  { %v6092_v49 = vpack.c.bf16 %v4850_v54, %v4838_v46 }
 0xa02   :  { %5546 = vmatprep.mubr.msk.f32.mxu0 %vm772_vm1, %v2370_v63 }
 0xa03   :  { %5547 = vmatmul.mubr.msk.f32.vlgmr.msra.gmra.mrb[24].mxu0 %vm772_vm1, %v2371_v0 }
 0xa04   :  { %6047 = vmatpush3.bf16.msra.mxu0 %v6044_v37  ;;  %v6060_v37 = vpack.c.bf16 %v4842_v36, %v4830_v35  ;;  %v4835_v36 = vld [vmem:[%s7935_s5 + $0x210] sm:$0xff] }
 0xa05   :  { %6049 = vmatprep.subr.bf16.mxu0 %v6048_v2 }
 0xa08   :  { %6051 = vmatpush3.bf16.msra.mxu0 %v6048_v2 }
 0xa09   :  { %6053 = vmatprep.subr.bf16.mxu0 %v6052_v5 }
 0xa0c   :  { %6055 = vmatpush3.bf16.msra.mxu0 %v6052_v5 }
 0xa0d   :  { %6057 = vmatprep.subr.bf16.mxu0 %v6056_v26 }
 0xa10   :  { %6059 = vmatpush3.bf16.msra.mxu0 %v6056_v26  ;;  %v4843_v26 = vld [vmem:[%s7935_s5 + $0x250] sm:$0xff] }
 0xa11   :  { %6061 = vmatprep.subr.bf16.mxu0 %v6060_v37  ;;  %v4847_v37 = vld [vmem:[%s7935_s5 + $0x270] sm:$0xff] }
 0xad6   :  { %v5548_v8 = vpop.f32.mrb[24].mxu0 }
 0xad7   :  { %v2459_v9 = vadd.f32 %v5548_v8, %v4821_v55  ;;  %v2453_v10 = vpop.f32.mrb[25].mxu0  ;;  %v4856_v8 = vld [vmem:[%s7935_s5 + $0x2b8] sm:$0xff] }
 0xad8   :  { %v2454_v11 = vadd.f32 %v4821_v55, %v2453_v10  ;;  %v4828_v55 = vld [vmem:[%s7938_s8 + $0x45] ss:$0 sm:$0xff] }
 0xad9   :  { %v2463_v38 = vmax.f32 %v2459_v9, 0.0  ;;  %v4868_v9 = vld [vmem:[%s7935_s5 + $0x318] sm:$0xff] }
 0xada   :  { %v2462_v14 = vmax.f32 %v2454_v11, 0.0  ;;  %v6070_v11 = vpack.c.bf16 %v4843_v26, %v4831_v21  ;;  %v4851_v21 = vld [vmem:[%s7935_s5 + $0x290] sm:$0xff]  ;;  %v4864_v26 = vld [vmem:[%s7935_s5 + $0x2f8] sm:$0xff] }
 0xadc   :  { %5565 = vmatprep.mubr.msk.f32.mxu0 %vm572_vm0, %v2462_v14 }
 0xadd   :  { %5566 = vmatmul.mubr.msk.f32.vlgmr.msra.gmra.mrb[26].mxu0 %vm572_vm0, %v2463_v38 }
 0xade   :  { %2787 = vmatprep.mubr.f32.mxu0 %v6473_v1  ;;  %6063 = vmatpush1.bf16.msra.mxu0 %v6062_v40  ;;  %v6086_v40 = vpack.c.bf16 %v4847_v37, %v4835_v36 }
 0xadf   :  { %6065 = vmatprep.subr.bf16.mxu0 %v6064_v45  ;;  %v4871_v45 = vld [vmem:[%s7935_s5 + $0x330] sm:$0xff] }
 0xae2   :  { %6067 = vmatpush1.bf16.msra.mxu0 %v6066_v47  ;;  %v6090_v47 = vpack.c.bf16 %v4871_v45, %v4859_v44 }
 0xae3   :  { %6069 = vmatprep.subr.bf16.mxu0 %v6068_v22  ;;  %v4849_v22 = vld [vmem:[%s7935_s5 + $0x280] sm:$0xff] }
 0xbb0   :  { %v5567_v6 = vpop.f32.mrb[26].mxu0 }
 0xbb1   :  { %v2555_v16 = vadd.f32 %v5567_v6, %v4824_v41  ;;  %v2549_v57 = vpop.f32.mrb[27].mxu0  ;;  %v4855_v6 = vld [vmem:[%s7935_s5 + $0x2b0] sm:$0xff] }
 0xbb2   :  { %v2550_v18 = vadd.f32 %v4824_v41, %v2549_v57  ;;  %v6072_v41 = vpack.c.bf16 %v4868_v9, %v4856_v8  ;;  %v4834_v57 = vld [vmem:[%s7935_s5 + $0x208] sm:$0xff] }
 0xbb3   :  { %v2559_v19 = vadd.f32 %v2555_v16, %v2371_v0  ;;  %v4867_v16 = vld [vmem:[%s7935_s5 + $0x310] sm:$0xff] }
 0xbb4   :  { %v2558_v20 = vadd.f32 %v2550_v18, %v2370_v63  ;;  %v4846_v18 = vld [vmem:[%s7935_s5 + $0x268] sm:$0xff] }
 0xbb5   :  { %v2563_v23 = vsel %vm772_vm1, %v2559_v19, 0.0 }
 0xbb6   :  { %2564 = vadd.xlane.f32.xlu1 %v2563_v23  ;;  %v2560_v24 = vsel %vm772_vm1, %v2558_v20, 0.0  ;;  %v6076_v23 = vpack.c.bf16 %v4846_v18, %v4834_v57 }
 0xbb7   :  { %2561 = vadd.xlane.f32.xlu0 %v2560_v24  ;;  %v4833_v24 = vld [vmem:[%s7935_s5 + $0x200] sm:$0xff] }
 0xc43   :  { %v2565_v27 = vpop.xlane.xlu1 %2564 }
 0xc44   :  { %v2567_v29 = vmul.f32 0.03125, %v2565_v27  ;;  %v2562_v30 = vpop.xlane.xlu0 %2561  ;;  %v4845_v27 = vld [vmem:[%s7935_s5 + $0x260] sm:$0xff] }
 0xc45   :  { %v2566_v28 = vmul.f32 0.03125, %v2562_v30  ;;  %v4870_v30 = vld [vmem:[%s7935_s5 + $0x328] sm:$0xff] }
 0xc46   :  { %v2569_v17 = vsub.f32 %v2559_v19, %v2567_v29  ;;  %v6074_v19 = vpack.c.bf16 %v4867_v16, %v4855_v6  ;;  %v4858_v29 = vld [vmem:[%s7935_s5 + $0x2c8] sm:$0xff] }
 0xc47   :  { %v2568_v32 = vsub.f32 %v2558_v20, %v2566_v28  ;;  %v6078_v28 = vpack.c.bf16 %v4845_v27, %v4833_v24  ;;  %v4878_v6 = vld [vmem:[%s7935_s5 + $0x360] ss:$8 sm:$0xf0] }
 0xc48   :  { %v2571_v33 = vmul.f32 %v2569_v17, %v2569_v17 }
 0xc49   :  { %v2570_v12 = vmul.f32 %v2568_v32, %v2568_v32 }
 0xc4a   :  { %v2575_v31 = vsel %vm772_vm1, %v2571_v33, 0.0  ;;  %v4869_v33 = vld [vmem:[%s7935_s5 + $0x320] sm:$0xff] }
 0xc4b   :  { %2576 = vadd.xlane.f32.xlu1 %v2575_v31  ;;  %v2572_v34 = vsel %vm772_vm1, %v2570_v12, 0.0  ;;  %v4836_v12 = vld [vmem:[%s7935_s5 + $0x218] sm:$0xff] }
 0xc4c   :  { %2573 = vadd.xlane.f32.xlu0 %v2572_v34  ;;  %v4848_v31 = vld [vmem:[%s7935_s5 + $0x278] sm:$0xff] }
 0xc4d   :  { %v6084_v35 = vpack.c.bf16 %v4848_v31, %v4836_v12 }
 0xcd8   :  { %v2577_v51 = vpop.xlane.xlu1 %2576 }
 0xcd9   :  { %v2579_v53 = vmul.f32 0.03125, %v2577_v51  ;;  %v2574_v61 = vpop.xlane.xlu0 %2573  ;;  %v4862_v51 = vld [vmem:[%s7935_s5 + $0x2e8] sm:$0xff] }
 0xcda   :  { %v2578_v62 = vmul.f32 0.03125, %v2574_v61  ;;  %v6094_v61 = vpack.c.bf16 %v4849_v22, %v4837_v50 }
 0xcdb   :  { %v2581_v63 = vadd.f32 1e-05, %v2579_v53  ;;  %v4874_v53 = vld [vmem:[%s7935_s5 + $0x348] sm:$0xff] }
 0xcdc   :  { %v2580_v0 = vadd.f32 1e-05, %v2578_v62  ;;  %v6096_v62 = vpack.c.bf16 %v4874_v53, %v4862_v51 }
 0xcdd   :  { %6401 = vrsqrt.f32 %v2581_v63  ;;  %v4861_v63 = vld [vmem:[%s7935_s5 + $0x2e0] sm:$0xff] }
 0xcde   :  { %6403 = vrsqrt.f32 %v2580_v0  ;;  %v4873_v0 = vld [vmem:[%s7935_s5 + $0x340] sm:$0xff] }
 0xce7   :  { %v6402_v2 = vpop.eup %6401 }
 0xce8   :  { %v6404_v3 = vpop.eup %6403  ;;  %v2585_v5 = vmul.f32 %v6402_v2, %v2569_v17  ;;  %v6080_v17 = vpack.c.bf16 %v4870_v30, %v4858_v29  ;;  %v4840_v2 = vld [vmem:[%s7935_s5 + $0x238] sm:$0xff] }
 0xce9   :  { %v2584_v7 = vmul.f32 %v6404_v3, %v2568_v32  ;;  %v4857_v32 = vld [vmem:[%s7935_s5 + $0x2c0] sm:$0xff]  ;;  %v4852_v3 = vld [vmem:[%s7935_s5 + $0x298] sm:$0xff] }
 0xcea   :  { %v2592_v14 = vmul.f32 %v4827_v4, %v2585_v5  ;;  %v6082_v34 = vpack.c.bf16 %v4869_v33, %v4857_v32  ;;  %v6100_v5 = vpack.c.bf16 %v4852_v3, %v4840_v2 }
 0xceb   :  { %v2591_v10 = vmul.f32 %v4827_v4, %v2584_v7  ;;  %v6098_v4 = vpack.c.bf16 %v4873_v0, %v4861_v63  ;;  %v4839_v7 = vld [vmem:[%s7935_s5 + $0x230] sm:$0xff] }
 0xcec   :  { %v7384_v20 = vadd.f32 %v4828_v55, %v2592_v14  ;;  %v6102_v8 = vpack.c.bf16 %v4851_v21, %v4839_v7 }
 0xced   :  { %v7367_v38 = vadd.f32 %v4828_v55, %v2591_v10  ;;  %v4876_v55 = vld [vmem:[%s7935_s5 + $0x358] sm:$0xff]  ;;  %v4863_v10 = vld [vmem:[%s7935_s5 + $0x2f0] sm:$0xff] }
 0xcee   :  { %v6104_v9 = vpack.c.bf16 %v4876_v55, %v4864_v26 }
 0xcef   :  { %4880 = vmatmul.mubr.msk.f32.vlgmr.msra.gmra.mrb[28].mxu0 %vm772_vm1, %v7367_v38 }
 0xcf0   :  { %6071 = vmatpush1.bf16.msra.mxu0 %v6070_v11  ;;  %2793 = vmatprep.mubr.f32.mxu0 %v6473_v1  ;;  %v4875_v11 = vld [vmem:[%s7935_s5 + $0x350] sm:$0xff] }
 0xcf1   :  { %6073 = vmatprep.subr.bf16.mxu0 %v6072_v41  ;;  %v6106_v14 = vpack.c.bf16 %v4875_v11, %v4863_v10  ;;  %v4877_v41 = vld [vmem:[%s7935_s5 + $0x360] ss:$8 sm:$0xf] }
 0xcf2   :  { %v7514_v16 = vor.u32 %v4878_v6, %v4877_v41 }
 0xcf3   :  { %4881 = vmatmul.mubr.msk.f32.gmra.mrb[30].mxu0 %vm772_vm1, %v7384_v20 }
 0xcf4   :  { %6075 = vmatpush1.bf16.msra.mxu0 %v6074_v19  ;;  %2864 = vmatprep.mubr.f32.mxu0 %v6473_v1  ;;  %v2660_v57 = vrot.slane %v7514_v16, %v6939_v56  ;;  %v2664_v24 = vrot.slane %v7514_v16, %v6945_v59  ;;  %v2668_v33 = vrot.slane %v7514_v16, %v6962_v13 }
 0xcf5   :  { %6077 = vmatprep.subr.bf16.mxu0 %v6076_v23  ;;  %v2680_v44 = vrot.slane %v7514_v16, %v734_v60  ;;  %v2688_v60 = vrot.slane %v7514_v16, %v742_v42 }
 0xcf7   :  { %4882 = vmatmul.mubr.msk.f32.vlgmr.msra.gmra.mrb[32].mxu0 %vm772_vm1, %v7367_v38 }
 0xcf8   :  { %6079 = vmatpush1.bf16.msra.mxu0 %v6078_v28  ;;  %2870 = vmatprep.mubr.f32.mxu0 %v6473_v1 }
 0xcf9   :  { %6081 = vmatprep.subr.bf16.mxu0 %v6080_v17 }
 0xcfb   :  { %4883 = vmatmul.mubr.msk.f32.gmra.mrb[34].mxu0 %vm772_vm1, %v7384_v20 }
 0xcfc   :  { %6083 = vmatpush1.bf16.msra.mxu0 %v6082_v34  ;;  %2941 = vmatprep.mubr.f32.mxu0 %v6473_v1 }
 0xcfd   :  { %6085 = vmatprep.subr.bf16.mxu0 %v6084_v35 }
 0xcff   :  { %4884 = vmatmul.mubr.msk.f32.vlgmr.msra.gmra.mrb[36].mxu0 %vm772_vm1, %v7367_v38 }
 0xd00   :  { %6087 = vmatpush1.bf16.msra.mxu0 %v6086_v40  ;;  %2947 = vmatprep.mubr.f32.mxu0 %v6473_v1  ;;  %v2676_v40 = vrot.slane %v7514_v16, %v730_v58 }
 0xd01   :  { %6089 = vmatprep.subr.bf16.mxu0 %v6088_v43 }
 0xd03   :  { %4885 = vmatmul.mubr.msk.f32.gmra.mrb[38].mxu0 %vm772_vm1, %v7384_v20 }
 0xd04   :  { %6091 = vmatpush1.bf16.msra.mxu0 %v6090_v47  ;;  %3018 = vmatprep.mubr.f32.mxu0 %v6473_v1 }
 0xd05   :  { %6093 = vmatprep.subr.bf16.mxu0 %v6092_v49  ;;  %v2684_v49 = vrot.slane %v7514_v16, %v738_v48  ;;  %v4879_v48 = vld [vmem:[%s7935_s5 + $0x3a0] ss:$8 sm:$0xf] }
 0xd06   :  { %v2692_v21 = vrot.slane %v4879_v48, %v6939_v56  ;;  %v2704_v11 = vrot.slane %v4879_v48, %v6969_v25  ;;  %v2700_v6 = vrot.slane %v4879_v48, %v6962_v13  ;;  %v7562_v13 = vld [vmem:[%s7934_s4 + $0x8] sm:$0xff] }
 0xd07   :  { %4886 = vmatmul.mubr.msk.f32.vlgmr.msra.gmra.mrb[40].mxu0 %vm772_vm1, %v7367_v38 }
 0xd08   :  { %6095 = vmatpush1.bf16.msra.mxu0 %v6094_v61  ;;  %3024 = vmatprep.mubr.f32.mxu0 %v6473_v1 }
 0xd09   :  { %6097 = vmatprep.subr.bf16.mxu0 %v6096_v62 }
 0xd0b   :  { %4887 = vmatmul.mubr.msk.f32.gmra.mrb[42].mxu0 %vm772_vm1, %v7384_v20 }
 0xd0c   :  { %6099 = vmatpush1.bf16.msra.mxu0 %v6098_v4  ;;  %3095 = vmatprep.mubr.f32.mxu0 %v6473_v1  ;;  %v2696_v4 = vrot.slane %v4879_v48, %v6945_v59 }
 0xd0d   :  { %6101 = vmatprep.subr.bf16.mxu0 %v6100_v5 }
 0xd0f   :  { %4888 = vmatmul.mubr.msk.f32.vlgmr.msra.gmra.mrb[44].mxu0 %vm772_vm1, %v7367_v38 }
 0xd10   :  { %6103 = vmatpush1.bf16.msra.mxu0 %v6102_v8  ;;  %3101 = vmatprep.mubr.f32.mxu0 %v6473_v1 }
 0xd11   :  { %6105 = vmatprep.subr.bf16.mxu0 %v6104_v9 }
 0xd13   :  { %4889 = vmatmul.mubr.msk.f32.gmra.mrb[46].mxu0 %vm772_vm1, %v7384_v20 }
 0xd14   :  { %6107 = vmatpush1.bf16.msra.mxu0 %v6106_v14  ;;  %3172 = vmatprep.mubr.f32.mxu0 %v6473_v1 }
 0xd17   :  { %4890 = vmatmul.mubr.msk.f32.vlgmr.msra.gmra.mrb[48].mxu0 %vm772_vm1, %v7367_v38 }
 0xd18   :  { %3178 = vmatprep.mubr.f32.mxu0 %v6473_v1 }
 0xd1b   :  { %4891 = vmatmul.mubr.msk.f32.gmra.mrb[50].mxu0 %vm772_vm1, %v7384_v20 }
 0xdc2   :  { %v2789_v18 = vpop.f32.mrb[28].mxu0 }
 0xdc3   :  { %v2790_v19 = vadd.f32 %v2789_v18, %v2660_v57  ;;  %v2791_v23 = vpop.f32.mrb[29].mxu0 }
 0xdc4   :  { %v2792_v30 = vadd.f32 %v2791_v23, %v2664_v24 }
 0xdc5   :  { %5572 = vmatprep.mubr.f32.mxu0 %v2790_v19 }
 0xdc6   :  { %v2795_v27 = vpop.f32.mrb[30].mxu0 }
 0xdc7   :  { %v2797_v29 = vpop.f32.mrb[31].mxu0  ;;  %v2796_v15 = vadd.f32 %v2795_v27, %v2660_v57 }
 0xdc8   :  { %v2798_v28 = vadd.f32 %v2797_v29, %v2664_v24 }
 0xdca   :  { %v6108_v17 = vpack.c.bf16 %v2798_v28, %v2792_v30  ;;  %v2866_v32 = vpop.f32.mrb[32].mxu0 }
 0xdcb   :  { %v7522_v12 = vpop.f32.mrb[33].mxu0  ;;  %v2867_v34 = vadd.f32 %v2866_v32, %v2668_v33 }
 0xdcc   :  { %6109 = vmatprep.subr.bf16.mxu0 %v6108_v17 }
 0xdcd   :  { %6111 = vmatpush3.bf16.xpose.msra.mxu0 %v6108_v17 }
 0xdce   :  { %v2872_v31 = vpop.f32.mrb[34].mxu0 }
 0xdcf   :  { %v2873_v35 = vadd.f32 %v2872_v31, %v2668_v33  ;;  %v7524_v36 = vpop.f32.mrb[35].mxu0  ;;  %v7568_v33 = vld [vmem:[%s7934_s4] sm:$0xff] }
 0xdd1   :  { %v6112_v37 = vpack.c.bf16 %v2873_v35, %v2867_v34 }
 0xdd2   :  { %v2943_v39 = vpop.f32.mrb[36].mxu0 }
 0xdd3   :  { %v2945_v43 = vpop.f32.mrb[37].mxu0  ;;  %6113 = vmatprep.subr.bf16.mxu0 %v6112_v37  ;;  %v2944_v46 = vadd.f32 %v2943_v39, %v2676_v40 }
 0xdd4   :  { %5573 = vmatmul.mubr.f32.vlgmr.msra.gmra.mrb[52].mxu0 %v2796_v15  ;;  %v2946_v50 = vadd.f32 %v2945_v43, %v2680_v44 }
 0xdd5   :  { %6115 = vmatpush3.bf16.msra.mxu0 %v6112_v37 }
 0xdd6   :  { %v2949_v45 = vpop.f32.mrb[38].mxu0 }
 0xdd7   :  { %v2950_v54 = vadd.f32 %v2949_v45, %v2676_v40  ;;  %v2951_v47 = vpop.f32.mrb[39].mxu0 }
 0xdd8   :  { %v2952_v22 = vadd.f32 %v2951_v47, %v2680_v44 }
 0xdd9   :  { %v7535_v51 = vpack.c.bf16 %v2950_v54, %v2944_v46 }
 0xdda   :  { %v7537_v58 = vpack.c.bf16 %v2952_v22, %v2946_v50  ;;  %v3020_v53 = vpop.f32.mrb[40].mxu0 }
 0xddb   :  { %v3021_v61 = vadd.f32 %v3020_v53, %v2684_v49  ;;  %v3022_v62 = vpop.f32.mrb[41].mxu0  ;;  %6117 = vmatprep.subr.bf16.mxu0 %v7535_v51 }
 0xddc   :  { %v3023_v2 = vadd.f32 %v3022_v62, %v2688_v60 }
 0xddd   :  { %5670 = vmatprep.mubr.f32.mxu1 %v3021_v61 }
 0xdde   :  { %v3026_v63 = vpop.f32.mrb[42].mxu0 }
 0xddf   :  { %v3028_v0 = vpop.f32.mrb[43].mxu0  ;;  %v3027_v41 = vadd.f32 %v3026_v63, %v2684_v49 }
 0xde0   :  { %v3029_v3 = vadd.f32 %v3028_v0, %v2688_v60 }
 0xde2   :  { %v6188_v5 = vpack.c.bf16 %v3029_v3, %v3023_v2  ;;  %v3097_v7 = vpop.f32.mrb[44].mxu0 }
 0xde3   :  { %v3099_v26 = vpop.f32.mrb[45].mxu0  ;;  %v3098_v42 = vadd.f32 %v3097_v7, %v2692_v21 }
 0xde4   :  { %v7548_v55 = vadd.f32 %v3099_v26, %v2696_v4  ;;  %6189 = vmatprep.subr.bf16.mxu1 %v6188_v5 }
 0xde5   :  { %6191 = vmatpush3.bf16.xpose.msra.mxu1 %v6188_v5 }
 0xde6   :  { %v3103_v52 = vpop.f32.mrb[46].mxu0 }
 0xde7   :  { %v3104_v8 = vadd.f32 %v3103_v52, %v2692_v21  ;;  %v3105_v9 = vpop.f32.mrb[47].mxu0  ;;  %v2672_v21 = vrot.slane %v7514_v16, %v6969_v25 }
 0xde8   :  { %v7550_v10 = vadd.f32 %v3105_v9, %v2696_v4 }
 0xde9   :  { %v6192_v14 = vpack.c.bf16 %v3104_v8, %v3098_v42  ;;  %v2869_v8 = vadd.f32 %v7522_v12, %v2672_v21  ;;  %v2875_v16 = vadd.f32 %v7524_v36, %v2672_v21 }
 0xdea   :  { %v3174_v59 = vpop.f32.mrb[48].mxu0 }
 0xdeb   :  { %v3176_v57 = vpop.f32.mrb[49].mxu0  ;;  %6193 = vmatprep.subr.bf16.mxu1 %v6192_v14  ;;  %v3175_v19 = vadd.f32 %v3174_v59, %v2700_v6 }
 0xdec   :  { %v3177_v56 = vadd.f32 %v3176_v57, %v2704_v11  ;;  %5671 = vmatmul.mubr.f32.vlgmr.msra.gmra.mrb[32].mxu1 %v3027_v41 }
 0xded   :  { %6195 = vmatpush3.bf16.msra.mxu1 %v6192_v14 }
 0xdee   :  { %v3180_v18 = vpop.f32.mrb[50].mxu0 }
 0xdef   :  { %v3181_v23 = vadd.f32 %v3180_v18, %v2700_v6  ;;  %v3182_v24 = vpop.f32.mrb[51].mxu0 }
 0xdf0   :  { %v3183_v27 = vadd.f32 %v3182_v24, %v2704_v11 }
 0xdf1   :  { %v7554_v29 = vpack.c.bf16 %v3181_v23, %v3175_v19 }
 0xdf2   :  { %v7556_v30 = vpack.c.bf16 %v3183_v27, %v3177_v56 }
 0xdf3   :  { %6229 = vmatprep.subr.bf16.mxu1 %v7554_v29 }
 0xea7   :  { %v5574_v28 = vpop.f32.mrb[52].mxu0 }
 0xea8   :  { %v3257_v17 = vadd.f32 %v7562_v13, %v5574_v28  ;;  %v3251_v32 = vpop.f32.mrb[53].mxu0 }
 0xea9   :  { %v3252_v31 = vadd.f32 %v7568_v33, %v3251_v32 }
 0xeaa   :  { %v3263_v34 = vsel %vm1316_vm2, %v3257_v17, -inf }
 0xeab   :  { %3264 = vmax.xlane.f32.xlu1 %v3263_v34  ;;  %v3260_v35 = vsel %vm1316_vm2, %v3252_v31, -inf }
 0xeac   :  { %3261 = vmax.xlane.f32.xlu0 %v3260_v35 }
 0xebf   :  { %v5672_v37 = vpop.f32.mrb[32].mxu1 }
 0xec0   :  { %v3790_v15 = vpop.f32.mrb[33].mxu1  ;;  %v3796_v49 = vadd.f32 %v7562_v13, %v5672_v37 }
 0xec1   :  { %v3791_v22 = vadd.f32 %v7568_v33, %v3790_v15 }
 0xec2   :  { %v3802_v61 = vsel %vm1316_vm2, %v3796_v49, -inf }
 0xec3   :  { %v3799_v62 = vsel %vm1316_vm2, %v3791_v22, -inf }
 0xf38   :  { %v3265_v39 = vpop.xlane.xlu1 %3264 }
 0xf39   :  { %v3267_v40 = vsub.f32 %v3257_v17, %v3265_v39  ;;  %v3262_v43 = vpop.xlane.xlu0 %3261 }
 0xf3a   :  { %v3266_v44 = vsub.f32 %v3252_v31, %v3262_v43 }
 0xf3b   :  { %v3270_v45 = vmul.f32 1.442695, %v3267_v40 }
 0xf3c   :  { %v3268_v46 = vmul.f32 1.442695, %v3266_v44 }
 0xf3d   :  { %6405 = vpow2.f32 %v3270_v45 }
 0xf3e   :  { %6407 = vpow2.f32 %v3268_v46 }
 0xf47   :  { %v6406_v54 = vpop.eup %6405 }
 0xf48   :  { %v6408_v47 = vpop.eup %6407  ;;  %v3275_v50 = vsel %vm1316_vm2, %v6406_v54, 0.0 }
 0xf49   :  { %3276 = vadd.xlane.f32.xlu1 %v3275_v50  ;;  %v3272_v53 = vsel %vm1316_vm2, %v6408_v47, 0.0 }
 0xf4a   :  { %3273 = vadd.xlane.f32.xlu0 %v3272_v53 }
 0xf4d   :  { %3803 = vmax.xlane.f32.xlu1 %v3802_v61 }
 0xf4e   :  { %3800 = vmax.xlane.f32.xlu0 %v3799_v62 }
 0xfd6   :  { %v3277_v60 = vpop.xlane.xlu1 %3276 }
 0xfd7   :  { %6409 = vrcp.f32 %v3277_v60  ;;  %v3274_v48 = vpop.xlane.xlu0 %3273 }
 0xfd8   :  { %6411 = vrcp.f32 %v3274_v48 }
 0xfda   :  { %v3804_v63 = vpop.xlane.xlu1 %3803 }
 0xfdb   :  { %v3806_v0 = vsub.f32 %v3796_v49, %v3804_v63  ;;  %v3801_v2 = vpop.xlane.xlu0 %3800 }
 0xfdc   :  { %v3805_v3 = vsub.f32 %v3791_v22, %v3801_v2 }
 0xfdd   :  { %v3809_v4 = vmul.f32 1.442695, %v3806_v0 }
 0xfde   :  { %v3807_v5 = vmul.f32 1.442695, %v3805_v3 }
 0xfdf   :  { %6413 = vpow2.f32 %v3809_v4  ;;  %v4912_v4 = vld [vmem:[%s7936_s6 + $0x280] sm:$0xff] }
 0xfe0   :  { %6415 = vpow2.f32 %v3807_v5  ;;  %v4913_v5 = vld [vmem:[%s7936_s6 + $0x288] sm:$0xff] }
 0xfe1   :  { %v6410_v7 = vpop.eup %6409  ;;  %v6124_v21 = vpack.c.bf16 %v4913_v5, %v4912_v4  ;;  %v4932_v5 = vld [vmem:[%s7936_s6 + $0x310] sm:$0xff] }
 0xfe2   :  { %v6412_v26 = vpop.eup %6411  ;;  %v3281_v42 = vmul.f32 %v6410_v7, %v6406_v54  ;;  %v4914_v7 = vld [vmem:[%s7936_s6 + $0x290] sm:$0xff] }
 0xfe3   :  { %v3280_v52 = vmul.f32 %v6412_v26, %v6408_v47  ;;  %v4915_v26 = vld [vmem:[%s7936_s6 + $0x298] sm:$0xff] }
 0xfe5   :  { %5579 = vmatprep.mubr.msk.f32.mxu0 %vm1316_vm2, %v3280_v52  ;;  %v6128_v52 = vpack.c.bf16 %v4915_v26, %v4914_v7  ;;  %v4933_v7 = vld [vmem:[%s7936_s6 + $0x318] sm:$0xff]  ;;  %v4934_v26 = vld [vmem:[%s7936_s6 + $0x320] sm:$0xff] }
 0xfe6   :  { %5580 = vmatmul.mubr.msk.f32.vlgmr.msra.gmra.mrb[54].mxu0 %vm1316_vm2, %v3281_v42  ;;  %v4916_v42 = vld [vmem:[%s7936_s6 + $0x2a0] sm:$0xff] }
 0xfe7   :  { %6119 = vmatpush3.bf16.xpose.msra.mxu0 %v7535_v51  ;;  %5586 = vmatprep.mubr.f32.mxu0 %v2869_v8  ;;  %v4917_v8 = vld [vmem:[%s7936_s6 + $0x2a8] sm:$0xff] }
 0xfe8   :  { %6121 = vmatprep.subr.bf16.mxu0 %v7537_v58 }
 0xfe9   :  { %v6414_v9 = vpop.eup %6413 }
 0xfea   :  { %v6416_v11 = vpop.eup %6415  ;;  %v3814_v14 = vsel %vm1316_vm2, %v6414_v9, 0.0 }
 0xfeb   :  { %3815 = vadd.xlane.f32.xlu1 %v3814_v14  ;;  %v3811_v25 = vsel %vm1316_vm2, %v6416_v11, 0.0  ;;  %v4919_v14 = vld [vmem:[%s7936_s6 + $0x2b8] sm:$0xff] }
 0xfec   :  { %3812 = vadd.xlane.f32.xlu0 %v3811_v25 }
 0xfee   :  { %5587 = vmatmul.mubr.f32.vlgmr.msra.gmra.mrb[56].mxu0 %v2875_v16  ;;  %v4920_v16 = vld [vmem:[%s7936_s6 + $0x2c0] sm:$0xff] }
 0xfef   :  { %6123 = vmatpush3.bf16.msra.mxu0 %v7537_v58 }
 0xff0   :  { %6125 = vmatprep.subr.bf16.mxu0 %v6124_v21 }
0x1078   :  { %v3816_v12 = vpop.xlane.xlu1 %3815 }
0x1079   :  { %6417 = vrcp.f32 %v3816_v12  ;;  %v3813_v41 = vpop.xlane.xlu0 %3812  ;;  %v4921_v12 = vld [vmem:[%s7936_s6 + $0x2c8] sm:$0xff] }
0x107a   :  { %6419 = vrcp.f32 %v3813_v41  ;;  %v6140_v41 = vpack.c.bf16 %v4921_v12, %v4920_v16  ;;  %v4941_v16 = vld [vmem:[%s7936_s6 + $0x358] sm:$0xff] }
0x1083   :  { %v6418_v51 = vpop.eup %6417 }
0x1084   :  { %v6420_v59 = vpop.eup %6419  ;;  %v3820_v57 = vmul.f32 %v6418_v51, %v6414_v9  ;;  %v6132_v9 = vpack.c.bf16 %v4917_v8, %v4916_v42  ;;  %v4922_v51 = vld [vmem:[%s7936_s6 + $0x2d0] sm:$0xff] }
0x1085   :  { %v3819_v6 = vmul.f32 %v6420_v59, %v6416_v11  ;;  %v4918_v11 = vld [vmem:[%s7936_s6 + $0x2b0] sm:$0xff]  ;;  %v4923_v59 = vld [vmem:[%s7936_s6 + $0x2d8] sm:$0xff] }
0x1086   :  { %v6136_v25 = vpack.c.bf16 %v4919_v14, %v4918_v11  ;;  %v4936_v8 = vld [vmem:[%s7936_s6 + $0x330] sm:$0xff] }
0x1087   :  { %5677 = vmatprep.mubr.msk.f32.mxu1 %vm1316_vm2, %v3819_v6  ;;  %v6144_v6 = vpack.c.bf16 %v4923_v59, %v4922_v51  ;;  %v4943_v51 = vld [vmem:[%s7936_s6 + $0x368] sm:$0xff] }
0x1088   :  { %5678 = vmatmul.mubr.msk.f32.vlgmr.msra.gmra.mrb[34].mxu1 %vm1316_vm2, %v3820_v57  ;;  %v4924_v57 = vld [vmem:[%s7936_s6 + $0x2e0] sm:$0xff] }
0x1089   :  { %6231 = vmatpush3.bf16.xpose.msra.mxu1 %v7554_v29  ;;  %5719 = vmatprep.mubr.f32.mxu1 %v7548_v55 }
0x108a   :  { %6233 = vmatprep.subr.bf16.mxu1 %v7556_v30 }
0x1090   :  { %5720 = vmatmul.mubr.f32.vlgmr.msra.gmra.mrb[36].mxu1 %v7550_v10 }
0x1091   :  { %6235 = vmatpush3.bf16.msra.mxu1 %v7556_v30 }
0x10b9   :  { %v7597_v36 = vpop.f32.mrb[54].mxu0 }
0x10ba   :  { %v7599_v58 = vpop.f32.mrb[55].mxu0 }
0x10c1   :  { %v5588_v56 = vpop.f32.mrb[56].mxu0 }
0x10c2   :  { %v3452_v18 = vadd.f32 %v7562_v13, %v5588_v56  ;;  %v3446_v19 = vpop.f32.mrb[57].mxu0  ;;  %v4925_v56 = vld [vmem:[%s7936_s6 + $0x2e8] sm:$0xff] }
0x10c3   :  { %v3447_v23 = vadd.f32 %v7568_v33, %v3446_v19  ;;  %v4926_v19 = vld [vmem:[%s7936_s6 + $0x2f0] sm:$0xff] }
0x10c4   :  { %v3458_v24 = vsel %vm1316_vm2, %v3452_v18, -inf }
0x10c5   :  { %3459 = vmax.xlane.f32.xlu1 %v3458_v24  ;;  %v3455_v55 = vsel %vm1316_vm2, %v3447_v23, -inf }
0x10c6   :  { %3456 = vmax.xlane.f32.xlu0 %v3455_v55  ;;  %v4894_v55 = vld [vmem:[%s7936_s6 + $0x200] sm:$0xff] }
0x1152   :  { %v3460_v27 = vpop.xlane.xlu1 %3459 }
0x1153   :  { %v3462_v10 = vsub.f32 %v3452_v18, %v3460_v27  ;;  %v3457_v29 = vpop.xlane.xlu0 %3456  ;;  %v6148_v18 = vpack.c.bf16 %v4925_v56, %v4924_v57  ;;  %v4895_v27 = vld [vmem:[%s7936_s6 + $0x208] sm:$0xff]  ;;  %v4945_v57 = vld [vmem:[%s7936_s6 + $0x378] sm:$0xff] }
0x1154   :  { %v3461_v30 = vsub.f32 %v3447_v23, %v3457_v29  ;;  %v4927_v23 = vld [vmem:[%s7936_s6 + $0x2f8] sm:$0xff] }
0x1155   :  { %v3465_v28 = vmul.f32 1.442695, %v3462_v10  ;;  %v6152_v24 = vpack.c.bf16 %v4927_v23, %v4926_v19  ;;  %v6156_v10 = vpack.c.bf16 %v4895_v27, %v4894_v55  ;;  %v4949_v19 = vld [vmem:[%s7936_s6 + $0x388] sm:$0xff]  ;;  %v4951_v55 = vld [vmem:[%s7936_s6 + $0x398] sm:$0xff] }
0x1156   :  { %v3463_v17 = vmul.f32 1.442695, %v3461_v30 }
0x1157   :  { %6421 = vpow2.f32 %v3465_v28 }
0x1158   :  { %6423 = vpow2.f32 %v3463_v17 }
0x115b   :  { %v7605_v32 = vpop.f32.mrb[34].mxu1 }
0x115c   :  { %v7607_v31 = vpop.f32.mrb[35].mxu1 }
0x1161   :  { %v6422_v34 = vpop.eup %6421 }
0x1162   :  { %v6424_v35 = vpop.eup %6423  ;;  %v3470_v37 = vsel %vm1316_vm2, %v6422_v34, 0.0 }
0x1163   :  { %3471 = vadd.xlane.f32.xlu1 %v3470_v37  ;;  %v5721_v15 = vpop.f32.mrb[36].mxu1  ;;  %v3467_v39 = vsel %vm1316_vm2, %v6424_v35, 0.0  ;;  %v4896_v37 = vld [vmem:[%s7936_s6 + $0x210] sm:$0xff] }
0x1164   :  { %v4067_v40 = vadd.f32 %v7562_v13, %v5721_v15  ;;  %v4061_v43 = vpop.f32.mrb[37].mxu1  ;;  %3468 = vadd.xlane.f32.xlu0 %v3467_v39  ;;  %v4897_v15 = vld [vmem:[%s7936_s6 + $0x218] sm:$0xff] }
0x1165   :  { %v4062_v44 = vadd.f32 %v7568_v33, %v4061_v43  ;;  %v6160_v43 = vpack.c.bf16 %v4897_v15, %v4896_v37  ;;  %v4958_v15 = vld [vmem:[%s7936_s6 + $0x3d0] sm:$0xff] }
0x1166   :  { %v4073_v45 = vsel %vm1316_vm2, %v4067_v40, -inf }
0x1167   :  { %4074 = vmax.xlane.f32.xlu1 %v4073_v45  ;;  %v4070_v46 = vsel %vm1316_vm2, %v4062_v44, -inf  ;;  %v4899_v45 = vld [vmem:[%s7936_s6 + $0x228] sm:$0xff] }
0x1168   :  { %4071 = vmax.xlane.f32.xlu0 %v4070_v46 }
0x11f0   :  { %v3472_v54 = vpop.xlane.xlu1 %3471 }
0x11f1   :  { %6425 = vrcp.f32 %v3472_v54  ;;  %v3469_v47 = vpop.xlane.xlu0 %3468  ;;  %v4900_v54 = vld [vmem:[%s7936_s6 + $0x230] sm:$0xff] }
0x11f2   :  { %6427 = vrcp.f32 %v3469_v47  ;;  %v4901_v47 = vld [vmem:[%s7936_s6 + $0x238] sm:$0xff] }
0x11f4   :  { %v4075_v49 = vpop.xlane.xlu1 %4074 }
0x11f5   :  { %v4077_v50 = vsub.f32 %v4067_v40, %v4075_v49  ;;  %v4072_v22 = vpop.xlane.xlu0 %4071  ;;  %v6168_v49 = vpack.c.bf16 %v4901_v47, %v4900_v54  ;;  %v4963_v54 = vld [vmem:[%s7936_s6 + $0x3f8] sm:$0xff] }
0x11f6   :  { %v4076_v53 = vsub.f32 %v4062_v44, %v4072_v22  ;;  %v4898_v44 = vld [vmem:[%s7936_s6 + $0x220] sm:$0xff] }
0x11f7   :  { %v4080_v61 = vmul.f32 1.442695, %v4077_v50  ;;  %v6164_v46 = vpack.c.bf16 %v4899_v45, %v4898_v44  ;;  %v4902_v50 = vld [vmem:[%s7936_s6 + $0x240] sm:$0xff]  ;;  %v4961_v44 = vld [vmem:[%s7936_s6 + $0x3e8] sm:$0xff] }
0x11f8   :  { %v4078_v13 = vmul.f32 1.442695, %v4076_v53  ;;  %v4904_v53 = vld [vmem:[%s7936_s6 + $0x250] sm:$0xff] }
0x11f9   :  { %6429 = vpow2.f32 %v4080_v61  ;;  %v4905_v61 = vld [vmem:[%s7936_s6 + $0x258] sm:$0xff] }
0x11fa   :  { %6431 = vpow2.f32 %v4078_v13  ;;  %v6176_v13 = vpack.c.bf16 %v4905_v61, %v4904_v53 }
0x11fb   :  { %v6426_v62 = vpop.eup %6425 }
0x11fc   :  { %v6428_v33 = vpop.eup %6427  ;;  %v3476_v48 = vmul.f32 %v6426_v62, %v6422_v34  ;;  %v4906_v62 = vld [vmem:[%s7936_s6 + $0x260] sm:$0xff] }
0x11fd   :  { %v3475_v60 = vmul.f32 %v6428_v33, %v6424_v35  ;;  %v4907_v33 = vld [vmem:[%s7936_s6 + $0x268] sm:$0xff] }
0x11ff   :  { %5593 = vmatprep.mubr.msk.f32.mxu0 %vm1316_vm2, %v3475_v60  ;;  %v6180_v60 = vpack.c.bf16 %v4907_v33, %v4906_v62 }
0x1200   :  { %5594 = vmatmul.mubr.msk.f32.vlgmr.msra.gmra.mrb[58].mxu0 %vm1316_vm2, %v3476_v48  ;;  %v4908_v48 = vld [vmem:[%s7936_s6 + $0x270] sm:$0xff] }
0x1201   :  { %6127 = vmatpush3.bf16.msra.mxu0 %v6124_v21  ;;  %v6200_v21 = vpack.c.bf16 %v4933_v7, %v4932_v5 }
0x1202   :  { %6129 = vmatprep.subr.bf16.mxu0 %v6128_v52 }
0x1203   :  { %v6430_v63 = vpop.eup %6429 }
0x1204   :  { %v6432_v0 = vpop.eup %6431  ;;  %v4085_v2 = vsel %vm1316_vm2, %v6430_v63, 0.0 }
0x1205   :  { %4086 = vadd.xlane.f32.xlu1 %v4085_v2  ;;  %v4082_v3 = vsel %vm1316_vm2, %v6432_v0, 0.0  ;;  %6131 = vmatpush3.bf16.msra.mxu0 %v6128_v52  ;;  %v4930_v2 = vld [vmem:[%s7936_s6 + $0x300] sm:$0xff]  ;;  %v4935_v52 = vld [vmem:[%s7936_s6 + $0x328] sm:$0xff] }
0x1206   :  { %4083 = vadd.xlane.f32.xlu0 %v4082_v3  ;;  %6133 = vmatprep.subr.bf16.mxu0 %v6132_v9  ;;  %v4931_v3 = vld [vmem:[%s7936_s6 + $0x308] sm:$0xff]  ;;  %v6204_v42 = vpack.c.bf16 %v4935_v52, %v4934_v26  ;;  %v4971_v52 = vld [vmem:[%s7937_s7 + $0x30] sm:$0xff] }
0x1207   :  { %v6196_v4 = vpack.c.bf16 %v4931_v3, %v4930_v2 }
0x1209   :  { %6135 = vmatpush3.bf16.msra.mxu0 %v6132_v9  ;;  %v4937_v9 = vld [vmem:[%s7936_s6 + $0x338] sm:$0xff] }
0x120a   :  { %6137 = vmatprep.subr.bf16.mxu0 %v6136_v25  ;;  %v6208_v11 = vpack.c.bf16 %v4937_v9, %v4936_v8  ;;  %v4972_v8 = vld [vmem:[%s7937_s7 + $0x38] sm:$0xff]  ;;  %v4973_v9 = vld [vmem:[%s7937_s7 + $0x40] sm:$0xff] }
0x120d   :  { %6139 = vmatpush3.bf16.msra.mxu0 %v6136_v25  ;;  %v4940_v25 = vld [vmem:[%s7936_s6 + $0x350] sm:$0xff] }
0x120e   :  { %6141 = vmatprep.subr.bf16.mxu0 %v6140_v41  ;;  %v6216_v12 = vpack.c.bf16 %v4941_v16, %v4940_v25 }
0x1211   :  { %6143 = vmatpush3.bf16.msra.mxu0 %v6140_v41  ;;  %v4942_v41 = vld [vmem:[%s7936_s6 + $0x360] sm:$0xff] }
0x1212   :  { %6145 = vmatprep.subr.bf16.mxu0 %v6144_v6  ;;  %v6220_v59 = vpack.c.bf16 %v4943_v51, %v4942_v41 }
0x1215   :  { %6147 = vmatpush3.bf16.msra.mxu0 %v6144_v6  ;;  %v4944_v6 = vld [vmem:[%s7936_s6 + $0x370] sm:$0xff] }
0x1216   :  { %6149 = vmatprep.subr.bf16.mxu0 %v6148_v18  ;;  %v6224_v56 = vpack.c.bf16 %v4945_v57, %v4944_v6  ;;  %v4967_v57 = vld [vmem:[%s7938_s8 + $0x8a] ss:$0 sm:$0xff] }
0x1219   :  { %6151 = vmatpush3.bf16.msra.mxu0 %v6148_v18  ;;  %v4948_v18 = vld [vmem:[%s7936_s6 + $0x380] sm:$0xff] }
0x121a   :  { %6153 = vmatprep.subr.bf16.mxu0 %v6152_v24  ;;  %v6236_v23 = vpack.c.bf16 %v4949_v19, %v4948_v18 }
0x121d   :  { %6155 = vmatpush3.bf16.msra.mxu0 %v6152_v24  ;;  %v4950_v24 = vld [vmem:[%s7936_s6 + $0x390] sm:$0xff] }
0x121e   :  { %6157 = vmatprep.subr.bf16.mxu0 %v6156_v10  ;;  %v6240_v27 = vpack.c.bf16 %v4951_v55, %v4950_v24  ;;  %v4969_v24 = vld [vmem:[%s7938_s8 + $0x8b] ss:$0 sm:$0xff] }
0x1292   :  { %v4087_v29 = vpop.xlane.xlu1 %4086 }
0x1293   :  { %6433 = vrcp.f32 %v4087_v29  ;;  %v4084_v30 = vpop.xlane.xlu0 %4083  ;;  %v4953_v29 = vld [vmem:[%s7936_s6 + $0x3a8] sm:$0xff] }
0x1294   :  { %6435 = vrcp.f32 %v4084_v30 }
0x129d   :  { %v6434_v28 = vpop.eup %6433 }
0x129e   :  { %v6436_v17 = vpop.eup %6435  ;;  %v4091_v35 = vmul.f32 %v6434_v28, %v6430_v63  ;;  %v4909_v63 = vld [vmem:[%s7936_s6 + $0x278] sm:$0xff]  ;;  %v4954_v28 = vld [vmem:[%s7936_s6 + $0x3b0] sm:$0xff] }
0x129f   :  { %v4090_v34 = vmul.f32 %v6436_v17, %v6432_v0  ;;  %v6184_v0 = vpack.c.bf16 %v4909_v63, %v4908_v48  ;;  %v4955_v17 = vld [vmem:[%s7936_s6 + $0x3b8] sm:$0xff] }
0x12a1   :  { %5726 = vmatprep.mubr.msk.f32.mxu1 %vm1316_vm2, %v4090_v34  ;;  %v6248_v34 = vpack.c.bf16 %v4955_v17, %v4954_v28  ;;  %v4982_v17 = vld [vmem:[%s7938_s8 + $0x68] sm:$0xff] }
0x12a2   :  { %5727 = vmatmul.mubr.msk.f32.vlgmr.msra.gmra.mrb[38].mxu1 %vm1316_vm2, %v4091_v35  ;;  %v4956_v35 = vld [vmem:[%s7936_s6 + $0x3c0] sm:$0xff] }
0x12d3   :  { %v5595_v39 = vpop.f32.mrb[58].mxu0 }
0x12d4   :  { %v3549_v40 = vpop.f32.mrb[59].mxu0 }
0x12d5   :  { %5628 = vmatprep.mubr.f32.mxu0 %v3549_v40 }
0x12d6   :  { %5629 = vmatmul.mubr.f32.vlgmr.msra.gmra.mrb[60].mxu0 %v5595_v39  ;;  %v4959_v39 = vld [vmem:[%s7936_s6 + $0x3d8] sm:$0xff] }
0x12d7   :  { %6159 = vmatpush3.bf16.msra.mxu0 %v6156_v10  ;;  %5663 = vmatprep.mubr.f32.mxu0 %v7599_v58  ;;  %v4903_v58 = vld [vmem:[%s7936_s6 + $0x248] sm:$0xff]  ;;  %v4952_v10 = vld [vmem:[%s7936_s6 + $0x3a0] sm:$0xff]  ;;  %v6256_v40 = vpack.c.bf16 %v4959_v39, %v4958_v15 }
0x12d8   :  { %6161 = vmatprep.subr.bf16.mxu0 %v6160_v43  ;;  %v6172_v22 = vpack.c.bf16 %v4903_v58, %v4902_v50  ;;  %v6244_v30 = vpack.c.bf16 %v4953_v29, %v4952_v10  ;;  %v4965_v58 = vld [vmem:[%s7938_s8 + $0x88] ss:$0 sm:$0xff]  ;;  %v4981_v10 = vld [vmem:[%s7938_s8 + $0x60] sm:$0xff] }
0x12d9   :  { %v4975_v39 = vld [vmem:[%s7937_s7 + $0x48] ss:$0 sm:$0xff] }
0x12db   :  { %6163 = vmatpush3.bf16.msra.mxu0 %v6160_v43  ;;  %v4960_v43 = vld [vmem:[%s7936_s6 + $0x3e0] sm:$0xff] }
0x12dc   :  { %6165 = vmatprep.subr.bf16.mxu0 %v6164_v46  ;;  %v6260_v45 = vpack.c.bf16 %v4961_v44, %v4960_v43 }
0x12df   :  { %6167 = vmatpush3.bf16.msra.mxu0 %v6164_v46  ;;  %v4962_v46 = vld [vmem:[%s7936_s6 + $0x3f0] sm:$0xff] }
0x12e0   :  { %6169 = vmatprep.subr.bf16.mxu0 %v6168_v49  ;;  %v6264_v47 = vpack.c.bf16 %v4963_v54, %v4962_v46 }
0x12e3   :  { %6171 = vmatpush3.bf16.msra.mxu0 %v6168_v49 }
0x12e4   :  { %6173 = vmatprep.subr.bf16.mxu0 %v6172_v22 }
0x12e7   :  { %6175 = vmatpush3.bf16.msra.mxu0 %v6172_v22 }
0x12e8   :  { %6177 = vmatprep.subr.bf16.mxu0 %v6176_v13 }
0x12eb   :  { %6179 = vmatpush3.bf16.msra.mxu0 %v6176_v13 }
0x12ec   :  { %6181 = vmatprep.subr.bf16.mxu0 %v6180_v60 }
0x12ef   :  { %6183 = vmatpush3.bf16.msra.mxu0 %v6180_v60 }
0x12f0   :  { %6185 = vmatprep.subr.bf16.mxu0 %v6184_v0 }
0x12f3   :  { %6187 = vmatpush3.bf16.msra.mxu0 %v6184_v0 }
0x12f4   :  { %6197 = vmatprep.subr.bf16.mxu0 %v6196_v4 }
0x12f6   :  { %5664 = vmatmul.mubr.f32.vlgmr.msra.gmra.mrb[60].mxu0 %v7597_v36  ;;  %v4938_v36 = vld [vmem:[%s7936_s6 + $0x340] sm:$0xff] }
0x12f7   :  { %6199 = vmatpush3.bf16.msra.mxu0 %v6196_v4  ;;  %5712 = vmatprep.mubr.f32.mxu0 %v7607_v31  ;;  %v4939_v31 = vld [vmem:[%s7936_s6 + $0x348] sm:$0xff] }
0x12f8   :  { %6201 = vmatprep.subr.bf16.mxu0 %v6200_v21  ;;  %v6212_v14 = vpack.c.bf16 %v4939_v31, %v4938_v36  ;;  %v4978_v36 = vld [vmem:[%s7938_s8 + $0x48] sm:$0xff]  ;;  %v4979_v31 = vld [vmem:[%s7938_s8 + $0x50] sm:$0xff] }
0x12fb   :  { %6203 = vmatpush3.bf16.msra.mxu0 %v6200_v21 }
0x12fc   :  { %6205 = vmatprep.subr.bf16.mxu0 %v6204_v42 }
0x12ff   :  { %6207 = vmatpush3.bf16.msra.mxu0 %v6204_v42 }
0x1300   :  { %6209 = vmatprep.subr.bf16.mxu0 %v6208_v11 }
0x1303   :  { %6211 = vmatpush3.bf16.msra.mxu0 %v6208_v11  ;;  %v6272_v11 = vpack.c.bf16 %v4973_v9, %v4972_v8 }
0x1304   :  { %6213 = vmatprep.subr.bf16.mxu0 %v6212_v14 }
0x1307   :  { %6215 = vmatpush3.bf16.msra.mxu0 %v6212_v14  ;;  %v6276_v14 = vpack.c.bf16 %v4979_v31, %v4978_v36 }
0x1308   :  { %6217 = vmatprep.subr.bf16.mxu0 %v6216_v12 }
0x130b   :  { %6219 = vmatpush3.bf16.msra.mxu0 %v6216_v12 }
0x130c   :  { %6221 = vmatprep.subr.bf16.mxu0 %v6220_v59 }
0x130f   :  { %6223 = vmatpush3.bf16.msra.mxu0 %v6220_v59 }
0x1310   :  { %6225 = vmatprep.subr.bf16.mxu0 %v6224_v56 }
0x1313   :  { %6227 = vmatpush3.bf16.msra.mxu0 %v6224_v56 }
0x1314   :  { %6237 = vmatprep.subr.bf16.mxu0 %v6236_v23 }
0x1316   :  { %5713 = vmatmul.mubr.f32.vlgmr.msra.gmra.mrb[60].mxu0 %v7605_v32  ;;  %v4957_v32 = vld [vmem:[%s7936_s6 + $0x3c8] sm:$0xff]  ;;  %s6449_s6 = scalar_lea.vmem %s4736_s30, 32 }
0x1317   :  { %6239 = vmatpush3.bf16.msra.mxu0 %v6236_v23  ;;  %v6252_v37 = vpack.c.bf16 %v4957_v32, %v4956_v35  ;;  %v4984_v32 = vld [vmem:[%s7938_s8 + $0x78] sm:$0xff]  ;;  %p6450_p0 = scmp.ne.s32.totalorder %s4736_s30, %s6449_s6  ;;  %p6455_p2 = scmp.lt.s32.totalorder %s6449_s6, %s6449_s6 }
0x1318   :  { %6241 = vmatprep.subr.bf16.mxu0 %v6240_v27 }
0x1319   :  { %p6456_p3 = por %p6455_p2, %p6454_p1 }
0x131b   :  { %6243 = vmatpush3.bf16.msra.mxu0 %v6240_v27  ;;  %v4980_v27 = vld [vmem:[%s7938_s8 + $0x58] sm:$0xff]  ;;  %p6457_p4 = pnand %p6456_p3, %p6450_p0 }
0x131c   :  { %6245 = vmatprep.subr.bf16.mxu0 %v6244_v30  ;;  %v6280_v28 = vpack.c.bf16 %v4981_v10, %v4980_v27  ;;  %v4645_v10 = vld [vmem:[%s7939_s9] sm:$0xff] }
0x131f   :  { %6247 = vmatpush3.bf16.msra.mxu0 %v6244_v30 }
0x1320   :  { %6249 = vmatprep.subr.bf16.mxu0 %v6248_v34 }
0x1323   :  { %6251 = vmatpush3.bf16.msra.mxu0 %v6248_v34  ;;  %v4983_v34 = vld [vmem:[%s7938_s8 + $0x70] sm:$0xff] }
0x1324   :  { %6253 = vmatprep.subr.bf16.mxu0 %v6252_v37  ;;  %v6284_v35 = vpack.c.bf16 %v4983_v34, %v4982_v17 }
0x1327   :  { %6255 = vmatpush3.bf16.msra.mxu0 %v6252_v37  ;;  %v4985_v37 = vld [vmem:[%s7938_s8 + $0x80] sm:$0xff] }
0x1328   :  { %6257 = vmatprep.subr.bf16.mxu0 %v6256_v40  ;;  %v6288_v15 = vpack.c.bf16 %v4985_v37, %v4984_v32 }
0x132b   :  { %6259 = vmatpush3.bf16.msra.mxu0 %v6256_v40 }
0x132c   :  { %6261 = vmatprep.subr.bf16.mxu0 %v6260_v45 }
0x132f   :  { %6263 = vmatpush3.bf16.msra.mxu0 %v6260_v45 }
0x1330   :  { %6265 = vmatprep.subr.bf16.mxu0 %v6264_v47 }
0x1333   :  { %6267 = vmatpush3.bf16.msra.mxu0 %v6264_v47  ;;  %v4987_v47 = vld [vmem:[%s7938_s8 + $0x89] ss:$0 sm:$0xff] }
0x1375   :  { %v5728_v49 = vpop.f32.mrb[38].mxu1 }
0x1376   :  { %v4164_v50 = vpop.f32.mrb[39].mxu1 }
0x1377   :  { %5761 = vmatprep.mubr.f32.mxu0 %v4164_v50 }
0x1378   :  { %5762 = vmatmul.mubr.f32.vlgmr.msra.gmra.mrb[60].mxu0 %v5728_v49 }
0x144b   :  { %v5763_v22 = vpop.f32.mrb[60].mxu0 }
0x144c   :  { %v4273_v53 = vadd.f32 %v5763_v22, %v4965_v58  ;;  %v4255_v61 = vpop.f32.mrb[61].mxu0 }
0x144d   :  { %v4272_v13 = vadd.f32 %v4965_v58, %v4255_v61 }
0x144e   :  { %v4275_v62 = vadd.f32 %v4273_v53, %v7384_v20 }
0x144f   :  { %v4274_v33 = vadd.f32 %v4272_v13, %v7367_v38  ;;  %v4970_v38 = vld [vmem:[%s7937_s7 + $0x28] sm:$0xff] }
0x1450   :  { %v4279_v60 = vsel %vm772_vm1, %v4275_v62, 0.0  ;;  %v6268_v42 = vpack.c.bf16 %v4971_v52, %v4970_v38 }
0x1451   :  { %4280 = vadd.xlane.f32.xlu1 %v4279_v60  ;;  %v4276_v48 = vsel %vm772_vm1, %v4274_v33, 0.0 }
0x1452   :  { %4277 = vadd.xlane.f32.xlu0 %v4276_v48  ;;  %6269 = vmatprep.subr.bf16.mxu1 %v6268_v42 }
0x1453   :  { %6271 = vmatpush3.bf16.msra.mxu1 %v6268_v42 }
0x1454   :  { %6273 = vmatprep.subr.bf16.mxu1 %v6272_v11 }
0x1457   :  { %6275 = vmatpush3.bf16.msra.mxu1 %v6272_v11  ;;  %v4991_v11 = vld [vmem:[%s7938_s8 + $0x8c] ss:$0 sm:$0xff] }
0x1458   :  { %6277 = vmatprep.subr.bf16.mxu1 %v6276_v14 }
0x14de   :  { %v4281_v63 = vpop.xlane.xlu1 %4280 }
0x14df   :  { %v4283_v0 = vmul.f32 0.03125, %v4281_v63  ;;  %v4278_v2 = vpop.xlane.xlu0 %4277 }
0x14e0   :  { %v4282_v3 = vmul.f32 0.03125, %v4278_v2 }
0x14e1   :  { %v4285_v4 = vsub.f32 %v4275_v62, %v4283_v0 }
0x14e2   :  { %v4284_v5 = vsub.f32 %v4274_v33, %v4282_v3 }
0x14e3   :  { %v4287_v7 = vmul.f32 %v4285_v4, %v4285_v4 }
0x14e4   :  { %v4286_v21 = vmul.f32 %v4284_v5, %v4284_v5 }
0x14e5   :  { %v4291_v26 = vsel %vm772_vm1, %v4287_v7, 0.0 }
0x14e6   :  { %4292 = vadd.xlane.f32.xlu1 %v4291_v26  ;;  %v4288_v20 = vsel %vm772_vm1, %v4286_v21, 0.0  ;;  %v6474_v21 = vmov 0.0|0.0  }
0x14e7   :  { %4289 = vadd.xlane.f32.xlu0 %v4288_v20 }
0x1573   :  { %v4293_v25 = vpop.xlane.xlu1 %4292 }
0x1574   :  { %v4295_v16 = vmul.f32 0.03125, %v4293_v25  ;;  %v4290_v12 = vpop.xlane.xlu0 %4289  ;;  %v4993_v25 = vld [vmem:[%s7938_s8 + $0x8d] ss:$0 sm:$0xff] }
0x1575   :  { %v4294_v41 = vmul.f32 0.03125, %v4290_v12 }
0x1576   :  { %v4297_v51 = vadd.f32 1e-05, %v4295_v16 }
0x1577   :  { %v4296_v59 = vadd.f32 1e-05, %v4294_v41 }
0x1578   :  { %6437 = vrsqrt.f32 %v4297_v51 }
0x1579   :  { %6439 = vrsqrt.f32 %v4296_v59 }
0x1582   :  { %v6438_v6 = vpop.eup %6437 }
0x1583   :  { %v6440_v56 = vpop.eup %6439  ;;  %v4301_v18 = vmul.f32 %v6438_v6, %v4285_v4  ;;  %v4545_v6 = vld [vmem:[%s7934_s4 + $0x10] sm:$0x3] }
0x1584   :  { %v4300_v19 = vmul.f32 %v6440_v56, %v4284_v5 }
0x1585   :  { %v4308_v23 = vmul.f32 %v4967_v57, %v4301_v18 }
0x1586   :  { %v4307_v55 = vmul.f32 %v4967_v57, %v4300_v19 }
0x1587   :  { %v4315_v30 = vadd.f32 %v4969_v24, %v4308_v23 }
0x1588   :  { %v4314_v29 = vadd.f32 %v4969_v24, %v4307_v55 }
0x158a   :  { %5772 = vmatprep.mubr.msk.f32.mxu1 %vm772_vm1, %v4314_v29 }
0x158b   :  { %5773 = vmatmul.mubr.msk.f32.vlgmr.msra.gmra.mrb[40].mxu1 %vm772_vm1, %v4315_v30 }
0x158c   :  { %6279 = vmatpush3.bf16.msra.mxu1 %v6276_v14 }
0x158d   :  { %6281 = vmatprep.subr.bf16.mxu1 %v6280_v28 }
0x1590   :  { %6283 = vmatpush3.bf16.msra.mxu1 %v6280_v28  ;;  %v4648_v28 = vld [vmem:[%s7939_s9 + $0x18] sm:$0xff] }
0x1591   :  { %6285 = vmatprep.subr.bf16.mxu1 %v6284_v35 }
0x1594   :  { %6287 = vmatpush3.bf16.msra.mxu1 %v6284_v35 }
0x1595   :  { %6289 = vmatprep.subr.bf16.mxu1 %v6288_v15 }
0x1598   :  { %6291 = vmatpush3.bf16.msra.mxu1 %v6288_v15  ;;  %v4995_v15 = vld [vmem:[%s7938_s8 + $0x46] ss:$0 sm:$0xff] }
0x1599   :  { %6292 = vmatprep.subr.bf16.mxu1 %v6474_v21 }
0x165e   :  { %v5774_v40 = vpop.f32.mrb[40].mxu1 }
0x165f   :  { %v4404_v43 = vadd.f32 %v5774_v40, %v4975_v39  ;;  %v4398_v44 = vpop.f32.mrb[41].mxu1  ;;  %v4996_v40 = vld [vmem:[%s7938_s8 + $0x47] ss:$0 sm:$0xff] }
0x1660   :  { %v4399_v45 = vadd.f32 %v4975_v39, %v4398_v44 }
0x1661   :  { %v4408_v54 = vmax.f32 %v4404_v43, 0.0 }
0x1662   :  { %v4407_v46 = vmax.f32 %v4399_v45, 0.0  ;;  %v4997_v45 = vld [vmem:[%s7939_s9 + $0x20] ss:$0 sm:$0xff] }
0x1664   :  { %5791 = vmatprep.mubr.msk.f32.mxu1 %vm572_vm0, %v4407_v46 }
0x1665   :  { %5792 = vmatmul.mubr.msk.f32.vlgmr.msra.gmra.mrb[42].mxu1 %vm572_vm0, %v4408_v54 }
0x1666   :  { %5798 = vmatprep.mubr.msk.f32.mxu1 %vm6475_vm3, %v6473_v1 }
0x1738   :  { %v5793_v49 = vpop.f32.mrb[42].mxu1 }
0x1739   :  { %v4500_v50 = vadd.f32 %v5793_v49, %v4987_v47  ;;  %v4494_v58 = vpop.f32.mrb[43].mxu1 }
0x173a   :  { %v4495_v22 = vadd.f32 %v4987_v47, %v4494_v58 }
0x173b   :  { %v4504_v53 = vadd.f32 %v4500_v50, %v4315_v30  ;;  %v4647_v30 = vld [vmem:[%s7939_s9 + $0x10] sm:$0xff] }
0x173c   :  { %v4503_v61 = vadd.f32 %v4495_v22, %v4314_v29  ;;  %v4646_v29 = vld [vmem:[%s7939_s9 + $0x8] sm:$0xff]  ;;  %v6299_v17 = vpack.c.bf16 %v4648_v28, %v4647_v30 }
0x173d   :  { %v4508_v13 = vsel %vm772_vm1, %v4504_v53, 0.0 }
0x173e   :  { %4509 = vadd.xlane.f32.xlu1 %v4508_v13  ;;  %v4505_v62 = vsel %vm772_vm1, %v4503_v61, 0.0 }
0x173f   :  { %4506 = vadd.xlane.f32.xlu0 %v4505_v62 }
0x17cb   :  { %v4510_v33 = vpop.xlane.xlu1 %4509 }
0x17cc   :  { %v4512_v60 = vmul.f32 0.03125, %v4510_v33  ;;  %v4507_v48 = vpop.xlane.xlu0 %4506 }
0x17cd   :  { %v4511_v63 = vmul.f32 0.03125, %v4507_v48 }
0x17ce   :  { %v4514_v0 = vsub.f32 %v4504_v53, %v4512_v60 }
0x17cf   :  { %v4513_v2 = vsub.f32 %v4503_v61, %v4511_v63 }
0x17d0   :  { %v4516_v3 = vmul.f32 %v4514_v0, %v4514_v0 }
0x17d1   :  { %v4515_v4 = vmul.f32 %v4513_v2, %v4513_v2 }
0x17d2   :  { %v4520_v5 = vsel %vm772_vm1, %v4516_v3, 0.0 }
0x17d3   :  { %4521 = vadd.xlane.f32.xlu1 %v4520_v5  ;;  %v4517_v7 = vsel %vm772_vm1, %v4515_v4, 0.0 }
0x17d4   :  { %4518 = vadd.xlane.f32.xlu0 %v4517_v7 }
0x1860   :  { %v4522_v26 = vpop.xlane.xlu1 %4521 }
0x1861   :  { %v4524_v20 = vmul.f32 0.03125, %v4522_v26  ;;  %v4519_v38 = vpop.xlane.xlu0 %4518 }
0x1862   :  { %v4523_v52 = vmul.f32 0.03125, %v4519_v38 }
0x1863   :  { %v4526_v42 = vadd.f32 1e-05, %v4524_v20 }
0x1864   :  { %v4525_v8 = vadd.f32 1e-05, %v4523_v52 }
0x1865   :  { %6441 = vrsqrt.f32 %v4526_v42 }
0x1866   :  { %6443 = vrsqrt.f32 %v4525_v8 }
0x186f   :  { %v6442_v9 = vpop.eup %6441 }
0x1870   :  { %v6444_v36 = vpop.eup %6443  ;;  %v4530_v31 = vmul.f32 %v6442_v9, %v4514_v0 }
0x1871   :  { %v4529_v14 = vmul.f32 %v6444_v36, %v4513_v2 }
0x1872   :  { %v4537_v16 = vmul.f32 %v4991_v11, %v4530_v31 }
0x1873   :  { %v4536_v12 = vmul.f32 %v4991_v11, %v4529_v14 }
0x1874   :  { %v4544_v41 = vadd.f32 %v4993_v25, %v4537_v16 }
0x1875   :  { %v4543_v51 = vadd.f32 %v4993_v25, %v4536_v12 }
0x1877   :  { %v6293_v59 = vpack.c.bf16 %v4544_v41, %v4543_v51 }
0x1879   :  { %6294 = vmatpush3.bf16.msra.mxu1 %v6293_v59 }
0x187a   :  { %6295 = vmatprep.subr.bf16.mxu1 %v6474_v21 }
0x187c   :  { %5799 = vmatmul.mubr.msk.f32.vlgmr.msra.gmra.mrb[44].mxu1 %vm1316_vm2, %v4545_v6 }
0x187d   :  { %5809 = vmatprep.mubr.msk.f32.mxu1 %vm6475_vm3, %v6473_v1  ;;  %v6296_v1 = vpack.c.bf16 %v4646_v29, %v4645_v10 }
0x187f   :  { %6297 = vmatpush3.bf16.msra.mxu1 %v6296_v1 }
0x1880   :  { %6298 = vmatprep.subr.bf16.mxu1 %v6474_v21 }
0x1883   :  { %6300 = vmatpush3.bf16.msra.mxu1 %v6299_v17 }
0x194f   :  { %v4615_v57 = vpop.f32.mrb[44].mxu1 }
0x1950   :  { %v5800_v56 = vpop.f32.mrb[45].mxu1  ;;  %v4620_v18 = vsel %vm4619_vm4, %v4615_v57, 0.0 }
0x1951   :  { %4621 = vadd.xlane.f32.xlu0 %v4620_v18 }
0x19de   :  { %v4622_v19 = vpop.xlane.xlu0 %4621 }
0x19df   :  { %v4623_v23 = vmul.f32 0.03125, %v4622_v19 }
0x19e1   :  { %v4624_v24 = vsub.f32 %v4615_v57, %v4623_v23 }
0x19e3   :  { %v4625_v55 = vmul.f32 %v4624_v24, %v4624_v24 }
0x19e5   :  { %v4626_v27 = vsel %vm4619_vm4, %v4625_v55, 0.0 }
0x19e6   :  { %4627 = vadd.xlane.f32.xlu1 %v4626_v27 }
0x1a73   :  { %v4628_v34 = vpop.xlane.xlu1 %4627 }
0x1a74   :  { %v4629_v35 = vmul.f32 0.03125, %v4628_v34 }
0x1a76   :  { %v4630_v32 = vadd.f32 1e-05, %v4629_v35 }
0x1a78   :  { %6445 = vrsqrt.f32 %v4630_v32 }
0x1a82   :  { %v6446_v37 = vpop.eup %6445 }
0x1a83   :  { %v4632_v39 = vmul.f32 %v6446_v37, %v4624_v24 }
0x1a85   :  { %v4638_v43 = vmul.f32 %v4995_v15, %v4632_v39 }
0x1a87   :  { %v4644_v44 = vadd.f32 %v4996_v40, %v4638_v43 }
0x1a89   :  { %5810 = vmatmul.mubr.msk.f32.vlgmr.msra.gmra.mrb[46].mxu1 %vm772_vm1, %v4644_v44 }
0x1b5c   :  { %v4723_v46 = vpop.f32.mrb[46].mxu1 }
0x1b5d   :  { %v4724_v54 = vadd.f32 %v4997_v45, %v4723_v46  ;;  %v5811_v47 = vpop.f32.mrb[47].mxu1 }
0x1b5f   :  { %4728 = vst.msk [vmem:[#allocation2] sm:$0x3] %vm4727_vm5, %v4724_v54 }
0x1b60   :  { %6460 = shalt.err (!%p6457_p4)
}
0x1b61   :  { %s6461_s12 = scalar_lea.hbm %s7940_s10, 32 }
0x1b62   :  { %p6462_p5 = scmp.ne.s32.totalorder %s7940_s10, %s6461_s12  ;;  %p6465_p6 = scmp.lt.u32.totalorder %s6461_s12, %s7940_s10 }
0x1b64   :  { %p6467_p7 = pnand %p6465_p6, %p6462_p5 }
0x1b66   :  { %6470 = shalt.err (!%p6467_p7)
}
0x1b67   :  { %4738 = dma.vmem_to_hbm [thread:$0]  %s4736_s30, 32, %s7940_s10, [#allocation3]  }
0x1b68   :  { %6471 = dma.done.wait [#allocation3], 32  }
0x1b69   :  { %6472 = vsyncadd [#allocation3], 4294967264 }
0x1b6a   :  { %4742 = vsyncpa [#allocation3], 1 }

</bundles_post_ra>
